<compile_context>
chip_gen: v6e
topology: v6e:2x2x1
jax: 0.10.0
libtpu: 0.0.40
codegen_flags: <defaults>
</compile_context>

<pallas_src>
import functools

import jax
import jax.numpy as jnp
from jax import lax
from jax.experimental import pallas as pl
from jax.experimental.pallas import tpu as pltpu

D_IN = 700     # EMBED_SIZE['sent2vec+dense']
D_HID = 1024   # lay1 out features
D_OUT = 600    # lay2 out features
EPS = 1e-12    # F.normalize default eps


def _round_up(n, m):
    return ((n + m - 1) // m) * m


def sent_finetune_kernel(x_ref, w1_ref, b1_ref, w2_ref, b2_ref, out_ref):
    # x_ref : (TM, 700)   f32
    # w1_ref: (700, 1024) bf16 ; b1_ref: (1, 1024) f32
    # w2_ref: (1024, 600) bf16 ; b2_ref: (1, 600)  f32
    # out_ref: (TM, 600)  f32
    x = x_ref[...].astype(jnp.bfloat16)                                  # cast in-kernel

    # lay1 + ReLU (bf16 MXU operands, f32 accumulate, f32 elementwise)
    h = jnp.dot(x, w1_ref[...], preferred_element_type=jnp.float32) + b1_ref[...]
    h = jnp.maximum(h, 0.0)                                              # (TM, 1024)

    # lay2
    y = jnp.dot(h.astype(jnp.bfloat16), w2_ref[...],
                preferred_element_type=jnp.float32) + b2_ref[...]        # (TM, 600)

    # F.normalize(dim=-1): y / max(||y||, eps) == y * rsqrt(max(sum(y^2), eps^2))
    sumsq = jnp.sum(y * y, axis=-1, keepdims=True)                       # (TM, 1)
    inv = lax.rsqrt(jnp.maximum(sumsq, EPS * EPS))                       # EUP rsqrt
    out_ref[...] = (y * inv).astype(out_ref.dtype)


def init_params(key=None):
    """Deterministic synthetic f32 parameters (shapes match the module __init__)."""
    if key is None:
        key = jax.random.PRNGKey(0)
    ks = jax.random.split(key, 4)
    w1 = jax.random.uniform(ks[0], (D_IN, D_HID), jnp.float32, -1.0, 1.0) / jnp.sqrt(D_IN)
    b1 = jax.random.uniform(ks[1], (D_HID,), jnp.float32, -1.0, 1.0) / jnp.sqrt(D_IN)
    w2 = jax.random.uniform(ks[2], (D_HID, D_OUT), jnp.float32, -1.0, 1.0) / jnp.sqrt(D_HID)
    b2 = jax.random.uniform(ks[3], (D_OUT,), jnp.float32, -1.0, 1.0) / jnp.sqrt(D_HID)
    return dict(w1=w1, b1=b1, w2=w2, b2=b2)


def prepare_params(params):
    """One-time cast/layout of the parameters (hoisted out of the per-call path)."""
    return dict(
        w1=params["w1"].astype(jnp.bfloat16),                    # (700, 1024)
        b1=params["b1"].astype(jnp.float32).reshape(1, D_HID),   # (1, 1024)
        w2=params["w2"].astype(jnp.bfloat16),                    # (1024, 600)
        b2=params["b2"].astype(jnp.float32).reshape(1, D_OUT),   # (1, 600)
    )


@functools.partial(jax.jit, static_argnames=("block_m",))
def sent_finetune_forward(x, prepared, *, block_m=256):
    """x: (..., 700) float -> (..., 600) float32, L2-normalized on the last dim."""
    assert x.shape[-1] == D_IN
    lead_shape = x.shape[:-1]
    x2 = x.reshape(-1, D_IN).astype(jnp.float32)
    bs = x2.shape[0]

    # Batch tile: multiple of 16 (bf16 sublane packing); prefer >= 2 grid steps
    # so the "parallel" batch axis can split across both v7x TensorCores.
    tm = max(16, min(block_m, _round_up(pl.cdiv(bs, 2), 16)))
    grid_m = pl.cdiv(bs, tm)   # tail block clipped by Pallas; OOB writes dropped

    out = pl.pallas_call(
        sent_finetune_kernel,
        out_shape=jax.ShapeDtypeStruct((bs, D_OUT), jnp.float32),
        grid_spec=pltpu.PrefetchScalarGridSpec(
            num_scalar_prefetch=0,
            grid=(grid_m,),
            in_specs=[
                pl.BlockSpec((tm, D_IN), lambda i: (i, 0)),
                pl.BlockSpec((D_IN, D_HID), lambda i: (0, 0)),   # resident weights
                pl.BlockSpec((1, D_HID), lambda i: (0, 0)),
                pl.BlockSpec((D_HID, D_OUT), lambda i: (0, 0)),
                pl.BlockSpec((1, D_OUT), lambda i: (0, 0)),
            ],
            out_specs=pl.BlockSpec((tm, D_OUT), lambda i: (i, 0)),
        ),
        compiler_params=pltpu.CompilerParams(
            dimension_semantics=("parallel",)),
    )(x2, prepared["w1"], prepared["b1"], prepared["w2"], prepared["b2"])

    return out.reshape(*lead_shape, D_OUT)


if __name__ == "__main__":
    # Small shapes consistent with the module: sentence embeddings with a
    # leading (batch, n_sents) structure and embed_dim = 700.
    key = jax.random.PRNGKey(0)
    x = jax.random.normal(key, (2, 8, D_IN), jnp.float32)

    params = init_params()
    prepared = prepare_params(params)          # hoisted: done once, reused per call

    out = sent_finetune_forward(x, prepared)
    jax.block_until_ready(out)

    assert out.shape == (2, 8, D_OUT) and out.dtype == jnp.float32

    # Pure-JAX f32 reference (kernel uses bf16 MXU operands -> small tolerance).
    h_ref = jnp.maximum(x @ params["w1"] + params["b1"], 0.0)
    y_ref = h_ref @ params["w2"] + params["b2"]
    ref = y_ref / jnp.maximum(jnp.linalg.norm(y_ref, axis=-1, keepdims=True), EPS)

    norms = jnp.linalg.norm(out, axis=-1)
    assert bool(jnp.all(jnp.abs(norms - 1.0) < 1e-3))     # rows are unit-normalized
    assert bool(jnp.max(jnp.abs(out - ref)) < 2e-2)       # matches f32 reference
    print("KERNEL_OK")
</pallas_src>

<mosaic_0001>
module attributes {stable_mosaic.version = 11 : i64} {
  func.func @sent_finetune_kernel(%arg0: i32, %arg1: memref<16x700xf32, #tpu.memory_space<vmem>>, %arg2: memref<700x1024xbf16, #tpu.memory_space<vmem>>, %arg3: memref<1x1024xf32, #tpu.memory_space<vmem>>, %arg4: memref<1024x600xbf16, #tpu.memory_space<vmem>>, %arg5: memref<1x600xf32, #tpu.memory_space<vmem>>, %arg6: memref<16x600xf32, #tpu.memory_space<vmem>>) attributes {dimension_semantics = [#tpu.dimension_semantics<parallel>], iteration_bounds = array<i64: 1>, scalar_prefetch = 0 : i64, scratch_operands = 0 : i64, tpu.core_type = #tpu.core_type<tc>, window_params = [{transform_indices = @transform_0, window_bounds = array<i64: 16, 700>}, {pipeline_mode = #tpu.pipeline_mode<synchronous>, transform_indices = @transform_1, window_bounds = array<i64: 700, 1024>}, {pipeline_mode = #tpu.pipeline_mode<synchronous>, transform_indices = @transform_2, window_bounds = array<i64: 1, 1024>}, {pipeline_mode = #tpu.pipeline_mode<synchronous>, transform_indices = @transform_3, window_bounds = array<i64: 1024, 600>}, {pipeline_mode = #tpu.pipeline_mode<synchronous>, transform_indices = @transform_4, window_bounds = array<i64: 1, 600>}, {transform_indices = @transform_5, window_bounds = array<i64: 16, 600>}]} {
    %c0 = arith.constant 0 : index
    %c0_0 = arith.constant 0 : index
    %0 = vector.load %arg1[%c0, %c0_0] : memref<16x700xf32, #tpu.memory_space<vmem>>, vector<16x700xf32>
    %1 = arith.truncf %0 : vector<16x700xf32> to vector<16x700xbf16>
    %c0_1 = arith.constant 0 : index
    %c0_2 = arith.constant 0 : index
    %2 = vector.load %arg2[%c0_1, %c0_2] : memref<700x1024xbf16, #tpu.memory_space<vmem>>, vector<700x1024xbf16>
    %cst = arith.constant dense<0.000000e+00> : vector<16x1024xf32>
    %3 = tpu.matmul %1, %2, %cst {dimension_numbers = #tpu.dot_dimension_numbers<[1], [0], [0], [1], [0, 0, 1, 1], [], []>} : vector<16x700xbf16>, vector<700x1024xbf16>, vector<16x1024xf32> -> vector<16x1024xf32>
    %c0_3 = arith.constant 0 : index
    %c0_4 = arith.constant 0 : index
    %4 = vector.load %arg3[%c0_3, %c0_4] : memref<1x1024xf32, #tpu.memory_space<vmem>>, vector<1x1024xf32>
    %5 = vector.broadcast %4 : vector<1x1024xf32> to vector<16x1024xf32>
    %6 = arith.addf %3, %5 : vector<16x1024xf32>
    %cst_5 = arith.constant 0.000000e+00 : f32
    %7 = vector.broadcast %cst_5 : f32 to vector<16x1024xf32>
    %8 = arith.maximumf %6, %7 : vector<16x1024xf32>
    %9 = arith.truncf %8 : vector<16x1024xf32> to vector<16x1024xbf16>
    %c0_6 = arith.constant 0 : index
    %c0_7 = arith.constant 0 : index
    %10 = vector.load %arg4[%c0_6, %c0_7] : memref<1024x600xbf16, #tpu.memory_space<vmem>>, vector<1024x600xbf16>
    %cst_8 = arith.constant dense<0.000000e+00> : vector<16x600xf32>
    %11 = tpu.matmul %9, %10, %cst_8 {dimension_numbers = #tpu.dot_dimension_numbers<[1], [0], [0], [1], [0, 0, 1, 1], [], []>} : vector<16x1024xbf16>, vector<1024x600xbf16>, vector<16x600xf32> -> vector<16x600xf32>
    %c0_9 = arith.constant 0 : index
    %c0_10 = arith.constant 0 : index
    %12 = vector.load %arg5[%c0_9, %c0_10] : memref<1x600xf32, #tpu.memory_space<vmem>>, vector<1x600xf32>
    %13 = vector.broadcast %12 : vector<1x600xf32> to vector<16x600xf32>
    %14 = arith.addf %11, %13 : vector<16x600xf32>
    %15 = arith.mulf %14, %14 : vector<16x600xf32>
    %cst_11 = arith.constant dense<0.000000e+00> : vector<16xf32>
    %16 = vector.multi_reduction <add>, %15, %cst_11 [1] : vector<16x600xf32> to vector<16xf32>
    %17 = vector.shape_cast %16 : vector<16xf32> to vector<16x1xf32>
    %cst_12 = arith.constant 1.000000e-24 : f32
    %18 = vector.broadcast %cst_12 : f32 to vector<16x1xf32>
    %19 = arith.maximumf %17, %18 : vector<16x1xf32>
    %20 = math.rsqrt %19 : vector<16x1xf32>
    %21 = vector.broadcast %20 : vector<16x1xf32> to vector<16x600xf32>
    %22 = arith.mulf %14, %21 : vector<16x600xf32>
    %c0_13 = arith.constant 0 : index
    %c0_14 = arith.constant 0 : index
    %23 = vector.load %arg6[%c0_13, %c0_14] : memref<16x600xf32, #tpu.memory_space<vmem>>, vector<16x600xf32>
    tpu.vector_store %arg6[%c0_13, %c0_14], %22 {strides = array<i32>} : memref<16x600xf32, #tpu.memory_space<vmem>>, vector<16x600xf32>,
    return
  }
  func.func @transform_0(%arg0: i32) -> (i32, i32) {
    %c0_i32 = arith.constant 0 : i32
    %c0_i32_0 = arith.constant 0 : i32
    return %arg0, %c0_i32 : i32, i32
  }
  func.func @transform_1(%arg0: i32) -> (i32, i32) {
    %c0_i32 = arith.constant 0 : i32
    %c0_i32_0 = arith.constant 0 : i32
    %c0_i32_1 = arith.constant 0 : i32
    return %c0_i32, %c0_i32_0 : i32, i32
  }
  func.func @transform_2(%arg0: i32) -> (i32, i32) {
    %c0_i32 = arith.constant 0 : i32
    %c0_i32_0 = arith.constant 0 : i32
    %c0_i32_1 = arith.constant 0 : i32
    return %c0_i32, %c0_i32_0 : i32, i32
  }
  func.func @transform_3(%arg0: i32) -> (i32, i32) {
    %c0_i32 = arith.constant 0 : i32
    %c0_i32_0 = arith.constant 0 : i32
    %c0_i32_1 = arith.constant 0 : i32
    return %c0_i32, %c0_i32_0 : i32, i32
  }
  func.func @transform_4(%arg0: i32) -> (i32, i32) {
    %c0_i32 = arith.constant 0 : i32
    %c0_i32_0 = arith.constant 0 : i32
    %c0_i32_1 = arith.constant 0 : i32
    return %c0_i32, %c0_i32_0 : i32, i32
  }
  func.func @transform_5(%arg0: i32) -> (i32, i32) {
    %c0_i32 = arith.constant 0 : i32
    %c0_i32_0 = arith.constant 0 : i32
    return %arg0, %c0_i32 : i32, i32
  }
}

</mosaic_0001>

<bundles_post_ra>
// kernel: sent_finetune_forward.1
= control target key start
LH: loop header
LB: loop body
LE: loop exit
PB: predicated region body
PF: predicated region fallthrough
CT: control target
= control target key end

     0   :  { %vm2186_vm0 = vcmask 490496   ;;  %vm2190_vm1 = vcmask 1045504   ;;  %s8950_s0 = inlined_call_operand.vmem [shape: f32[16,700], index: 0, kind: input, shape index: {}]   ;;  %s8951_s1 = inlined_call_operand.vmem [shape: bf16[700,1024], index: 1, kind: input, shape index: {}]   ;;  %s8952_s2 = inlined_call_operand.vmem [shape: f32[1,1024], index: 2, kind: input, shape index: {}]   ;;  %s8953_s3 = inlined_call_operand.vmem [shape: bf16[1024,600], index: 3, kind: input, shape index: {}]   ;;  %s8954_s4 = inlined_call_operand.vmem [shape: f32[1,600], index: 4, kind: input, shape index: {}]   ;;  %s8955_s5 = inlined_call_operand.hbm [shape: f32[16,600], index: 5, kind: output, shape index: {}]  }
   0x1   :  { %v96_v0 = vld [vmem:[%s8951_s1 + $0x1c0] sm:$0xff]  ;;  %v23_v54 = vld [vmem:[%s8950_s0 + $0x8] sm:$0xff]  ;;  %v29_v55 = vld [vmem:[%s8950_s0 + $0x38] sm:$0xff] }
   0x2   :  { %v100_v1 = vld [vmem:[%s8951_s1 + $0x1e0] sm:$0xff]  ;;  %v6778_v58 = vpack.c.bf16 %v29_v55, %v23_v54  ;;  %v25_v59 = vld [vmem:[%s8950_s0 + $0x18] sm:$0xff]  ;;  %v31_v60 = vld [vmem:[%s8950_s0 + $0x48] sm:$0xff] }
   0x3   :  { %v224_v2 = vld [vmem:[%s8951_s1 + $0x5c0] sm:$0xff]  ;;  %v5460_v3 = vcombine.high %v96_v0, %v100_v1  ;;  %v5459_v5 = vcombine.low %v96_v0, %v100_v1  ;;  %v6792_v63 = vpack.c.bf16 %v31_v60, %v25_v59 }
   0x4   :  { %v228_v4 = vld [vmem:[%s8951_s1 + $0x5e0] sm:$0xff]  ;;  %2247 = vmatprep.mubr.bf16.mxu0 %v6778_v58 }
   0x5   :  { %v88_v6 = vld [vmem:[%s8951_s1 + $0x180] sm:$0xff]  ;;  %v5588_v8 = vcombine.high %v224_v2, %v228_v4  ;;  %v5587_v9 = vcombine.low %v224_v2, %v228_v4  ;;  %2215 = vmatprep.subr.bf16.mxu0 %v5460_v3  ;;  %2290 = vmatprep.mubr.bf16.mxu1 %v6792_v63 }
   0x6   :  { %v92_v7 = vld [vmem:[%s8951_s1 + $0x1a0] sm:$0xff]  ;;  %2216 = vmatpush1.bf16.msra.mxu0 %v5459_v5 }
   0x7   :  { %v5452_v10 = vcombine.high %v88_v6, %v92_v7  ;;  %v216_v11 = vld [vmem:[%s8951_s1 + $0x580] sm:$0xff]  ;;  %2258 = vmatprep.subr.bf16.mxu1 %v5588_v8  ;;  %v5451_v18 = vcombine.low %v88_v6, %v92_v7 }
   0x8   :  { %v220_v12 = vld [vmem:[%s8951_s1 + $0x5a0] sm:$0xff]  ;;  %2259 = vmatpush1.bf16.msra.mxu1 %v5587_v9 }
   0x9   :  { %v80_v13 = vld [vmem:[%s8951_s1 + $0x140] sm:$0xff]  ;;  %v5580_v14 = vcombine.high %v216_v11, %v220_v12  ;;  %2217 = vmatprep.subr.bf16.mxu0 %v5452_v10  ;;  %v5579_v19 = vcombine.low %v216_v11, %v220_v12 }
   0xa   :  { %v84_v15 = vld [vmem:[%s8951_s1 + $0x160] sm:$0xff]  ;;  %2218 = vmatpush1.bf16.msra.mxu0 %v5451_v18 }
   0xb   :  { %v208_v16 = vld [vmem:[%s8951_s1 + $0x540] sm:$0xff]  ;;  %v5444_v20 = vcombine.high %v80_v13, %v84_v15  ;;  %2260 = vmatprep.subr.bf16.mxu1 %v5580_v14  ;;  %v5443_v26 = vcombine.low %v80_v13, %v84_v15 }
   0xc   :  { %v212_v17 = vld [vmem:[%s8951_s1 + $0x560] sm:$0xff]  ;;  %2261 = vmatpush1.bf16.msra.mxu1 %v5579_v19 }
   0xd   :  { %v5572_v21 = vcombine.high %v208_v16, %v212_v17  ;;  %v72_v22 = vld [vmem:[%s8951_s1 + $0x100] sm:$0xff]  ;;  %2219 = vmatprep.subr.bf16.mxu0 %v5444_v20  ;;  %v5571_v27 = vcombine.low %v208_v16, %v212_v17 }
   0xe   :  { %v76_v23 = vld [vmem:[%s8951_s1 + $0x120] sm:$0xff]  ;;  %2220 = vmatpush1.bf16.msra.mxu0 %v5443_v26 }
   0xf   :  { %v200_v24 = vld [vmem:[%s8951_s1 + $0x500] sm:$0xff]  ;;  %v5436_v28 = vcombine.high %v72_v22, %v76_v23  ;;  %2262 = vmatprep.subr.bf16.mxu1 %v5572_v21  ;;  %v5435_v34 = vcombine.low %v72_v22, %v76_v23 }
  0x10   :  { %v204_v25 = vld [vmem:[%s8951_s1 + $0x520] sm:$0xff]  ;;  %2263 = vmatpush1.bf16.msra.mxu1 %v5571_v27 }
  0x11   :  { %v5564_v29 = vcombine.high %v200_v24, %v204_v25  ;;  %v64_v30 = vld [vmem:[%s8951_s1 + $0xc0] sm:$0xff]  ;;  %2221 = vmatprep.subr.bf16.mxu0 %v5436_v28  ;;  %v5563_v35 = vcombine.low %v200_v24, %v204_v25 }
  0x12   :  { %v68_v31 = vld [vmem:[%s8951_s1 + $0xe0] sm:$0xff]  ;;  %2222 = vmatpush1.bf16.msra.mxu0 %v5435_v34 }
  0x13   :  { %v192_v32 = vld [vmem:[%s8951_s1 + $0x4c0] sm:$0xff]  ;;  %v5428_v36 = vcombine.high %v64_v30, %v68_v31  ;;  %2264 = vmatprep.subr.bf16.mxu1 %v5564_v29  ;;  %v5427_v42 = vcombine.low %v64_v30, %v68_v31 }
  0x14   :  { %v196_v33 = vld [vmem:[%s8951_s1 + $0x4e0] sm:$0xff]  ;;  %2265 = vmatpush1.bf16.msra.mxu1 %v5563_v35 }
  0x15   :  { %v5556_v37 = vcombine.high %v192_v32, %v196_v33  ;;  %v56_v38 = vld [vmem:[%s8951_s1 + $0x80] sm:$0xff]  ;;  %2223 = vmatprep.subr.bf16.mxu0 %v5428_v36  ;;  %v5555_v43 = vcombine.low %v192_v32, %v196_v33 }
  0x16   :  { %v60_v39 = vld [vmem:[%s8951_s1 + $0xa0] sm:$0xff]  ;;  %2224 = vmatpush1.bf16.msra.mxu0 %v5427_v42 }
  0x17   :  { %v184_v40 = vld [vmem:[%s8951_s1 + $0x480] sm:$0xff]  ;;  %v5420_v44 = vcombine.high %v56_v38, %v60_v39  ;;  %2266 = vmatprep.subr.bf16.mxu1 %v5556_v37  ;;  %v5419_v50 = vcombine.low %v56_v38, %v60_v39 }
  0x18   :  { %v188_v41 = vld [vmem:[%s8951_s1 + $0x4a0] sm:$0xff]  ;;  %2267 = vmatpush1.bf16.msra.mxu1 %v5555_v43 }
  0x19   :  { %v5548_v45 = vcombine.high %v184_v40, %v188_v41  ;;  %v48_v46 = vld [vmem:[%s8951_s1 + $0x40] sm:$0xff]  ;;  %2225 = vmatprep.subr.bf16.mxu0 %v5420_v44  ;;  %v5547_v51 = vcombine.low %v184_v40, %v188_v41 }
  0x1a   :  { %v52_v47 = vld [vmem:[%s8951_s1 + $0x60] sm:$0xff]  ;;  %2226 = vmatpush1.bf16.msra.mxu0 %v5419_v50 }
  0x1b   :  { %v176_v48 = vld [vmem:[%s8951_s1 + $0x440] sm:$0xff]  ;;  %v5412_v52 = vcombine.high %v48_v46, %v52_v47  ;;  %2268 = vmatprep.subr.bf16.mxu1 %v5548_v45  ;;  %v5411_v0 = vcombine.low %v48_v46, %v52_v47 }
  0x1c   :  { %v180_v49 = vld [vmem:[%s8951_s1 + $0x460] sm:$0xff]  ;;  %2269 = vmatpush1.bf16.msra.mxu1 %v5547_v51 }
  0x1d   :  { %v40_v53 = vld [vmem:[%s8951_s1] sm:$0xff]  ;;  %v5540_v56 = vcombine.high %v176_v48, %v180_v49  ;;  %2227 = vmatprep.subr.bf16.mxu0 %v5412_v52  ;;  %v5539_v1 = vcombine.low %v176_v48, %v180_v49 }
  0x1e   :  { %v44_v57 = vld [vmem:[%s8951_s1 + $0x20] sm:$0xff]  ;;  %2228 = vmatpush1.bf16.msra.mxu0 %v5411_v0 }
  0x1f   :  { %v168_v61 = vld [vmem:[%s8951_s1 + $0x400] sm:$0xff]  ;;  %v5404_v2 = vcombine.high %v40_v53, %v44_v57  ;;  %2270 = vmatprep.subr.bf16.mxu1 %v5540_v56  ;;  %v5403_v8 = vcombine.low %v40_v53, %v44_v57 }
  0x20   :  { %v172_v62 = vld [vmem:[%s8951_s1 + $0x420] sm:$0xff]  ;;  %2271 = vmatpush1.bf16.msra.mxu1 %v5539_v1 }
  0x21   :  { %v5532_v3 = vcombine.high %v168_v61, %v172_v62  ;;  %v160_v4 = vld [vmem:[%s8951_s1 + $0x3c0] sm:$0xff]  ;;  %2229 = vmatprep.subr.bf16.mxu0 %v5404_v2  ;;  %v5531_v9 = vcombine.low %v168_v61, %v172_v62 }
  0x22   :  { %v164_v5 = vld [vmem:[%s8951_s1 + $0x3e0] sm:$0xff]  ;;  %2230 = vmatpush1.bf16.msra.mxu0 %v5403_v8  ;;  %v97_v8 = vld [vmem:[%s8951_s1 + $0x1c8] sm:$0xff] }
  0x23   :  { %v288_v6 = vld [vmem:[%s8951_s1 + $0x7c0] sm:$0xff]  ;;  %v5524_v10 = vcombine.high %v160_v4, %v164_v5  ;;  %2272 = vmatprep.subr.bf16.mxu1 %v5532_v3  ;;  %v5523_v16 = vcombine.low %v160_v4, %v164_v5 }
  0x24   :  { %v292_v7 = vld [vmem:[%s8951_s1 + $0x7e0] sm:$0xff]  ;;  %2273 = vmatpush1.bf16.msra.mxu1 %v5531_v9  ;;  %v101_v9 = vld [vmem:[%s8951_s1 + $0x1e8] sm:$0xff] }
  0x25   :  { %v5652_v11 = vcombine.high %v288_v6, %v292_v7  ;;  %v152_v12 = vld [vmem:[%s8951_s1 + $0x380] sm:$0xff]  ;;  %2231 = vmatprep.subr.bf16.mxu0 %v5524_v10  ;;  %v5651_v17 = vcombine.low %v288_v6, %v292_v7 }
  0x26   :  { %v156_v13 = vld [vmem:[%s8951_s1 + $0x3a0] sm:$0xff]  ;;  %2232 = vmatpush2.bf16.msra.mxu0 %v5523_v16 }
  0x27   :  { %v280_v14 = vld [vmem:[%s8951_s1 + $0x780] sm:$0xff]  ;;  %v5516_v18 = vcombine.high %v152_v12, %v156_v13  ;;  %2274 = vmatprep.subr.bf16.mxu1 %v5652_v11  ;;  %v5515_v24 = vcombine.low %v152_v12, %v156_v13  ;;  %v28_v12 = vld [vmem:[%s8950_s0 + $0x30] sm:$0xff] }
  0x28   :  { %v284_v15 = vld [vmem:[%s8951_s1 + $0x7a0] sm:$0xff]  ;;  %2275 = vmatpush2.bf16.msra.mxu1 %v5651_v17  ;;  %v5462_v17 = vcombine.high %v97_v8, %v101_v9 }
  0x29   :  { %v5644_v19 = vcombine.high %v280_v14, %v284_v15  ;;  %v144_v20 = vld [vmem:[%s8951_s1 + $0x340] sm:$0xff]  ;;  %2233 = vmatprep.subr.bf16.mxu0 %v5516_v18  ;;  %v5643_v25 = vcombine.low %v280_v14, %v284_v15  ;;  %v24_v14 = vld [vmem:[%s8950_s0 + $0x10] sm:$0xff] }
  0x2a   :  { %v148_v21 = vld [vmem:[%s8951_s1 + $0x360] sm:$0xff]  ;;  %2234 = vmatpush2.bf16.msra.mxu0 %v5515_v24  ;;  %v33_v24 = vld [vmem:[%s8950_s0 + $0x58] sm:$0xff] }
  0x2b   :  { %v272_v22 = vld [vmem:[%s8951_s1 + $0x740] sm:$0xff]  ;;  %v5508_v26 = vcombine.high %v144_v20, %v148_v21  ;;  %2276 = vmatprep.subr.bf16.mxu1 %v5644_v19  ;;  %v5507_v32 = vcombine.low %v144_v20, %v148_v21  ;;  %v89_v20 = vld [vmem:[%s8951_s1 + $0x188] sm:$0xff] }
  0x2c   :  { %v276_v23 = vld [vmem:[%s8951_s1 + $0x760] sm:$0xff]  ;;  %2277 = vmatpush2.bf16.msra.mxu1 %v5643_v25 }
  0x2d   :  { %v5636_v27 = vcombine.high %v272_v22, %v276_v23  ;;  %v136_v28 = vld [vmem:[%s8951_s1 + $0x300] sm:$0xff]  ;;  %2235 = vmatprep.subr.bf16.mxu0 %v5508_v26  ;;  %v5635_v33 = vcombine.low %v272_v22, %v276_v23  ;;  %v93_v22 = vld [vmem:[%s8951_s1 + $0x1a8] sm:$0xff] }
  0x2e   :  { %v140_v29 = vld [vmem:[%s8951_s1 + $0x320] sm:$0xff]  ;;  %2236 = vmatpush2.bf16.msra.mxu0 %v5507_v32  ;;  %v27_v23 = vld [vmem:[%s8950_s0 + $0x28] sm:$0xff] }
  0x2f   :  { %v264_v30 = vld [vmem:[%s8951_s1 + $0x700] sm:$0xff]  ;;  %v5500_v34 = vcombine.high %v136_v28, %v140_v29  ;;  %2278 = vmatprep.subr.bf16.mxu1 %v5636_v27  ;;  %v5499_v40 = vcombine.low %v136_v28, %v140_v29  ;;  %v5461_v27 = vcombine.low %v97_v8, %v101_v9  ;;  %v5454_v29 = vcombine.high %v89_v20, %v93_v22 }
  0x30   :  { %v268_v31 = vld [vmem:[%s8951_s1 + $0x720] sm:$0xff]  ;;  %2279 = vmatpush2.bf16.msra.mxu1 %v5635_v33  ;;  %v6944_v32 = vpack.c.bf16 %v33_v24, %v27_v23  ;;  %v81_v33 = vld [vmem:[%s8951_s1 + $0x148] sm:$0xff] }
  0x31   :  { %v5628_v35 = vcombine.high %v264_v30, %v268_v31  ;;  %v128_v36 = vld [vmem:[%s8951_s1 + $0x2c0] sm:$0xff]  ;;  %2237 = vmatprep.subr.bf16.mxu0 %v5500_v34  ;;  %v5627_v41 = vcombine.low %v264_v30, %v268_v31  ;;  %v85_v34 = vld [vmem:[%s8951_s1 + $0x168] sm:$0xff] }
  0x32   :  { %v132_v37 = vld [vmem:[%s8951_s1 + $0x2e0] sm:$0xff]  ;;  %2238 = vmatpush2.bf16.msra.mxu0 %v5499_v40  ;;  %v5446_v40 = vcombine.high %v81_v33, %v85_v34 }
  0x33   :  { %v256_v38 = vld [vmem:[%s8951_s1 + $0x6c0] sm:$0xff]  ;;  %v5492_v42 = vcombine.high %v128_v36, %v132_v37  ;;  %2280 = vmatprep.subr.bf16.mxu1 %v5628_v35  ;;  %v5491_v48 = vcombine.low %v128_v36, %v132_v37  ;;  %v5453_v36 = vcombine.low %v89_v20, %v93_v22  ;;  %v165_v20 = vld [vmem:[%s8951_s1 + $0x3e8] sm:$0xff] }
  0x34   :  { %v260_v39 = vld [vmem:[%s8951_s1 + $0x6e0] sm:$0xff]  ;;  %2281 = vmatpush2.bf16.msra.mxu1 %v5627_v41  ;;  %v73_v41 = vld [vmem:[%s8951_s1 + $0x108] sm:$0xff] }
  0x35   :  { %v5620_v43 = vcombine.high %v256_v38, %v260_v39  ;;  %v120_v44 = vld [vmem:[%s8951_s1 + $0x280] sm:$0xff]  ;;  %2239 = vmatprep.subr.bf16.mxu0 %v5492_v42  ;;  %v5619_v49 = vcombine.low %v256_v38, %v260_v39  ;;  %v77_v42 = vld [vmem:[%s8951_s1 + $0x128] sm:$0xff] }
  0x36   :  { %v124_v45 = vld [vmem:[%s8951_s1 + $0x2a0] sm:$0xff]  ;;  %2240 = vmatpush2.bf16.msra.mxu0 %v5491_v48  ;;  %v65_v48 = vld [vmem:[%s8951_s1 + $0xc8] sm:$0xff] }
  0x37   :  { %v248_v46 = vld [vmem:[%s8951_s1 + $0x680] sm:$0xff]  ;;  %v5484_v50 = vcombine.high %v120_v44, %v124_v45  ;;  %2282 = vmatprep.subr.bf16.mxu1 %v5620_v43  ;;  %v5483_v56 = vcombine.low %v120_v44, %v124_v45  ;;  %v5445_v44 = vcombine.low %v81_v33, %v85_v34 }
  0x38   :  { %v252_v47 = vld [vmem:[%s8951_s1 + $0x6a0] sm:$0xff]  ;;  %2283 = vmatpush2.bf16.msra.mxu1 %v5619_v49  ;;  %v5438_v49 = vcombine.high %v73_v41, %v77_v42 }
  0x39   :  { %v5612_v51 = vcombine.high %v248_v46, %v252_v47  ;;  %v112_v52 = vld [vmem:[%s8951_s1 + $0x240] sm:$0xff]  ;;  %2241 = vmatprep.subr.bf16.mxu0 %v5484_v50  ;;  %v5611_v57 = vcombine.low %v248_v46, %v252_v47  ;;  %v69_v50 = vld [vmem:[%s8951_s1 + $0xe8] sm:$0xff] }
  0x3a   :  { %v116_v53 = vld [vmem:[%s8951_s1 + $0x260] sm:$0xff]  ;;  %2242 = vmatpush2.bf16.msra.mxu0 %v5483_v56  ;;  %v57_v56 = vld [vmem:[%s8951_s1 + $0x88] sm:$0xff] }
  0x3b   :  { %v240_v54 = vld [vmem:[%s8951_s1 + $0x640] sm:$0xff]  ;;  %v5476_v59 = vcombine.high %v112_v52, %v116_v53  ;;  %2284 = vmatprep.subr.bf16.mxu1 %v5612_v51  ;;  %v5475_v2 = vcombine.low %v112_v52, %v116_v53  ;;  %v5437_v52 = vcombine.low %v73_v41, %v77_v42 }
  0x3c   :  { %v244_v55 = vld [vmem:[%s8951_s1 + $0x660] sm:$0xff]  ;;  %2285 = vmatpush2.bf16.msra.mxu1 %v5611_v57  ;;  %v5430_v57 = vcombine.high %v65_v48, %v69_v50 }
  0x3d   :  { %v5604_v60 = vcombine.high %v240_v54, %v244_v55  ;;  %v104_v61 = vld [vmem:[%s8951_s1 + $0x200] sm:$0xff]  ;;  %2243 = vmatprep.subr.bf16.mxu0 %v5476_v59  ;;  %v5603_v3 = vcombine.low %v240_v54, %v244_v55  ;;  %v61_v59 = vld [vmem:[%s8951_s1 + $0xa8] sm:$0xff] }
  0x3e   :  { %v108_v62 = vld [vmem:[%s8951_s1 + $0x220] sm:$0xff]  ;;  %2244 = vmatpush2.bf16.msra.mxu0 %v5475_v2  ;;  %v49_v2 = vld [vmem:[%s8951_s1 + $0x48] sm:$0xff] }
  0x3f   :  { %v232_v0 = vld [vmem:[%s8951_s1 + $0x600] sm:$0xff]  ;;  %v5468_v4 = vcombine.high %v104_v61, %v108_v62  ;;  %2286 = vmatprep.subr.bf16.mxu1 %v5604_v60  ;;  %v5467_v10 = vcombine.low %v104_v61, %v108_v62  ;;  %v5429_v61 = vcombine.low %v65_v48, %v69_v50  ;;  %v141_v48 = vld [vmem:[%s8951_s1 + $0x328] sm:$0xff] }
  0x40   :  { %v236_v1 = vld [vmem:[%s8951_s1 + $0x620] sm:$0xff]  ;;  %2287 = vmatpush2.bf16.msra.mxu1 %v5603_v3  ;;  %v5422_v3 = vcombine.high %v57_v56, %v61_v59 }
  0x41   :  { %v5596_v5 = vcombine.high %v232_v0, %v236_v1  ;;  %v352_v6 = vld [vmem:[%s8951_s1 + $0x9c0] sm:$0xff]  ;;  %2245 = vmatprep.subr.bf16.mxu0 %v5468_v4  ;;  %v5595_v13 = vcombine.low %v232_v0, %v236_v1  ;;  %v53_v4 = vld [vmem:[%s8951_s1 + $0x68] sm:$0xff] }
  0x42   :  { %v356_v7 = vld [vmem:[%s8951_s1 + $0x9e0] sm:$0xff]  ;;  %2246 = vmatpush2.bf16.msra.mxu0 %v5467_v10  ;;  %v41_v10 = vld [vmem:[%s8951_s1 + $0x8] sm:$0xff] }
  0x43   :  { %v22_v11 = vld [vmem:[%s8950_s0] sm:$0xff]  ;;  %v5716_v16 = vcombine.high %v352_v6, %v356_v7  ;;  %2288 = vmatprep.subr.bf16.mxu1 %v5596_v5  ;;  %v5715_v26 = vcombine.low %v352_v6, %v356_v7  ;;  %v5421_v6 = vcombine.low %v57_v56, %v61_v59  ;;  %v229_v59 = vld [vmem:[%s8951_s1 + $0x5e8] sm:$0xff] }
  0x44   :  { %v30_v15 = vld [vmem:[%s8950_s0 + $0x40] sm:$0xff]  ;;  %v6925_v21 = vpack.c.bf16 %v28_v12, %v22_v11  ;;  %2289 = vmatpush2.bf16.msra.mxu1 %v5595_v13  ;;  %v5414_v11 = vcombine.high %v49_v2, %v53_v4  ;;  %v45_v12 = vld [vmem:[%s8951_s1 + $0x28] sm:$0xff] }
  0x45   :  { %v344_v18 = vld [vmem:[%s8951_s1 + $0x980] sm:$0xff]  ;;  %v6936_v25 = vpack.c.bf16 %v30_v15, %v24_v14  ;;  %2301 = vmatprep.subr.bf16.mxu0 %v5716_v16  ;;  %2344 = vmatprep.subr.bf16.mxu1 %v5462_v17  ;;  %v5413_v14 = vcombine.low %v49_v2, %v53_v4  ;;  %v5405_v23 = vcombine.low %v41_v10, %v45_v12  ;;  %v217_v2 = vld [vmem:[%s8951_s1 + $0x588] sm:$0xff] }
  0x46   :  { %v348_v19 = vld [vmem:[%s8951_s1 + $0x9a0] sm:$0xff]  ;;  %2248 = vmatmul.mubr.bf16.vlgmr.msra.gmra.mxu0 %v6925_v21  ;;  %v221_v4 = vld [vmem:[%s8951_s1 + $0x5a8] sm:$0xff] }
  0x47   :  { %v5708_v28 = vcombine.high %v344_v18, %v348_v19  ;;  %v336_v30 = vld [vmem:[%s8951_s1 + $0x940] sm:$0xff]  ;;  %2291 = vmatmul.mubr.bf16.vlgmr.msra.gmra.mxu1 %v6936_v25  ;;  %2302 = vmatpush1.bf16.msra.mxu0 %v5715_v26  ;;  %v5707_v35 = vcombine.low %v344_v18, %v348_v19  ;;  %v161_v18 = vld [vmem:[%s8951_s1 + $0x3c8] sm:$0xff]  ;;  %v5406_v19 = vcombine.high %v41_v10, %v45_v12 }
  0x48   :  { %v340_v31 = vld [vmem:[%s8951_s1 + $0x960] sm:$0xff]  ;;  %2345 = vmatpush1.bf16.msra.mxu1 %v5461_v27  ;;  %5756 = vmatprep.mubr.msk.bf16.mxu0 %vm2186_vm0, %v6944_v32  ;;  %v5525_v33 = vcombine.low %v161_v18, %v165_v20  ;;  %v117_v10 = vld [vmem:[%s8951_s1 + $0x268] sm:$0xff] }
  0x49   :  { %2303 = vmatprep.subr.bf16.mxu0 %v5708_v28  ;;  %v5700_v37 = vcombine.high %v336_v30, %v340_v31  ;;  %v328_v38 = vld [vmem:[%s8951_s1 + $0x900] sm:$0xff]  ;;  %2346 = vmatprep.subr.bf16.mxu1 %v5454_v29  ;;  %v5699_v43 = vcombine.low %v336_v30, %v340_v31  ;;  %v153_v29 = vld [vmem:[%s8951_s1 + $0x388] sm:$0xff]  ;;  %v5526_v30 = vcombine.high %v161_v18, %v165_v20 }
  0x4a   :  { %v332_v39 = vld [vmem:[%s8951_s1 + $0x920] sm:$0xff]  ;;  %2376 = vmatprep.mubr.bf16.mxu1 %v6778_v58  ;;  %v157_v31 = vld [vmem:[%s8951_s1 + $0x3a8] sm:$0xff] }
  0x4b   :  { %2304 = vmatpush1.bf16.msra.mxu0 %v5707_v35  ;;  %v5692_v45 = vcombine.high %v328_v38, %v332_v39  ;;  %v320_v46 = vld [vmem:[%s8951_s1 + $0x8c0] sm:$0xff]  ;;  %v5691_v51 = vcombine.low %v328_v38, %v332_v39  ;;  %v145_v38 = vld [vmem:[%s8951_s1 + $0x348] sm:$0xff]  ;;  %v5518_v39 = vcombine.high %v153_v29, %v157_v31  ;;  %v5517_v42 = vcombine.low %v153_v29, %v157_v31 }
  0x4c   :  { %2347 = vmatpush1.bf16.msra.mxu1 %v5453_v36  ;;  %2305 = vmatprep.subr.bf16.mxu0 %v5700_v37  ;;  %v324_v47 = vld [vmem:[%s8951_s1 + $0x8e0] sm:$0xff]  ;;  %v109_v18 = vld [vmem:[%s8951_s1 + $0x228] sm:$0xff] }
  0x4d   :  { %2348 = vmatprep.subr.bf16.mxu1 %v5446_v40  ;;  %v5684_v53 = vcombine.high %v320_v46, %v324_v47  ;;  %v312_v54 = vld [vmem:[%s8951_s1 + $0x880] sm:$0xff]  ;;  %v5683_v60 = vcombine.low %v320_v46, %v324_v47  ;;  %v149_v40 = vld [vmem:[%s8951_s1 + $0x368] sm:$0xff] }
  0x4e   :  { %v316_v55 = vld [vmem:[%s8951_s1 + $0x8a0] sm:$0xff]  ;;  %v137_v46 = vld [vmem:[%s8951_s1 + $0x308] sm:$0xff]  ;;  %v5510_v47 = vcombine.high %v145_v38, %v149_v40  ;;  %v5509_v50 = vcombine.low %v145_v38, %v149_v40 }
  0x4f   :  { %2306 = vmatpush1.bf16.msra.mxu0 %v5699_v43  ;;  %v5676_v62 = vcombine.high %v312_v54, %v316_v55  ;;  %v304_v0 = vld [vmem:[%s8951_s1 + $0x840] sm:$0xff]  ;;  %v5675_v5 = vcombine.low %v312_v54, %v316_v55  ;;  %v225_v54 = vld [vmem:[%s8951_s1 + $0x5c8] sm:$0xff]  ;;  %v5502_v55 = vcombine.high %v137_v46, %v141_v48 }
  0x50   :  { %2349 = vmatpush1.bf16.msra.mxu1 %v5445_v44  ;;  %2307 = vmatprep.subr.bf16.mxu0 %v5692_v45  ;;  %v308_v1 = vld [vmem:[%s8951_s1 + $0x860] sm:$0xff]  ;;  %v353_v29 = vld [vmem:[%s8951_s1 + $0x9c8] sm:$0xff] }
  0x51   :  { %2350 = vmatprep.subr.bf16.mxu1 %v5438_v49  ;;  %v5668_v7 = vcombine.high %v304_v0, %v308_v1  ;;  %v296_v8 = vld [vmem:[%s8951_s1 + $0x800] sm:$0xff]  ;;  %v5667_v13 = vcombine.low %v304_v0, %v308_v1  ;;  %v121_v0 = vld [vmem:[%s8951_s1 + $0x288] sm:$0xff] }
  0x52   :  { %v300_v9 = vld [vmem:[%s8951_s1 + $0x820] sm:$0xff]  ;;  %v125_v1 = vld [vmem:[%s8951_s1 + $0x2a8] sm:$0xff] }
  0x53   :  { %2308 = vmatpush1.bf16.msra.mxu0 %v5691_v51  ;;  %v5660_v15 = vcombine.high %v296_v8, %v300_v9  ;;  %v384_v16 = vld [vmem:[%s8951_s1 + $0xac0] sm:$0xff]  ;;  %v5659_v22 = vcombine.low %v296_v8, %v300_v9  ;;  %v5582_v8 = vcombine.high %v217_v2, %v221_v4  ;;  %v113_v9 = vld [vmem:[%s8951_s1 + $0x248] sm:$0xff]  ;;  %v5486_v12 = vcombine.high %v121_v0, %v125_v1 }
  0x54   :  { %2351 = vmatpush1.bf16.msra.mxu1 %v5437_v52  ;;  %2309 = vmatprep.subr.bf16.mxu0 %v5684_v53  ;;  %v388_v17 = vld [vmem:[%s8951_s1 + $0xae0] sm:$0x33]  ;;  %v129_v52 = vld [vmem:[%s8951_s1 + $0x2c8] sm:$0xff]  ;;  %v5478_v20 = vcombine.high %v113_v9, %v117_v10 }
  0x55   :  { %2352 = vmatprep.subr.bf16.mxu1 %v5430_v57  ;;  %v5748_v24 = vcombine.high %v384_v16, %v388_v17  ;;  %v5747_v26 = vcombine.low %v384_v16, %v388_v17  ;;  %v376_v27 = vld [vmem:[%s8951_s1 + $0xa80] sm:$0xff]  ;;  %v133_v53 = vld [vmem:[%s8951_s1 + $0x2e8] sm:$0xff]  ;;  %v32_v57 = vld [vmem:[%s8950_s0 + $0x50] sm:$0xff] }
  0x56   :  { %v380_v28 = vld [vmem:[%s8951_s1 + $0xaa0] sm:$0xff]  ;;  %v105_v17 = vld [vmem:[%s8951_s1 + $0x208] sm:$0xff] }
  0x57   :  { %2310 = vmatpush1.bf16.msra.mxu0 %v5683_v60  ;;  %v2192_v34 = vsel %vm2190_vm1, %v5747_v26, 0  ;;  %v5740_v35 = vcombine.high %v376_v27, %v380_v28  ;;  %v368_v36 = vld [vmem:[%s8951_s1 + $0xa40] sm:$0xff]  ;;  %v5739_v41 = vcombine.low %v376_v27, %v380_v28  ;;  %v193_v27 = vld [vmem:[%s8951_s1 + $0x4c8] sm:$0xff] }
  0x58   :  { %2353 = vmatpush1.bf16.msra.mxu1 %v5429_v61  ;;  %2311 = vmatprep.subr.bf16.mxu0 %v5676_v62  ;;  %v372_v37 = vld [vmem:[%s8951_s1 + $0xa60] sm:$0xff]  ;;  %v5501_v61 = vcombine.low %v137_v46, %v141_v48  ;;  %v5590_v62 = vcombine.high %v225_v54, %v229_v59  ;;  %v197_v28 = vld [vmem:[%s8951_s1 + $0x4e8] sm:$0xff] }
  0x59   :  { %2354 = vmatprep.subr.bf16.mxu1 %v5422_v3  ;;  %v5732_v43 = vcombine.high %v368_v36, %v372_v37  ;;  %v360_v44 = vld [vmem:[%s8951_s1 + $0xa00] sm:$0xff]  ;;  %v5731_v49 = vcombine.low %v368_v36, %v372_v37  ;;  %v5494_v3 = vcombine.high %v129_v52, %v133_v53  ;;  %v357_v31 = vld [vmem:[%s8951_s1 + $0x9e8] sm:$0xff] }
  0x5a   :  { %v364_v45 = vld [vmem:[%s8951_s1 + $0xa20] sm:$0xff]  ;;  %v185_v36 = vld [vmem:[%s8951_s1 + $0x488] sm:$0xff] }
  0x5b   :  { %2312 = vmatpush1.bf16.msra.mxu0 %v5675_v5  ;;  %v5724_v51 = vcombine.high %v360_v44, %v364_v45  ;;  %v26_v56 = vld [vmem:[%s8950_s0 + $0x20] sm:$0xff]  ;;  %v5723_v60 = vcombine.low %v360_v44, %v364_v45  ;;  %v189_v37 = vld [vmem:[%s8951_s1 + $0x4a8] sm:$0xff] }
  0x5c   :  { %2355 = vmatpush1.bf16.msra.mxu1 %v5421_v6  ;;  %2313 = vmatprep.subr.bf16.mxu0 %v5668_v7  ;;  %v7097_v5 = vpack.c.bf16 %v32_v57, %v26_v56  ;;  %v5589_v6 = vcombine.low %v225_v54, %v229_v59  ;;  %v5493_v7 = vcombine.low %v129_v52, %v133_v53  ;;  %v345_v38 = vld [vmem:[%s8951_s1 + $0x988] sm:$0xff] }
  0x5d   :  { %2356 = vmatprep.subr.bf16.mxu1 %v5414_v11  ;;  %v209_v11 = vld [vmem:[%s8951_s1 + $0x548] sm:$0xff] }
  0x5e   :  { %v349_v40 = vld [vmem:[%s8951_s1 + $0x9a8] sm:$0xff] }
  0x5f   :  { %2314 = vmatpush1.bf16.msra.mxu0 %v5667_v13  ;;  %v213_v13 = vld [vmem:[%s8951_s1 + $0x568] sm:$0xff]  ;;  %v5710_v46 = vcombine.high %v345_v38, %v349_v40 }
  0x60   :  { %2357 = vmatpush1.bf16.msra.mxu1 %v5413_v14  ;;  %2315 = vmatprep.subr.bf16.mxu0 %v5660_v15  ;;  %v5581_v14 = vcombine.low %v217_v2, %v221_v4  ;;  %v5485_v15 = vcombine.low %v121_v0, %v125_v1  ;;  %v5574_v16 = vcombine.high %v209_v11, %v213_v13  ;;  %v177_v44 = vld [vmem:[%s8951_s1 + $0x448] sm:$0xff] }
  0x61   :  { %2358 = vmatprep.subr.bf16.mxu1 %v5406_v19  ;;  %v201_v19 = vld [vmem:[%s8951_s1 + $0x508] sm:$0xff] }
  0x62   :  { %v181_v45 = vld [vmem:[%s8951_s1 + $0x468] sm:$0xff] }
  0x63   :  { %2316 = vmatpush1.bf16.msra.mxu0 %v5659_v22  ;;  %v205_v22 = vld [vmem:[%s8951_s1 + $0x528] sm:$0xff]  ;;  %v5541_v57 = vcombine.low %v177_v44, %v181_v45 }
  0x64   :  { %2359 = vmatpush1.bf16.msra.mxu1 %v5405_v23  ;;  %5755 = vmatprep.subr.msk.bf16.mxu0 %vm2190_vm1, %v5748_v24  ;;  %v5573_v23 = vcombine.low %v209_v11, %v213_v13  ;;  %v5477_v24 = vcombine.low %v113_v9, %v117_v10  ;;  %v5566_v26 = vcombine.high %v201_v19, %v205_v22  ;;  %v341_v48 = vld [vmem:[%s8951_s1 + $0x968] sm:$0xff] }
  0x65   :  { %2360 = vmatprep.subr.bf16.mxu1 %v5526_v30  ;;  %v5470_v30 = vcombine.high %v105_v17, %v109_v18  ;;  %v169_v52 = vld [vmem:[%s8951_s1 + $0x408] sm:$0xff] }
  0x66   :  { %v173_v53 = vld [vmem:[%s8951_s1 + $0x428] sm:$0xff] }
  0x67   :  { %2326 = vmatpush2.bf16.msra.mxu0 %v2192_v34  ;;  %v5469_v34 = vcombine.low %v105_v17, %v109_v18  ;;  %v329_v54 = vld [vmem:[%s8951_s1 + $0x908] sm:$0xff] }
  0x68   :  { %2361 = vmatpush2.bf16.msra.mxu1 %v5525_v33  ;;  %2327 = vmatprep.subr.bf16.mxu0 %v5740_v35  ;;  %v5565_v33 = vcombine.low %v201_v19, %v205_v22  ;;  %v5558_v35 = vcombine.high %v193_v27, %v197_v28  ;;  %v333_v56 = vld [vmem:[%s8951_s1 + $0x928] sm:$0xff] }
  0x69   :  { %2362 = vmatprep.subr.bf16.mxu1 %v5518_v39  ;;  %v5718_v39 = vcombine.high %v353_v29, %v357_v31  ;;  %v321_v0 = vld [vmem:[%s8951_s1 + $0x8c8] sm:$0xff]  ;;  %v5694_v1 = vcombine.high %v329_v54, %v333_v56  ;;  %v5693_v4 = vcombine.low %v329_v54, %v333_v56 }
  0x6a   :  { %v325_v2 = vld [vmem:[%s8951_s1 + $0x8e8] sm:$0xff] }
  0x6b   :  { %2328 = vmatpush2.bf16.msra.mxu0 %v5739_v41  ;;  %v5557_v41 = vcombine.low %v193_v27, %v197_v28  ;;  %v313_v9 = vld [vmem:[%s8951_s1 + $0x888] sm:$0xff]  ;;  %v5686_v10 = vcombine.high %v321_v0, %v325_v2  ;;  %v5685_v13 = vcombine.low %v321_v0, %v325_v2 }
  0x6c   :  { %2363 = vmatpush2.bf16.msra.mxu1 %v5517_v42  ;;  %2329 = vmatprep.subr.bf16.mxu0 %v5732_v43  ;;  %v5717_v42 = vcombine.low %v353_v29, %v357_v31  ;;  %v5550_v43 = vcombine.high %v185_v36, %v189_v37  ;;  %v317_v11 = vld [vmem:[%s8951_s1 + $0x8a8] sm:$0xff] }
  0x6d   :  { %2364 = vmatprep.subr.bf16.mxu1 %v5510_v47  ;;  %v337_v47 = vld [vmem:[%s8951_s1 + $0x948] sm:$0xff]  ;;  %v5678_v18 = vcombine.high %v313_v9, %v317_v11  ;;  %v5677_v22 = vcombine.low %v313_v9, %v317_v11 }
  0x6e   :  { %v5701_v59 = vcombine.low %v337_v47, %v341_v48  ;;  %v305_v17 = vld [vmem:[%s8951_s1 + $0x848] sm:$0xff] }
  0x6f   :  { %2330 = vmatpush2.bf16.msra.mxu0 %v5731_v49  ;;  %v5549_v49 = vcombine.low %v185_v36, %v189_v37  ;;  %v309_v19 = vld [vmem:[%s8951_s1 + $0x868] sm:$0xff] }
  0x70   :  { %2365 = vmatpush2.bf16.msra.mxu1 %v5509_v50  ;;  %2331 = vmatprep.subr.bf16.mxu0 %v5724_v51  ;;  %v5709_v50 = vcombine.low %v345_v38, %v349_v40  ;;  %v5542_v51 = vcombine.high %v177_v44, %v181_v45  ;;  %v297_v27 = vld [vmem:[%s8951_s1 + $0x808] sm:$0xff]  ;;  %v5670_v28 = vcombine.high %v305_v17, %v309_v19 }
  0x71   :  { %2366 = vmatprep.subr.bf16.mxu1 %v5502_v55  ;;  %v5702_v55 = vcombine.high %v337_v47, %v341_v48  ;;  %v301_v29 = vld [vmem:[%s8951_s1 + $0x828] sm:$0xff]  ;;  %v5669_v31 = vcombine.low %v305_v17, %v309_v19 }
  0x72   :  { %v385_v36 = vld [vmem:[%s8951_s1 + $0xac8] sm:$0xff]  ;;  %v5662_v37 = vcombine.high %v297_v27, %v301_v29  ;;  %v5661_v40 = vcombine.low %v297_v27, %v301_v29 }
  0x73   :  { %2332 = vmatpush2.bf16.msra.mxu0 %v5723_v60  ;;  %v5534_v60 = vcombine.high %v169_v52, %v173_v53  ;;  %v389_v38 = vld [vmem:[%s8951_s1 + $0xae8] sm:$0x33] }
  0x74   :  { %2367 = vmatpush2.bf16.msra.mxu1 %v5501_v61  ;;  %2387 = vmatprep.subr.bf16.mxu0 %v5590_v62  ;;  %v289_v61 = vld [vmem:[%s8951_s1 + $0x7c8] sm:$0xff]  ;;  %v5750_v45 = vcombine.high %v385_v36, %v389_v38 }
  0x75   :  { %2368 = vmatprep.subr.bf16.mxu1 %v5494_v3  ;;  %v293_v62 = vld [vmem:[%s8951_s1 + $0x7e8] sm:$0xff]  ;;  %v5533_v3 = vcombine.low %v169_v52, %v173_v53 }
  0x76   :  { %2334 = vmatmul.mubr.bf16.vlgmr.msra.gmra.mxu0 %v7097_v5  ;;  %v377_v44 = vld [vmem:[%s8951_s1 + $0xa88] sm:$0xff] }
  0x77   :  { %2388 = vmatpush1.bf16.msra.mxu0 %v5589_v6  ;;  %2419 = vmatprep.mubr.bf16.mxu0 %v6792_v63  ;;  %v5654_v6 = vcombine.high %v289_v61, %v293_v62  ;;  %v381_v47 = vld [vmem:[%s8951_s1 + $0xaa8] sm:$0xff] }
  0x78   :  { %2369 = vmatpush2.bf16.msra.mxu1 %v5493_v7  ;;  %2389 = vmatprep.subr.bf16.mxu0 %v5582_v8  ;;  %v281_v7 = vld [vmem:[%s8951_s1 + $0x788] sm:$0xff]  ;;  %v5742_v54 = vcombine.high %v377_v44, %v381_v47 }
  0x79   :  { %2370 = vmatprep.subr.bf16.mxu1 %v5486_v12  ;;  %v285_v8 = vld [vmem:[%s8951_s1 + $0x7a8] sm:$0xff]  ;;  %v5653_v12 = vcombine.low %v289_v61, %v293_v62 }
  0x7a   :  { %v369_v52 = vld [vmem:[%s8951_s1 + $0xa48] sm:$0xff] }
  0x7b   :  { %2390 = vmatpush1.bf16.msra.mxu0 %v5581_v14  ;;  %v5646_v14 = vcombine.high %v281_v7, %v285_v8  ;;  %v237_v61 = vld [vmem:[%s8951_s1 + $0x628] sm:$0xff] }
  0x7c   :  { %2371 = vmatpush2.bf16.msra.mxu1 %v5485_v15  ;;  %2391 = vmatprep.subr.bf16.mxu0 %v5574_v16  ;;  %v273_v15 = vld [vmem:[%s8951_s1 + $0x748] sm:$0xff] }
  0x7d   :  { %2372 = vmatprep.subr.bf16.mxu1 %v5478_v20  ;;  %v277_v16 = vld [vmem:[%s8951_s1 + $0x768] sm:$0xff]  ;;  %v5645_v20 = vcombine.low %v281_v7, %v285_v8  ;;  %v102_v7 = vld [vmem:[%s8951_s1 + $0x1f0] sm:$0xff] }
  0x7e   :  { %v361_v62 = vld [vmem:[%s8951_s1 + $0xa08] sm:$0xff]  ;;  %v226_v8 = vld [vmem:[%s8951_s1 + $0x5d0] sm:$0xff] }
  0x7f   :  { %2392 = vmatpush1.bf16.msra.mxu0 %v5573_v23  ;;  %v5638_v23 = vcombine.high %v273_v15, %v277_v16 }
  0x80   :  { %2373 = vmatpush2.bf16.msra.mxu1 %v5477_v24  ;;  %2393 = vmatprep.subr.bf16.mxu0 %v5566_v26  ;;  %v265_v24 = vld [vmem:[%s8951_s1 + $0x708] sm:$0xff] }
  0x81   :  { %2374 = vmatprep.subr.bf16.mxu1 %v5470_v30  ;;  %v269_v26 = vld [vmem:[%s8951_s1 + $0x728] sm:$0xff]  ;;  %v5637_v30 = vcombine.low %v273_v15, %v277_v16  ;;  %v94_v15 = vld [vmem:[%s8951_s1 + $0x1b0] sm:$0xff] }
  0x82   :  { %v218_v16 = vld [vmem:[%s8951_s1 + $0x590] sm:$0xff] }
  0x83   :  { %2394 = vmatpush1.bf16.msra.mxu0 %v5565_v33  ;;  %v5630_v33 = vcombine.high %v265_v24, %v269_v26 }
  0x84   :  { %2375 = vmatpush2.bf16.msra.mxu1 %v5469_v34  ;;  %2395 = vmatprep.subr.bf16.mxu0 %v5558_v35  ;;  %v257_v34 = vld [vmem:[%s8951_s1 + $0x6c8] sm:$0xff] }
  0x85   :  { %2430 = vmatprep.subr.bf16.mxu1 %v5718_v39  ;;  %v261_v35 = vld [vmem:[%s8951_s1 + $0x6e8] sm:$0xff]  ;;  %v5629_v39 = vcombine.low %v265_v24, %v269_v26  ;;  %v86_v24 = vld [vmem:[%s8951_s1 + $0x170] sm:$0xff] }
  0x86   :  { %v5621_v48 = vcombine.low %v257_v34, %v261_v35  ;;  %v210_v26 = vld [vmem:[%s8951_s1 + $0x550] sm:$0xff] }
  0x87   :  { %2377 = vmatmul.mubr.bf16.vlgmr.msra.gmra.mxu1 %v6925_v21  ;;  %2396 = vmatpush1.bf16.msra.mxu0 %v5557_v41  ;;  %v5622_v41 = vcombine.high %v257_v34, %v261_v35  ;;  %v78_v34 = vld [vmem:[%s8951_s1 + $0x130] sm:$0xff] }
  0x88   :  { %2431 = vmatpush1.bf16.msra.mxu1 %v5717_v42  ;;  %2397 = vmatprep.subr.bf16.mxu0 %v5550_v43  ;;  %v249_v42 = vld [vmem:[%s8951_s1 + $0x688] sm:$0xff]  ;;  %v202_v35 = vld [vmem:[%s8951_s1 + $0x510] sm:$0xff] }
  0x89   :  { %2432 = vmatprep.subr.bf16.mxu1 %v5710_v46  ;;  %5758 = vmatprep.mubr.msk.bf16.mxu1 %vm2186_vm0, %v6944_v32  ;;  %v253_v43 = vld [vmem:[%s8951_s1 + $0x6a8] sm:$0xff]  ;;  %v5749_v46 = vcombine.low %v385_v36, %v389_v38 }
  0x8a   :  { %v5613_v56 = vcombine.low %v249_v42, %v253_v43 }
  0x8b   :  { %2398 = vmatpush1.bf16.msra.mxu0 %v5549_v49  ;;  %v5614_v49 = vcombine.high %v249_v42, %v253_v43  ;;  %v2198_v53 = vsel %vm2190_vm1, %v5749_v46, 0  ;;  %v70_v42 = vld [vmem:[%s8951_s1 + $0xf0] sm:$0xff] }
  0x8c   :  { %2433 = vmatpush1.bf16.msra.mxu1 %v5709_v50  ;;  %2399 = vmatprep.subr.bf16.mxu0 %v5542_v51  ;;  %v241_v50 = vld [vmem:[%s8951_s1 + $0x648] sm:$0xff]  ;;  %v194_v43 = vld [vmem:[%s8951_s1 + $0x4d0] sm:$0xff] }
  0x8d   :  { %2434 = vmatprep.subr.bf16.mxu1 %v5702_v55  ;;  %v245_v51 = vld [vmem:[%s8951_s1 + $0x668] sm:$0xff] }
  0x8e   :  { %v373_v55 = vld [vmem:[%s8951_s1 + $0xa68] sm:$0xff]  ;;  %v5605_v2 = vcombine.low %v241_v50, %v245_v51 }
  0x8f   :  { %2400 = vmatpush1.bf16.msra.mxu0 %v5541_v57  ;;  %v5741_v57 = vcombine.low %v377_v44, %v381_v47  ;;  %v5734_v0 = vcombine.high %v369_v52, %v373_v55 }
  0x90   :  { %2435 = vmatpush1.bf16.msra.mxu1 %v5701_v59  ;;  %2401 = vmatprep.subr.bf16.mxu0 %v5534_v60  ;;  %v5606_v59 = vcombine.high %v241_v50, %v245_v51  ;;  %v233_v60 = vld [vmem:[%s8951_s1 + $0x608] sm:$0xff]  ;;  %v62_v50 = vld [vmem:[%s8951_s1 + $0xb0] sm:$0xff] }
  0x91   :  { %2436 = vmatprep.subr.bf16.mxu1 %v5694_v1  ;;  %v365_v1 = vld [vmem:[%s8951_s1 + $0xa28] sm:$0xff]  ;;  %v5597_v11 = vcombine.low %v233_v60, %v237_v61  ;;  %v186_v51 = vld [vmem:[%s8951_s1 + $0x490] sm:$0xff] }
  0x92   :  { %v5726_v9 = vcombine.high %v361_v62, %v365_v1 }
  0x93   :  { %2402 = vmatpush1.bf16.msra.mxu0 %v5533_v3  ;;  %v5733_v3 = vcombine.low %v369_v52, %v373_v55 }
  0x94   :  { %2437 = vmatpush1.bf16.msra.mxu1 %v5693_v4  ;;  %2403 = vmatprep.subr.bf16.mxu0 %v5654_v6  ;;  %v5598_v4 = vcombine.high %v233_v60, %v237_v61  ;;  %v98_v6 = vld [vmem:[%s8951_s1 + $0x1d0] sm:$0xff] }
  0x95   :  { %2438 = vmatprep.subr.bf16.mxu1 %v5686_v10  ;;  %v230_v10 = vld [vmem:[%s8951_s1 + $0x5f0] sm:$0xff]  ;;  %v5463_v19 = vcombine.low %v98_v6, %v102_v7 }
  0x96   :  { %v5592_v17 = vcombine.high %v226_v8, %v230_v10  ;;  %v178_v60 = vld [vmem:[%s8951_s1 + $0x450] sm:$0xff] }
  0x97   :  { %2404 = vmatpush2.bf16.msra.mxu0 %v5653_v12  ;;  %v5725_v12 = vcombine.low %v361_v62, %v365_v1  ;;  %v182_v62 = vld [vmem:[%s8951_s1 + $0x470] sm:$0xff] }
  0x98   :  { %2439 = vmatpush1.bf16.msra.mxu1 %v5685_v13  ;;  %2405 = vmatprep.subr.bf16.mxu0 %v5646_v14  ;;  %v5464_v13 = vcombine.high %v98_v6, %v102_v7  ;;  %v90_v14 = vld [vmem:[%s8951_s1 + $0x190] sm:$0xff]  ;;  %v5544_v7 = vcombine.high %v178_v60, %v182_v62 }
  0x99   :  { %2440 = vmatprep.subr.bf16.mxu1 %v5678_v18  ;;  %v222_v18 = vld [vmem:[%s8951_s1 + $0x5b0] sm:$0xff]  ;;  %v5455_v29 = vcombine.low %v90_v14, %v94_v15 }
  0x9a   :  { %v5584_v27 = vcombine.high %v218_v16, %v222_v18  ;;  %v170_v6 = vld [vmem:[%s8951_s1 + $0x410] sm:$0xff] }
  0x9b   :  { %2406 = vmatpush2.bf16.msra.mxu0 %v5645_v20  ;;  %v5591_v20 = vcombine.low %v226_v8, %v230_v10  ;;  %v174_v8 = vld [vmem:[%s8951_s1 + $0x430] sm:$0xff]  ;;  %v5543_v10 = vcombine.low %v178_v60, %v182_v62 }
  0x9c   :  { %2441 = vmatpush1.bf16.msra.mxu1 %v5677_v22  ;;  %2407 = vmatprep.subr.bf16.mxu0 %v5638_v23  ;;  %v5456_v22 = vcombine.high %v90_v14, %v94_v15  ;;  %v82_v23 = vld [vmem:[%s8951_s1 + $0x150] sm:$0xff]  ;;  %v5536_v15 = vcombine.high %v170_v6, %v174_v8 }
  0x9d   :  { %2442 = vmatprep.subr.bf16.mxu1 %v5670_v28  ;;  %v214_v28 = vld [vmem:[%s8951_s1 + $0x570] sm:$0xff]  ;;  %v5447_v38 = vcombine.low %v82_v23, %v86_v24 }
  0x9e   :  { %v5576_v36 = vcombine.high %v210_v26, %v214_v28  ;;  %v290_v14 = vld [vmem:[%s8951_s1 + $0x7d0] sm:$0xff] }
  0x9f   :  { %2408 = vmatpush2.bf16.msra.mxu0 %v5637_v30  ;;  %v5583_v30 = vcombine.low %v218_v16, %v222_v18  ;;  %v294_v16 = vld [vmem:[%s8951_s1 + $0x7f0] sm:$0xff]  ;;  %v5535_v18 = vcombine.low %v170_v6, %v174_v8 }
  0xa0   :  { %2443 = vmatpush1.bf16.msra.mxu1 %v5669_v31  ;;  %2409 = vmatprep.subr.bf16.mxu0 %v5630_v33  ;;  %v5448_v31 = vcombine.high %v82_v23, %v86_v24  ;;  %v74_v33 = vld [vmem:[%s8951_s1 + $0x110] sm:$0xff]  ;;  %v5656_v24 = vcombine.high %v290_v14, %v294_v16 }
  0xa1   :  { %2444 = vmatprep.subr.bf16.mxu1 %v5662_v37  ;;  %v206_v37 = vld [vmem:[%s8951_s1 + $0x530] sm:$0xff]  ;;  %v5439_v46 = vcombine.low %v74_v33, %v78_v34 }
  0xa2   :  { %v5568_v44 = vcombine.high %v202_v35, %v206_v37  ;;  %v5567_v47 = vcombine.low %v202_v35, %v206_v37  ;;  %v282_v23 = vld [vmem:[%s8951_s1 + $0x790] sm:$0xff] }
  0xa3   :  { %2410 = vmatpush2.bf16.msra.mxu0 %v5629_v39  ;;  %v5575_v39 = vcombine.low %v210_v26, %v214_v28  ;;  %v286_v26 = vld [vmem:[%s8951_s1 + $0x7b0] sm:$0xff]  ;;  %v5655_v28 = vcombine.low %v290_v14, %v294_v16 }
  0xa4   :  { %2445 = vmatpush1.bf16.msra.mxu1 %v5661_v40  ;;  %2411 = vmatprep.subr.bf16.mxu0 %v5622_v41  ;;  %v5440_v40 = vcombine.high %v74_v33, %v78_v34  ;;  %v66_v41 = vld [vmem:[%s8951_s1 + $0xd0] sm:$0xff]  ;;  %v5648_v34 = vcombine.high %v282_v23, %v286_v26  ;;  %v5647_v37 = vcombine.low %v282_v23, %v286_v26  ;;  %v103_v23 = vld [vmem:[%s8951_s1 + $0x1f8] sm:$0xff] }
  0xa5   :  { %5757 = vmatprep.subr.msk.bf16.mxu1 %vm2190_vm1, %v5750_v45  ;;  %v198_v45 = vld [vmem:[%s8951_s1 + $0x4f0] sm:$0xff] }
  0xa6   :  { %v5560_v52 = vcombine.high %v194_v43, %v198_v45  ;;  %v5559_v55 = vcombine.low %v194_v43, %v198_v45  ;;  %v274_v33 = vld [vmem:[%s8951_s1 + $0x750] sm:$0xff] }
  0xa7   :  { %2412 = vmatpush2.bf16.msra.mxu0 %v5621_v48  ;;  %v5432_v48 = vcombine.high %v66_v41, %v70_v42  ;;  %v278_v35 = vld [vmem:[%s8951_s1 + $0x770] sm:$0xff] }
  0xa8   :  { %2455 = vmatpush2.bf16.msra.mxu1 %v2198_v53  ;;  %2413 = vmatprep.subr.bf16.mxu0 %v5614_v49  ;;  %v58_v49 = vld [vmem:[%s8951_s1 + $0x90] sm:$0xff]  ;;  %v5639_v45 = vcombine.low %v274_v33, %v278_v35 }
  0xa9   :  { %2456 = vmatprep.subr.bf16.mxu1 %v5742_v54  ;;  %v190_v53 = vld [vmem:[%s8951_s1 + $0x4b0] sm:$0xff]  ;;  %v5431_v54 = vcombine.low %v66_v41, %v70_v42  ;;  %v5640_v42 = vcombine.high %v274_v33, %v278_v35  ;;  %v95_v33 = vld [vmem:[%s8951_s1 + $0x1b8] sm:$0xff] }
  0xaa   :  { %v5552_v61 = vcombine.high %v186_v51, %v190_v53  ;;  %v5551_v1 = vcombine.low %v186_v51, %v190_v53  ;;  %v266_v41 = vld [vmem:[%s8951_s1 + $0x710] sm:$0xff] }
  0xab   :  { %2414 = vmatpush2.bf16.msra.mxu0 %v5613_v56  ;;  %v5424_v56 = vcombine.high %v58_v49, %v62_v50  ;;  %v270_v43 = vld [vmem:[%s8951_s1 + $0x730] sm:$0xff] }
  0xac   :  { %2457 = vmatpush2.bf16.msra.mxu1 %v5741_v57  ;;  %2415 = vmatprep.subr.bf16.mxu0 %v5606_v59  ;;  %v50_v57 = vld [vmem:[%s8951_s1 + $0x50] sm:$0xff]  ;;  %v5631_v53 = vcombine.low %v266_v41, %v270_v43 }
  0xad   :  { %2458 = vmatprep.subr.bf16.mxu1 %v5734_v0  ;;  %v54_v59 = vld [vmem:[%s8951_s1 + $0x70] sm:$0xff]  ;;  %v5423_v0 = vcombine.low %v58_v49, %v62_v50  ;;  %v5632_v50 = vcombine.high %v266_v41, %v270_v43  ;;  %v87_v41 = vld [vmem:[%s8951_s1 + $0x178] sm:$0xff] }
  0xae   :  { %v258_v49 = vld [vmem:[%s8951_s1 + $0x6d0] sm:$0xff] }
  0xaf   :  { %2416 = vmatpush2.bf16.msra.mxu0 %v5605_v2  ;;  %v5416_v2 = vcombine.high %v50_v57, %v54_v59  ;;  %v262_v51 = vld [vmem:[%s8951_s1 + $0x6f0] sm:$0xff] }
  0xb0   :  { %2459 = vmatpush2.bf16.msra.mxu1 %v5733_v3  ;;  %2417 = vmatprep.subr.bf16.mxu0 %v5598_v4  ;;  %v42_v3 = vld [vmem:[%s8951_s1 + $0x10] sm:$0xff]  ;;  %v5623_v62 = vcombine.low %v258_v49, %v262_v51 }
  0xb1   :  { %2460 = vmatprep.subr.bf16.mxu1 %v5726_v9  ;;  %v46_v4 = vld [vmem:[%s8951_s1 + $0x30] sm:$0xff]  ;;  %v5415_v9 = vcombine.low %v50_v57, %v54_v59  ;;  %v5624_v59 = vcombine.high %v258_v49, %v262_v51  ;;  %v75_v49 = vld [vmem:[%s8951_s1 + $0x118] sm:$0xff] }
  0xb2   :  { %v250_v57 = vld [vmem:[%s8951_s1 + $0x690] sm:$0xff] }
  0xb3   :  { %2418 = vmatpush2.bf16.msra.mxu0 %v5597_v11  ;;  %v5408_v11 = vcombine.high %v42_v3, %v46_v4  ;;  %v254_v60 = vld [vmem:[%s8951_s1 + $0x6b0] sm:$0xff] }
  0xb4   :  { %2461 = vmatpush2.bf16.msra.mxu1 %v5725_v12  ;;  %2473 = vmatprep.subr.bf16.mxu0 %v5464_v13  ;;  %v162_v12 = vld [vmem:[%s8951_s1 + $0x3d0] sm:$0xff]  ;;  %v5615_v8 = vcombine.low %v250_v57, %v254_v60 }
  0xb5   :  { %2516 = vmatprep.subr.bf16.mxu1 %v5592_v17  ;;  %v166_v13 = vld [vmem:[%s8951_s1 + $0x3f0] sm:$0xff]  ;;  %v5407_v17 = vcombine.low %v42_v3, %v46_v4 }
  0xb6   :  { %2420 = vmatmul.mubr.bf16.vlgmr.msra.gmra.mxu0 %v6936_v25  ;;  %v118_v3 = vld [vmem:[%s8951_s1 + $0x270] sm:$0xff] }
  0xb7   :  { %2463 = vmatmul.mubr.bf16.vlgmr.msra.gmra.mxu1 %v7097_v5  ;;  %2474 = vmatpush1.bf16.msra.mxu0 %v5463_v19  ;;  %v5528_v19 = vcombine.high %v162_v12, %v166_v13  ;;  %v242_v4 = vld [vmem:[%s8951_s1 + $0x650] sm:$0xff] }
  0xb8   :  { %2517 = vmatpush1.bf16.msra.mxu1 %v5591_v20  ;;  %2475 = vmatprep.subr.bf16.mxu0 %v5456_v22  ;;  %v154_v20 = vld [vmem:[%s8951_s1 + $0x390] sm:$0xff] }
  0xb9   :  { %2518 = vmatprep.subr.bf16.mxu1 %v5584_v27  ;;  %2505 = vmatprep.mubr.bf16.mxu0 %v6778_v58  ;;  %v158_v22 = vld [vmem:[%s8951_s1 + $0x3b0] sm:$0xff]  ;;  %v5527_v27 = vcombine.low %v162_v12, %v166_v13 }
  0xba   :  { %2548 = vmatprep.mubr.bf16.mxu1 %v6792_v63  ;;  %v246_v6 = vld [vmem:[%s8951_s1 + $0x670] sm:$0xff] }
  0xbb   :  { %2476 = vmatpush1.bf16.msra.mxu0 %v5455_v29  ;;  %v5520_v29 = vcombine.high %v154_v20, %v158_v22  ;;  %v5608_v12 = vcombine.high %v242_v4, %v246_v6  ;;  %v234_v13 = vld [vmem:[%s8951_s1 + $0x610] sm:$0xff]  ;;  %v5607_v16 = vcombine.low %v242_v4, %v246_v6  ;;  %v59_v6 = vld [vmem:[%s8951_s1 + $0x98] sm:$0xff] }
  0xbc   :  { %2519 = vmatpush1.bf16.msra.mxu1 %v5583_v30  ;;  %2477 = vmatprep.subr.bf16.mxu0 %v5448_v31  ;;  %v146_v30 = vld [vmem:[%s8951_s1 + $0x350] sm:$0xff] }
  0xbd   :  { %2520 = vmatprep.subr.bf16.mxu1 %v5576_v36  ;;  %v150_v31 = vld [vmem:[%s8951_s1 + $0x370] sm:$0xff]  ;;  %v5519_v36 = vcombine.low %v154_v20, %v158_v22  ;;  %v99_v20 = vld [vmem:[%s8951_s1 + $0x1d8] sm:$0xff] }
  0xbe   :  { %v238_v14 = vld [vmem:[%s8951_s1 + $0x630] sm:$0xff]  ;;  %v5465_v35 = vcombine.low %v99_v20, %v103_v23 }
  0xbf   :  { %2478 = vmatpush1.bf16.msra.mxu0 %v5447_v38  ;;  %v5512_v38 = vcombine.high %v146_v30, %v150_v31  ;;  %v5600_v22 = vcombine.high %v234_v13, %v238_v14  ;;  %v5599_v26 = vcombine.low %v234_v13, %v238_v14  ;;  %v318_v4 = vld [vmem:[%s8951_s1 + $0x8b0] sm:$0xff] }
  0xc0   :  { %2521 = vmatpush1.bf16.msra.mxu1 %v5575_v39  ;;  %2479 = vmatprep.subr.bf16.mxu0 %v5440_v40  ;;  %v138_v39 = vld [vmem:[%s8951_s1 + $0x310] sm:$0xff] }
  0xc1   :  { %2522 = vmatprep.subr.bf16.mxu1 %v5568_v44  ;;  %v142_v40 = vld [vmem:[%s8951_s1 + $0x330] sm:$0xff]  ;;  %v5511_v44 = vcombine.low %v146_v30, %v150_v31  ;;  %v91_v30 = vld [vmem:[%s8951_s1 + $0x198] sm:$0xff]  ;;  %v5466_v31 = vcombine.high %v99_v20, %v103_v23 }
  0xc2   :  { %v306_v13 = vld [vmem:[%s8951_s1 + $0x850] sm:$0xff] }
  0xc3   :  { %2480 = vmatpush1.bf16.msra.mxu0 %v5439_v46  ;;  %v5504_v46 = vcombine.high %v138_v39, %v142_v40  ;;  %v310_v14 = vld [vmem:[%s8951_s1 + $0x870] sm:$0xff] }
  0xc4   :  { %2523 = vmatpush1.bf16.msra.mxu1 %v5567_v47  ;;  %2481 = vmatprep.subr.bf16.mxu0 %v5432_v48  ;;  %v130_v47 = vld [vmem:[%s8951_s1 + $0x2d0] sm:$0xff] }
  0xc5   :  { %2524 = vmatprep.subr.bf16.mxu1 %v5560_v52  ;;  %v134_v48 = vld [vmem:[%s8951_s1 + $0x2f0] sm:$0xff]  ;;  %v5503_v52 = vcombine.low %v138_v39, %v142_v40  ;;  %v83_v40 = vld [vmem:[%s8951_s1 + $0x158] sm:$0xff] }
  0xc6   :  { %v342_v39 = vld [vmem:[%s8951_s1 + $0x970] sm:$0xff] }
  0xc7   :  { %2482 = vmatpush1.bf16.msra.mxu0 %v5431_v54  ;;  %v5496_v54 = vcombine.high %v130_v47, %v134_v48 }
  0xc8   :  { %2525 = vmatpush1.bf16.msra.mxu1 %v5559_v55  ;;  %2483 = vmatprep.subr.bf16.mxu0 %v5424_v56  ;;  %v122_v55 = vld [vmem:[%s8951_s1 + $0x290] sm:$0xff] }
  0xc9   :  { %2526 = vmatprep.subr.bf16.mxu1 %v5552_v61  ;;  %v126_v56 = vld [vmem:[%s8951_s1 + $0x2b0] sm:$0xff]  ;;  %v5495_v61 = vcombine.low %v130_v47, %v134_v48 }
  0xca   :  { %v330_v47 = vld [vmem:[%s8951_s1 + $0x910] sm:$0xff] }
  0xcb   :  { %2484 = vmatpush1.bf16.msra.mxu0 %v5423_v0  ;;  %v5488_v0 = vcombine.high %v122_v55, %v126_v56  ;;  %v334_v48 = vld [vmem:[%s8951_s1 + $0x930] sm:$0xff] }
  0xcc   :  { %2527 = vmatpush1.bf16.msra.mxu1 %v5551_v1  ;;  %2485 = vmatprep.subr.bf16.mxu0 %v5416_v2  ;;  %v5616_v1 = vcombine.high %v250_v57, %v254_v60  ;;  %v114_v2 = vld [vmem:[%s8951_s1 + $0x250] sm:$0xff]  ;;  %v67_v60 = vld [vmem:[%s8951_s1 + $0xd8] sm:$0xff] }
  0xcd   :  { %2528 = vmatprep.subr.bf16.mxu1 %v5544_v7  ;;  %v5487_v7 = vcombine.low %v122_v55, %v126_v56  ;;  %v322_v56 = vld [vmem:[%s8951_s1 + $0x8d0] sm:$0xff] }
  0xce   :  { %v326_v57 = vld [vmem:[%s8951_s1 + $0x8f0] sm:$0xff] }
  0xcf   :  { %2486 = vmatpush1.bf16.msra.mxu0 %v5415_v9  ;;  %v5480_v9 = vcombine.high %v114_v2, %v118_v3 }
  0xd0   :  { %2529 = vmatpush1.bf16.msra.mxu1 %v5543_v10  ;;  %2487 = vmatprep.subr.bf16.mxu0 %v5408_v11  ;;  %v106_v10 = vld [vmem:[%s8951_s1 + $0x210] sm:$0xff] }
  0xd1   :  { %2530 = vmatprep.subr.bf16.mxu1 %v5536_v15  ;;  %v110_v11 = vld [vmem:[%s8951_s1 + $0x230] sm:$0xff]  ;;  %v5479_v15 = vcombine.low %v114_v2, %v118_v3 }
  0xd2   :  { %v314_v3 = vld [vmem:[%s8951_s1 + $0x890] sm:$0xff] }
  0xd3   :  { %2488 = vmatpush1.bf16.msra.mxu0 %v5407_v17  ;;  %v5472_v17 = vcombine.high %v106_v10, %v110_v11  ;;  %v5679_v20 = vcombine.low %v314_v3, %v318_v4 }
  0xd4   :  { %2531 = vmatpush1.bf16.msra.mxu1 %v5535_v18  ;;  %2489 = vmatprep.subr.bf16.mxu0 %v5528_v19  ;;  %v354_v18 = vld [vmem:[%s8951_s1 + $0x9d0] sm:$0xff] }
  0xd5   :  { %2532 = vmatprep.subr.bf16.mxu1 %v5656_v24  ;;  %v358_v19 = vld [vmem:[%s8951_s1 + $0x9f0] sm:$0xff]  ;;  %v5471_v24 = vcombine.low %v106_v10, %v110_v11  ;;  %v5680_v11 = vcombine.high %v314_v3, %v318_v4 }
  0xd7   :  { %2490 = vmatpush2.bf16.msra.mxu0 %v5527_v27  ;;  %v5720_v27 = vcombine.high %v354_v18, %v358_v19 }
  0xd8   :  { %2533 = vmatpush2.bf16.msra.mxu1 %v5655_v28  ;;  %2491 = vmatprep.subr.bf16.mxu0 %v5520_v29  ;;  %v346_v28 = vld [vmem:[%s8951_s1 + $0x990] sm:$0xff] }
  0xd9   :  { %2534 = vmatprep.subr.bf16.mxu1 %v5648_v34  ;;  %v350_v29 = vld [vmem:[%s8951_s1 + $0x9b0] sm:$0xff]  ;;  %v5719_v34 = vcombine.low %v354_v18, %v358_v19 }
  0xda   :  { %v5711_v43 = vcombine.low %v346_v28, %v350_v29 }
  0xdb   :  { %2492 = vmatpush2.bf16.msra.mxu0 %v5519_v36  ;;  %v5712_v36 = vcombine.high %v346_v28, %v350_v29 }
  0xdc   :  { %2535 = vmatpush2.bf16.msra.mxu1 %v5647_v37  ;;  %2493 = vmatprep.subr.bf16.mxu0 %v5512_v38  ;;  %v5458_v37 = vcombine.high %v91_v30, %v95_v33  ;;  %v338_v38 = vld [vmem:[%s8951_s1 + $0x950] sm:$0xff] }
  0xdd   :  { %2536 = vmatprep.subr.bf16.mxu1 %v5640_v42  ;;  %v394_v42 = vlaneseq }
  0xdf   :  { %2494 = vmatpush2.bf16.msra.mxu0 %v5511_v44  ;;  %v5457_v44 = vcombine.low %v91_v30, %v95_v33  ;;  %v7522_v51 = vshrl.u32 %v394_v42, 7  ;;  %v302_v30 = vld [vmem:[%s8951_s1 + $0x830] sm:$0xff]  ;;  %v43_v33 = vld [vmem:[%s8951_s1 + $0x18] sm:$0xff] }
  0xe0   :  { %2537 = vmatpush2.bf16.msra.mxu1 %v5639_v45  ;;  %2495 = vmatprep.subr.bf16.mxu0 %v5504_v46  ;;  %v5704_v45 = vcombine.high %v338_v38, %v342_v39  ;;  %v5450_v46 = vcombine.high %v83_v40, %v87_v41 }
  0xe1   :  { %2538 = vmatprep.subr.bf16.mxu1 %v5632_v50  ;;  %v79_v50 = vld [vmem:[%s8951_s1 + $0x138] sm:$0xff] }
  0xe2   :  { %v5442_v55 = vcombine.high %v75_v49, %v79_v50 }
  0xe3   :  { %2496 = vmatpush2.bf16.msra.mxu0 %v5503_v52  ;;  %v5703_v52 = vcombine.low %v338_v38, %v342_v39 }
  0xe4   :  { %2539 = vmatpush2.bf16.msra.mxu1 %v5631_v53  ;;  %2497 = vmatprep.subr.bf16.mxu0 %v5496_v54  ;;  %v5449_v53 = vcombine.low %v83_v40, %v87_v41  ;;  %v5696_v54 = vcombine.high %v330_v47, %v334_v48 }
  0xe5   :  { %2540 = vmatprep.subr.bf16.mxu1 %v5624_v59  ;;  %v396_v59 = vsub.s32 0, %v7522_v51 }
  0xe7   :  { %2498 = vmatpush2.bf16.msra.mxu0 %v5495_v61  ;;  %v71_v61 = vld [vmem:[%s8951_s1 + $0xf8] sm:$0xff] }
  0xe8   :  { %2541 = vmatpush2.bf16.msra.mxu1 %v5623_v62  ;;  %2499 = vmatprep.subr.bf16.mxu0 %v5488_v0  ;;  %v5695_v62 = vcombine.low %v330_v47, %v334_v48  ;;  %v5441_v0 = vcombine.low %v75_v49, %v79_v50  ;;  %v5434_v2 = vcombine.high %v67_v60, %v71_v61 }
  0xe9   :  { %2542 = vmatprep.subr.bf16.mxu1 %v5616_v1  ;;  %v5688_v1 = vcombine.high %v322_v56, %v326_v57  ;;  %v5433_v10 = vcombine.low %v67_v60, %v71_v61 }
  0xeb   :  { %2500 = vmatpush2.bf16.msra.mxu0 %v5487_v7  ;;  %v63_v7 = vld [vmem:[%s8951_s1 + $0xb8] sm:$0xff] }
  0xec   :  { %2543 = vmatpush2.bf16.msra.mxu1 %v5615_v8  ;;  %2501 = vmatprep.subr.bf16.mxu0 %v5480_v9  ;;  %v5687_v9 = vcombine.low %v322_v56, %v326_v57  ;;  %v5425_v23 = vcombine.low %v59_v6, %v63_v7 }
  0xed   :  { %2544 = vmatprep.subr.bf16.mxu1 %v5608_v12  ;;  %v5426_v12 = vcombine.high %v59_v6, %v63_v7 }
  0xef   :  { %2502 = vmatpush2.bf16.msra.mxu0 %v5479_v15  ;;  %v51_v15 = vld [vmem:[%s8951_s1 + $0x58] sm:$0xff] }
  0xf0   :  { %2545 = vmatpush2.bf16.msra.mxu1 %v5607_v16  ;;  %2503 = vmatprep.subr.bf16.mxu0 %v5472_v17  ;;  %v55_v17 = vld [vmem:[%s8951_s1 + $0x78] sm:$0xff] }
  0xf1   :  { %2546 = vmatprep.subr.bf16.mxu1 %v5600_v22  ;;  %v5418_v29 = vcombine.high %v51_v15, %v55_v17 }
  0xf3   :  { %2504 = vmatpush2.bf16.msra.mxu0 %v5471_v24  ;;  %v5672_v24 = vcombine.high %v306_v13, %v310_v14 }
  0xf4   :  { %2547 = vmatpush2.bf16.msra.mxu1 %v5599_v26  ;;  %2559 = vmatprep.subr.bf16.mxu0 %v5720_v27  ;;  %v298_v26 = vld [vmem:[%s8951_s1 + $0x810] sm:$0xff] }
  0xf5   :  { %2602 = vmatprep.subr.bf16.mxu1 %v5466_v31 }
  0xf6   :  { %2506 = vmatmul.mubr.bf16.vlgmr.msra.gmra.mxu0 %v6925_v21 }
  0xf7   :  { %2549 = vmatmul.mubr.bf16.vlgmr.msra.gmra.mxu1 %v6936_v25  ;;  %2560 = vmatpush1.bf16.msra.mxu0 %v5719_v34  ;;  %v47_v34 = vld [vmem:[%s8951_s1 + $0x38] sm:$0xff] }
  0xf8   :  { %2603 = vmatpush1.bf16.msra.mxu1 %v5465_v35  ;;  %2561 = vmatprep.subr.bf16.mxu0 %v5712_v36 }
  0xf9   :  { %2604 = vmatprep.subr.bf16.mxu1 %v5458_v37  ;;  %5760 = vmatprep.mubr.msk.bf16.mxu0 %vm2186_vm0, %v6944_v32 }
  0xfa   :  { %2634 = vmatprep.mubr.bf16.mxu1 %v6778_v58  ;;  %v7534_v58 = vld [vmem:[%s8952_s2] sm:$0xff] }
  0xfb   :  { %2562 = vmatpush1.bf16.msra.mxu0 %v5711_v43  ;;  %v397_v8 = vrot.slane %v7534_v58, %v396_v59 }
  0xfc   :  { %2605 = vmatpush1.bf16.msra.mxu1 %v5457_v44  ;;  %2563 = vmatprep.subr.bf16.mxu0 %v5704_v45 }
  0xfd   :  { %2606 = vmatprep.subr.bf16.mxu1 %v5450_v46 }
  0xff   :  { %2564 = vmatpush1.bf16.msra.mxu0 %v5703_v52 }
 0x100   :  { %2607 = vmatpush1.bf16.msra.mxu1 %v5449_v53  ;;  %2565 = vmatprep.subr.bf16.mxu0 %v5696_v54 }
 0x101   :  { %2608 = vmatprep.subr.bf16.mxu1 %v5442_v55 }
 0x103   :  { %2566 = vmatpush1.bf16.msra.mxu0 %v5695_v62 }
 0x104   :  { %2609 = vmatpush1.bf16.msra.mxu1 %v5441_v0  ;;  %2567 = vmatprep.subr.bf16.mxu0 %v5688_v1 }
 0x105   :  { %2610 = vmatprep.subr.bf16.mxu1 %v5434_v2 }
 0x106   :  { %v2249_v16 = vpop.f32.mrf.mxu0 }
 0x107   :  { %v2250_v18 = vadd.f32 %v2249_v16, %v397_v8  ;;  %v2292_v19 = vpop.f32.mrf.mxu1  ;;  %2568 = vmatpush1.bf16.msra.mxu0 %v5687_v9 }
 0x108   :  { %2611 = vmatpush1.bf16.msra.mxu1 %v5433_v10  ;;  %v7570_v22 = vpop.f32.mrf.mxu0  ;;  %2569 = vmatprep.subr.bf16.mxu0 %v5680_v11 }
 0x109   :  { %v7575_v27 = vadd.f32 %v2292_v19, %v2250_v18  ;;  %v7577_v28 = vpop.f32.mrf.mxu1  ;;  %2612 = vmatprep.subr.bf16.mxu1 %v5426_v12 }
 0x10a   :  { %v2253_v31 = vpop.f32.mrf.mxu0 }
 0x10b   :  { %10 = vsyncpa [#allocation3], 0  ;;  %v2254_v35 = vadd.f32 %v2253_v31, %v397_v8  ;;  %2570 = vmatpush1.bf16.msra.mxu0 %v5679_v20  ;;  %v5671_v36 = vcombine.low %v306_v13, %v310_v14  ;;  %v2296_v37 = vpop.f32.mrf.mxu1  ;;  %v5417_v38 = vcombine.low %v51_v15, %v55_v17  ;;  %v5664_v39 = vcombine.high %v298_v26, %v302_v30  ;;  %v386_v42 = vld [vmem:[%s8951_s1 + $0xad0] sm:$0xff]  ;;  %v163_v44 = vld [vmem:[%s8951_s1 + $0x3d8] sm:$0xff] }
 0x10c   :  { %2613 = vmatpush1.bf16.msra.mxu1 %v5425_v23  ;;  %2571 = vmatprep.subr.bf16.mxu0 %v5672_v24  ;;  %v5410_v41 = vcombine.high %v43_v33, %v47_v34  ;;  %v390_v43 = vld [vmem:[%s8951_s1 + $0xaf0] sm:$0x33]  ;;  %v167_v45 = vld [vmem:[%s8951_s1 + $0x3f8] sm:$0xff]  ;;  %v5663_v46 = vcombine.low %v298_v26, %v302_v30  ;;  %v5409_v47 = vcombine.low %v43_v33, %v47_v34  ;;  %vm5351_vm2 = vcmask 719872  }
 0x10d   :  { %v7588_v40 = vadd.f32 %v2296_v37, %v2254_v35  ;;  %2614 = vmatprep.subr.bf16.mxu1 %v5418_v29  ;;  %v5752_v48 = vcombine.high %v386_v42, %v390_v43  ;;  %v5751_v49 = vcombine.low %v386_v42, %v390_v43  ;;  %v5530_v50 = vcombine.high %v163_v44, %v167_v45  ;;  %v378_v52 = vld [vmem:[%s8951_s1 + $0xa90] sm:$0xff]  ;;  %v155_v54 = vld [vmem:[%s8951_s1 + $0x398] sm:$0xff] }
 0x10e   :  { %v382_v53 = vld [vmem:[%s8951_s1 + $0xab0] sm:$0xff]  ;;  %v159_v55 = vld [vmem:[%s8951_s1 + $0x3b8] sm:$0xff]  ;;  %v5529_v56 = vcombine.low %v163_v44, %v167_v45 }
 0x10f   :  { %2572 = vmatpush1.bf16.msra.mxu0 %v5671_v36  ;;  %v2204_v57 = vsel %vm2190_vm1, %v5751_v49, 0  ;;  %v5744_v60 = vcombine.high %v378_v52, %v382_v53  ;;  %v5522_v61 = vcombine.high %v155_v54, %v159_v55  ;;  %v370_v62 = vld [vmem:[%s8951_s1 + $0xa50] sm:$0xff]  ;;  %v147_v1 = vld [vmem:[%s8951_s1 + $0x358] sm:$0xff]  ;;  %v5743_v3 = vcombine.low %v378_v52, %v382_v53 }
 0x110   :  { %2615 = vmatpush1.bf16.msra.mxu1 %v5417_v38  ;;  %2573 = vmatprep.subr.bf16.mxu0 %v5664_v39  ;;  %v374_v0 = vld [vmem:[%s8951_s1 + $0xa70] sm:$0xff]  ;;  %v151_v2 = vld [vmem:[%s8951_s1 + $0x378] sm:$0xff]  ;;  %v5521_v4 = vcombine.low %v155_v54, %v159_v55 }
 0x111   :  { %2616 = vmatprep.subr.bf16.mxu1 %v5410_v41  ;;  %v5736_v6 = vcombine.high %v370_v62, %v374_v0  ;;  %v5514_v7 = vcombine.high %v147_v1, %v151_v2  ;;  %v362_v8 = vld [vmem:[%s8951_s1 + $0xa10] sm:$0xff]  ;;  %v139_v10 = vld [vmem:[%s8951_s1 + $0x318] sm:$0xff]  ;;  %v5735_v12 = vcombine.low %v370_v62, %v374_v0  ;;  %v5513_v13 = vcombine.low %v147_v1, %v151_v2 }
 0x112   :  { %v366_v9 = vld [vmem:[%s8951_s1 + $0xa30] sm:$0xff]  ;;  %v143_v11 = vld [vmem:[%s8951_s1 + $0x338] sm:$0xff] }
 0x113   :  { %2574 = vmatpush1.bf16.msra.mxu0 %v5663_v46  ;;  %v5728_v14 = vcombine.high %v362_v8, %v366_v9  ;;  %v5506_v15 = vcombine.high %v139_v10, %v143_v11  ;;  %v227_v16 = vld [vmem:[%s8951_s1 + $0x5d8] sm:$0xff]  ;;  %v5727_v20 = vcombine.low %v362_v8, %v366_v9  ;;  %v5505_v23 = vcombine.low %v139_v10, %v143_v11  ;;  %v7714_v8 = vpop.f32.mrf.mxu0 }
 0x114   :  { %2617 = vmatpush1.bf16.msra.mxu1 %v5409_v47  ;;  %5759 = vmatprep.subr.msk.bf16.mxu0 %vm2190_vm1, %v5752_v48  ;;  %v231_v17 = vld [vmem:[%s8951_s1 + $0x5f8] sm:$0xff] }
 0x115   :  { %2618 = vmatprep.subr.bf16.mxu1 %v5530_v50  ;;  %v131_v18 = vld [vmem:[%s8951_s1 + $0x2d8] sm:$0xff]  ;;  %v5594_v24 = vcombine.high %v227_v16, %v231_v17  ;;  %v5593_v34 = vcombine.low %v227_v16, %v231_v17 }
 0x116   :  { %v135_v19 = vld [vmem:[%s8951_s1 + $0x2f8] sm:$0xff] }
 0x117   :  { %2584 = vmatpush2.bf16.msra.mxu0 %v2204_v57  ;;  %v5498_v26 = vcombine.high %v131_v18, %v135_v19  ;;  %v219_v29 = vld [vmem:[%s8951_s1 + $0x598] sm:$0xff]  ;;  %v5497_v35 = vcombine.low %v131_v18, %v135_v19 }
 0x118   :  { %2619 = vmatpush2.bf16.msra.mxu1 %v5529_v56  ;;  %2585 = vmatprep.subr.bf16.mxu0 %v5744_v60  ;;  %v223_v30 = vld [vmem:[%s8951_s1 + $0x5b8] sm:$0xff] }
 0x119   :  { %2620 = vmatprep.subr.bf16.mxu1 %v5522_v61  ;;  %v123_v31 = vld [vmem:[%s8951_s1 + $0x298] sm:$0xff]  ;;  %v5586_v36 = vcombine.high %v219_v29, %v223_v30  ;;  %v5585_v43 = vcombine.low %v219_v29, %v223_v30 }
 0x11a   :  { %v127_v33 = vld [vmem:[%s8951_s1 + $0x2b8] sm:$0xff] }
 0x11b   :  { %2586 = vmatpush2.bf16.msra.mxu0 %v5743_v3  ;;  %v5490_v37 = vcombine.high %v123_v31, %v127_v33  ;;  %v211_v38 = vld [vmem:[%s8951_s1 + $0x558] sm:$0xff]  ;;  %v5489_v44 = vcombine.low %v123_v31, %v127_v33 }
 0x11c   :  { %2621 = vmatpush2.bf16.msra.mxu1 %v5521_v4  ;;  %2587 = vmatprep.subr.bf16.mxu0 %v5736_v6  ;;  %v215_v39 = vld [vmem:[%s8951_s1 + $0x578] sm:$0xff] }
 0x11d   :  { %2622 = vmatprep.subr.bf16.mxu1 %v5514_v7  ;;  %v115_v41 = vld [vmem:[%s8951_s1 + $0x258] sm:$0xff]  ;;  %v5578_v45 = vcombine.high %v211_v38, %v215_v39  ;;  %v5577_v50 = vcombine.low %v211_v38, %v215_v39 }
 0x11e   :  { %v119_v42 = vld [vmem:[%s8951_s1 + $0x278] sm:$0xff] }
 0x11f   :  { %2588 = vmatpush2.bf16.msra.mxu0 %v5735_v12  ;;  %v5482_v46 = vcombine.high %v115_v41, %v119_v42  ;;  %v203_v47 = vld [vmem:[%s8951_s1 + $0x518] sm:$0xff]  ;;  %v5481_v52 = vcombine.low %v115_v41, %v119_v42 }
 0x120   :  { %2623 = vmatpush2.bf16.msra.mxu1 %v5513_v13  ;;  %2589 = vmatprep.subr.bf16.mxu0 %v5728_v14  ;;  %v207_v48 = vld [vmem:[%s8951_s1 + $0x538] sm:$0xff] }
 0x121   :  { %2624 = vmatprep.subr.bf16.mxu1 %v5506_v15  ;;  %v107_v49 = vld [vmem:[%s8951_s1 + $0x218] sm:$0xff]  ;;  %v5570_v53 = vcombine.high %v203_v47, %v207_v48  ;;  %v5569_v61 = vcombine.low %v203_v47, %v207_v48 }
 0x122   :  { %v195_v55 = vld [vmem:[%s8951_s1 + $0x4d8] sm:$0xff] }
 0x123   :  { %2590 = vmatpush2.bf16.msra.mxu0 %v5727_v20  ;;  %v199_v56 = vld [vmem:[%s8951_s1 + $0x4f8] sm:$0xff] }
 0x124   :  { %2625 = vmatpush2.bf16.msra.mxu1 %v5505_v23  ;;  %2645 = vmatprep.subr.bf16.mxu0 %v5594_v24  ;;  %v355_v57 = vld [vmem:[%s8951_s1 + $0x9d8] sm:$0xff]  ;;  %v5562_v0 = vcombine.high %v195_v55, %v199_v56  ;;  %v5561_v7 = vcombine.low %v195_v55, %v199_v56 }
 0x125   :  { %2626 = vmatprep.subr.bf16.mxu1 %v5498_v26  ;;  %v359_v60 = vld [vmem:[%s8951_s1 + $0x9f8] sm:$0xff] }
 0x126   :  { %2592 = vmatmul.mubr.bf16.vlgmr.msra.gmra.mxu0 %v7097_v5  ;;  %v5722_v1 = vcombine.high %v355_v57, %v359_v60  ;;  %v187_v2 = vld [vmem:[%s8951_s1 + $0x498] sm:$0xff]  ;;  %v5721_v9 = vcombine.low %v355_v57, %v359_v60 }
 0x127   :  { %2646 = vmatpush1.bf16.msra.mxu0 %v5593_v34  ;;  %2677 = vmatprep.mubr.bf16.mxu0 %v6792_v63  ;;  %v111_v63 = vld [vmem:[%s8951_s1 + $0x238] sm:$0xff] }
 0x128   :  { %2627 = vmatpush2.bf16.msra.mxu1 %v5497_v35  ;;  %2647 = vmatprep.subr.bf16.mxu0 %v5586_v36  ;;  %v5474_v54 = vcombine.high %v107_v49, %v111_v63  ;;  %v5473_v62 = vcombine.low %v107_v49, %v111_v63  ;;  %v191_v3 = vld [vmem:[%s8951_s1 + $0x4b8] sm:$0xff] }
 0x129   :  { %2628 = vmatprep.subr.bf16.mxu1 %v5490_v37  ;;  %v347_v4 = vld [vmem:[%s8951_s1 + $0x998] sm:$0xff]  ;;  %v5554_v10 = vcombine.high %v187_v2, %v191_v3  ;;  %v5553_v18 = vcombine.low %v187_v2, %v191_v3 }
 0x12a   :  { %v351_v6 = vld [vmem:[%s8951_s1 + $0x9b8] sm:$0xff] }
 0x12b   :  { %2648 = vmatpush1.bf16.msra.mxu0 %v5585_v43  ;;  %v5714_v11 = vcombine.high %v347_v4, %v351_v6  ;;  %v179_v12 = vld [vmem:[%s8951_s1 + $0x458] sm:$0xff]  ;;  %v5713_v20 = vcombine.low %v347_v4, %v351_v6 }
 0x12c   :  { %2629 = vmatpush2.bf16.msra.mxu1 %v5489_v44  ;;  %2649 = vmatprep.subr.bf16.mxu0 %v5578_v45  ;;  %v183_v13 = vld [vmem:[%s8951_s1 + $0x478] sm:$0xff] }
 0x12d   :  { %2630 = vmatprep.subr.bf16.mxu1 %v5482_v46  ;;  %v339_v15 = vld [vmem:[%s8951_s1 + $0x958] sm:$0xff]  ;;  %v5546_v23 = vcombine.high %v179_v12, %v183_v13  ;;  %v5545_v33 = vcombine.low %v179_v12, %v183_v13 }
 0x12e   :  { %v343_v16 = vld [vmem:[%s8951_s1 + $0x978] sm:$0xff] }
 0x12f   :  { %2650 = vmatpush1.bf16.msra.mxu0 %v5577_v50  ;;  %v5706_v24 = vcombine.high %v339_v15, %v343_v16  ;;  %v171_v26 = vld [vmem:[%s8951_s1 + $0x418] sm:$0xff]  ;;  %v5705_v34 = vcombine.low %v339_v15, %v343_v16 }
 0x130   :  { %2631 = vmatpush2.bf16.msra.mxu1 %v5481_v52  ;;  %2651 = vmatprep.subr.bf16.mxu0 %v5570_v53  ;;  %v331_v29 = vld [vmem:[%s8951_s1 + $0x918] sm:$0xff] }
 0x131   :  { %2632 = vmatprep.subr.bf16.mxu1 %v5474_v54  ;;  %v335_v30 = vld [vmem:[%s8951_s1 + $0x938] sm:$0xff] }
 0x132   :  { %v291_v38 = vld [vmem:[%s8951_s1 + $0x7d8] sm:$0xff]  ;;  %v5697_v44 = vcombine.low %v331_v29, %v335_v30 }
 0x133   :  { %2652 = vmatpush1.bf16.msra.mxu0 %v5569_v61  ;;  %v295_v39 = vld [vmem:[%s8951_s1 + $0x7f8] sm:$0xff] }
 0x134   :  { %2633 = vmatpush2.bf16.msra.mxu1 %v5473_v62  ;;  %2653 = vmatprep.subr.bf16.mxu0 %v5562_v0  ;;  %v327_v41 = vld [vmem:[%s8951_s1 + $0x8f8] sm:$0xff]  ;;  %v5658_v45 = vcombine.high %v291_v38, %v295_v39  ;;  %v5657_v50 = vcombine.low %v291_v38, %v295_v39 }
 0x135   :  { %2688 = vmatprep.subr.bf16.mxu1 %v5722_v1  ;;  %v283_v47 = vld [vmem:[%s8951_s1 + $0x798] sm:$0xff] }
 0x136   :  { %v2335_v14 = vpop.f32.mrf.mxu0  ;;  %v287_v48 = vld [vmem:[%s8951_s1 + $0x7b8] sm:$0xff] }
 0x137   :  { %v2336_v17 = vadd.f32 %v2335_v14, %v7575_v27  ;;  %2635 = vmatmul.mubr.bf16.vlgmr.msra.gmra.mxu1 %v6925_v21  ;;  %2654 = vmatpush1.bf16.msra.mxu0 %v5561_v7  ;;  %v175_v27 = vld [vmem:[%s8951_s1 + $0x438] sm:$0xff]  ;;  %v5650_v53 = vcombine.high %v283_v47, %v287_v48  ;;  %v5649_v61 = vcombine.low %v283_v47, %v287_v48 }
 0x138   :  { %2689 = vmatpush1.bf16.msra.mxu1 %v5721_v9  ;;  %v7730_v19 = vpop.f32.mrf.mxu0  ;;  %2655 = vmatprep.subr.bf16.mxu0 %v5554_v10  ;;  %v5538_v35 = vcombine.high %v171_v26, %v175_v27  ;;  %v5537_v43 = vcombine.low %v171_v26, %v175_v27  ;;  %v315_v49 = vld [vmem:[%s8951_s1 + $0x898] sm:$0xff]  ;;  %v400_v27 = vsub.s32 1, %v7522_v51 }
 0x139   :  { %2690 = vmatprep.subr.bf16.mxu1 %v5714_v11  ;;  %5762 = vmatprep.mubr.msk.bf16.mxu1 %vm2186_vm0, %v6944_v32  ;;  %v2731_v36 = vmax.f32 %v2336_v17, 0.0  ;;  %v5698_v32 = vcombine.high %v331_v29, %v335_v30  ;;  %v319_v63 = vld [vmem:[%s8951_s1 + $0x8b8] sm:$0xff] }
 0x13a   :  { %v2339_v21 = vpop.f32.mrf.mxu0  ;;  %v5682_v54 = vcombine.high %v315_v49, %v319_v63  ;;  %v275_v55 = vld [vmem:[%s8951_s1 + $0x758] sm:$0xff]  ;;  %v5681_v62 = vcombine.low %v315_v49, %v319_v63  ;;  %v2298_v49 = vpop.f32.mrf.mxu1 }
 0x13b   :  { %v2340_v31 = vadd.f32 %v2339_v21, %v7588_v40  ;;  %2656 = vmatpush1.bf16.msra.mxu0 %v5553_v18  ;;  %v323_v40 = vld [vmem:[%s8951_s1 + $0x8d8] sm:$0xff] }
 0x13c   :  { %2691 = vmatpush1.bf16.msra.mxu1 %v5713_v20  ;;  %2657 = vmatprep.subr.bf16.mxu0 %v5546_v23  ;;  %v5690_v46 = vcombine.high %v323_v40, %v327_v41  ;;  %v5689_v52 = vcombine.low %v323_v40, %v327_v41  ;;  %v279_v56 = vld [vmem:[%s8951_s1 + $0x778] sm:$0xff]  ;;  %v2341_v63 = vpop.f32.mrf.mxu0 }
 0x13d   :  { %v2739_v37 = vmax.f32 %v2340_v31, 0.0  ;;  %2692 = vmatprep.subr.bf16.mxu1 %v5706_v24  ;;  %v307_v57 = vld [vmem:[%s8951_s1 + $0x858] sm:$0xff]  ;;  %v5642_v0 = vcombine.high %v275_v55, %v279_v56  ;;  %v5641_v7 = vcombine.low %v275_v55, %v279_v56 }
 0x13e   :  { %v311_v60 = vld [vmem:[%s8951_s1 + $0x878] sm:$0xff] }
 0x13f   :  { %v7759_v42 = vpack.c.bf16 %v2739_v37, %v2731_v36  ;;  %2658 = vmatpush1.bf16.msra.mxu0 %v5545_v33  ;;  %v5674_v1 = vcombine.high %v307_v57, %v311_v60  ;;  %v267_v2 = vld [vmem:[%s8951_s1 + $0x718] sm:$0xff]  ;;  %v5673_v9 = vcombine.low %v307_v57, %v311_v60  ;;  %v401_v37 = vrot.slane %v7534_v58, %v400_v27 }
 0x140   :  { %2693 = vmatpush1.bf16.msra.mxu1 %v5705_v34  ;;  %2659 = vmatprep.subr.bf16.mxu0 %v5538_v35  ;;  %v271_v3 = vld [vmem:[%s8951_s1 + $0x738] sm:$0xff] }
 0x141   :  { %2694 = vmatprep.subr.bf16.mxu1 %v5698_v32  ;;  %v299_v4 = vld [vmem:[%s8951_s1 + $0x818] sm:$0xff]  ;;  %v5634_v10 = vcombine.high %v267_v2, %v271_v3  ;;  %v5633_v16 = vcombine.low %v267_v2, %v271_v3  ;;  %v2256_v40 = vadd.f32 %v7714_v8, %v401_v37  ;;  %v2252_v47 = vadd.f32 %v7570_v22, %v401_v37  ;;  %v6182_v3 = vld [vmem:[%s8953_s3 + $0xf4] ss:$20 sps:$4 sm:$0xff]   ;;  %v6204_v37 = vld [vmem:[%s8953_s3 + $0x50] ss:$20 sps:$4 sm:$0xff]  }
 0x142   :  { %v303_v6 = vld [vmem:[%s8951_s1 + $0x838] sm:$0xff] }
 0x143   :  { %2660 = vmatpush1.bf16.msra.mxu0 %v5537_v43  ;;  %v5666_v11 = vcombine.high %v299_v4, %v303_v6  ;;  %v259_v12 = vld [vmem:[%s8951_s1 + $0x6d8] sm:$0xff]  ;;  %v5665_v17 = vcombine.low %v299_v4, %v303_v6  ;;  %v2295_v22 = vadd.f32 %v7577_v28, %v2252_v47  ;;  %v6185_v4 = vld [vmem:[%s8953_s3 + $0x374] ss:$20 sps:$4 sm:$0xff]  }
 0x144   :  { %2695 = vmatpush1.bf16.msra.mxu1 %v5697_v44  ;;  %2661 = vmatprep.subr.bf16.mxu0 %v5658_v45  ;;  %v263_v13 = vld [vmem:[%s8951_s1 + $0x6f8] sm:$0xff] }
 0x145   :  { %2696 = vmatprep.subr.bf16.mxu1 %v5690_v46  ;;  %v387_v14 = vld [vmem:[%s8951_s1 + $0xad8] sm:$0xff]  ;;  %v5626_v18 = vcombine.high %v259_v12, %v263_v13  ;;  %v5625_v30 = vcombine.low %v259_v12, %v263_v13  ;;  %v2338_v60 = vadd.f32 %v7730_v19, %v2295_v22  ;;  %v6219_v22 = vld [vmem:[%s8953_s3 + $0x280] ss:$20 sps:$4 sm:$0xff]  }
 0x146   :  { %v391_v15 = vld [vmem:[%s8951_s1 + $0xaf8] sm:$0x33] }
 0x147   :  { %2662 = vmatpush2.bf16.msra.mxu0 %v5657_v50  ;;  %v5754_v20 = vcombine.high %v387_v14, %v391_v15  ;;  %v5753_v23 = vcombine.low %v387_v14, %v391_v15  ;;  %v251_v24 = vld [vmem:[%s8951_s1 + $0x698] sm:$0xff]  ;;  %v2732_v2 = vmax.f32 %v2338_v60, 0.0 }
 0x148   :  { %2697 = vmatpush1.bf16.msra.mxu1 %v5689_v52  ;;  %2663 = vmatprep.subr.bf16.mxu0 %v5650_v53  ;;  %v255_v26 = vld [vmem:[%s8951_s1 + $0x6b8] sm:$0xff]  ;;  %v2299_v52 = vadd.f32 %v2298_v49, %v2256_v40 }
 0x149   :  { %2698 = vmatprep.subr.bf16.mxu1 %v5682_v54  ;;  %v379_v21 = vld [vmem:[%s8951_s1 + $0xa98] sm:$0xff]  ;;  %v5618_v31 = vcombine.high %v251_v24, %v255_v26  ;;  %v2210_v33 = vsel %vm2190_vm1, %v5753_v23, 0  ;;  %v5617_v39 = vcombine.low %v251_v24, %v255_v26 }
 0x14a   :  { %v383_v29 = vld [vmem:[%s8951_s1 + $0xab8] sm:$0xff]  ;;  %v2342_v56 = vadd.f32 %v2341_v63, %v2299_v52 }
 0x14b   :  { %2664 = vmatpush2.bf16.msra.mxu0 %v5649_v61  ;;  %v5746_v34 = vcombine.high %v379_v21, %v383_v29  ;;  %v243_v35 = vld [vmem:[%s8951_s1 + $0x658] sm:$0xff]  ;;  %v5745_v41 = vcombine.low %v379_v21, %v383_v29 }
 0x14c   :  { %2699 = vmatpush1.bf16.msra.mxu1 %v5681_v62  ;;  %2665 = vmatprep.subr.bf16.mxu0 %v5642_v0  ;;  %v247_v36 = vld [vmem:[%s8951_s1 + $0x678] sm:$0xff] }
 0x14d   :  { %2700 = vmatprep.subr.bf16.mxu1 %v5674_v1  ;;  %v371_v32 = vld [vmem:[%s8951_s1 + $0xa58] sm:$0xff]  ;;  %v5610_v43 = vcombine.high %v243_v35, %v247_v36  ;;  %v5609_v50 = vcombine.low %v243_v35, %v247_v36  ;;  %v2740_v1 = vmax.f32 %v2342_v56, 0.0 }
 0x14e   :  { %v375_v38 = vld [vmem:[%s8951_s1 + $0xa78] sm:$0xff] }
 0x14f   :  { %2666 = vmatpush2.bf16.msra.mxu0 %v5641_v7  ;;  %v5738_v44 = vcombine.high %v371_v32, %v375_v38  ;;  %v235_v45 = vld [vmem:[%s8951_s1 + $0x618] sm:$0xff]  ;;  %v5737_v53 = vcombine.low %v371_v32, %v375_v38  ;;  %v7873_v6 = vpack.c.bf16 %v2740_v1, %v2732_v2  ;;  %v6180_v7 = vld [vmem:[%s8953_s3 + $0xf0] ss:$20 sps:$4 sm:$0xff]   ;;  %v6233_v2 = vld [vmem:[%s8953_s3 + $0x4b4] ss:$20 sps:$4 sm:$0xff]  }
 0x150   :  { %2701 = vmatpush1.bf16.msra.mxu1 %v5673_v9  ;;  %2667 = vmatprep.subr.bf16.mxu0 %v5634_v10  ;;  %v239_v46 = vld [vmem:[%s8951_s1 + $0x638] sm:$0xff]  ;;  %v6183_v9 = vld [vmem:[%s8953_s3 + $0x370] ss:$20 sps:$4 sm:$0xff]   ;;  %v6188_v10 = vld [vmem:[%s8953_s3 + $0xcc] ss:$20 sps:$4 sm:$0xff]  }
 0x151   :  { %2702 = vmatprep.subr.bf16.mxu1 %v5666_v11  ;;  %v363_v8 = vld [vmem:[%s8951_s1 + $0xa18] sm:$0xff]  ;;  %v5602_v54 = vcombine.high %v235_v45, %v239_v46  ;;  %v5601_v57 = vcombine.low %v235_v45, %v239_v46  ;;  %v7887_v11 = vpop.f32.mrf.mxu1  ;;  %v6207_v38 = vld [vmem:[%s8953_s3 + $0x2d0] ss:$20 sps:$4 sm:$0xff]  }
 0x152   :  { %v367_v48 = vld [vmem:[%s8951_s1 + $0xa38] sm:$0xff] }
 0x153   :  { %2668 = vmatpush2.bf16.msra.mxu0 %v5633_v16  ;;  %v5730_v55 = vcombine.high %v363_v8, %v367_v48  ;;  %v5729_v61 = vcombine.low %v363_v8, %v367_v48  ;;  %v6176_v62 = vld [vmem:[%s8953_s3 + $0x11c] ss:$20 sps:$4 sm:$0xff]   ;;  %v6174_v28 = vld [vmem:[%s8953_s3 + $0x118] ss:$20 sps:$4 sm:$0xff]   ;;  %v2380_v14 = vpop.f32.mrf.mxu1  ;;  %v408_v16 = vsub.s32 3, %v7522_v51 }
 0x154   :  { %2703 = vmatpush1.bf16.msra.mxu1 %v5665_v17  ;;  %2669 = vmatprep.subr.bf16.mxu0 %v5626_v18  ;;  %v6179_v0 = vld [vmem:[%s8953_s3 + $0x39c] ss:$20 sps:$4 sm:$0xff]   ;;  %v6177_v19 = vld [vmem:[%s8953_s3 + $0x398] ss:$20 sps:$4 sm:$0xff]   ;;  %v6192_v17 = vld [vmem:[%s8953_s3 + $0xa0] ss:$20 sps:$4 sm:$0xff]  }
 0x155   :  { %5761 = vmatprep.subr.msk.bf16.mxu1 %vm2190_vm1, %v5754_v20  ;;  %v6189_v12 = vld [vmem:[%s8953_s3 + $0x348] ss:$20 sps:$4 sm:$0xff]   ;;  %v6194_v13 = vld [vmem:[%s8953_s3 + $0xa4] ss:$20 sps:$4 sm:$0xff]   ;;  %v6195_v18 = vld [vmem:[%s8953_s3 + $0x320] ss:$20 sps:$4 sm:$0xff]   ;;  %v7914_v23 = vpop.f32.mrf.mxu1  ;;  %v409_v26 = vrot.slane %v7534_v58, %v408_v16 }
 0x156   :  { %v6197_v15 = vld [vmem:[%s8953_s3 + $0x324] ss:$20 sps:$4 sm:$0xff]   ;;  %v6200_v20 = vld [vmem:[%s8953_s3 + $0x7c] ss:$20 sps:$4 sm:$0xff]  }
 0x157   :  { %2670 = vmatpush2.bf16.msra.mxu0 %v5625_v30  ;;  %v6203_v24 = vld [vmem:[%s8953_s3 + $0x2fc] ss:$20 sps:$4 sm:$0xff]   ;;  %v6198_v21 = vld [vmem:[%s8953_s3 + $0x78] ss:$20 sps:$4 sm:$0xff]   ;;  %v6206_v30 = vld [vmem:[%s8953_s3 + $0x54] ss:$20 sps:$4 sm:$0xff]   ;;  %v2381_v35 = vadd.f32 %v2380_v14, %v409_v26 }
 0x158   :  { %2713 = vmatpush2.bf16.msra.mxu1 %v2210_v33  ;;  %2671 = vmatprep.subr.bf16.mxu0 %v5618_v31  ;;  %v6201_v29 = vld [vmem:[%s8953_s3 + $0x2f8] ss:$20 sps:$4 sm:$0xff]   ;;  %v2384_v31 = vpop.f32.mrf.mxu1  ;;  %v6209_v33 = vld [vmem:[%s8953_s3 + $0x2d4] ss:$20 sps:$4 sm:$0xff]   ;;  %v6224_v56 = vld [vmem:[%s8953_s3 + $0x25c] ss:$20 sps:$4 sm:$0xff]  }
 0x159   :  { %2714 = vmatprep.subr.bf16.mxu1 %v5746_v34  ;;  %v2385_v45 = vadd.f32 %v2384_v31, %v409_v26  ;;  %v6210_v47 = vld [vmem:[%s8953_s3 + $0x28] ss:$20 sps:$4 sm:$0xff]   ;;  %v6218_v49 = vld [vmem:[%s8953_s3 + $0x4] ss:$20 sps:$4 sm:$0xff]   ;;  %v6243_v14 = vld [vmem:[%s8953_s3 + $0x460] ss:$20 sps:$4 sm:$0xff]  }
 0x15a   :  { %v6213_v48 = vld [vmem:[%s8953_s3 + $0x2a8] ss:$20 sps:$4 sm:$0xff]   ;;  %v6221_v52 = vld [vmem:[%s8953_s3 + $0x284] ss:$20 sps:$4 sm:$0xff]   ;;  %v6260_v31 = vld [vmem:[%s8953_s3 + $0x16c] ss:$20 sps:$4 sm:$0xff]  }
 0x15b   :  { %2672 = vmatpush2.bf16.msra.mxu0 %v5617_v39  ;;  %v6212_v39 = vld [vmem:[%s8953_s3 + $0x2c] ss:$20 sps:$4 sm:$0xff]   ;;  %v6254_v26 = vld [vmem:[%s8953_s3 + $0x194] ss:$20 sps:$4 sm:$0xff]  }
 0x15c   :  { %2715 = vmatpush2.bf16.msra.mxu1 %v5745_v41  ;;  %2673 = vmatprep.subr.bf16.mxu0 %v5610_v43  ;;  %v6215_v43 = vld [vmem:[%s8953_s3 + $0x2ac] ss:$20 sps:$4 sm:$0xff]  }
 0x15d   :  { %2716 = vmatprep.subr.bf16.mxu1 %v5738_v44  ;;  %v6225_v1 = vld [vmem:[%s8953_s3 + $0x4d8] ss:$20 sps:$4 sm:$0xff]  }
 0x15f   :  { %2674 = vmatpush2.bf16.msra.mxu0 %v5609_v50 }
 0x160   :  { %2717 = vmatpush2.bf16.msra.mxu1 %v5737_v53  ;;  %2675 = vmatprep.subr.bf16.mxu0 %v5602_v54 }
 0x161   :  { %2718 = vmatprep.subr.bf16.mxu1 %v5730_v55  ;;  %v6216_v55 = vld [vmem:[%s8953_s3] ss:$20 sps:$4 sm:$0xff]  }
 0x163   :  { %2676 = vmatpush2.bf16.msra.mxu0 %v5601_v57 }
 0x164   :  { %2719 = vmatpush2.bf16.msra.mxu1 %v5729_v61  ;;  %4830 = vmatprep.subr.bf16.mxu0 %v6176_v62  ;;  %v6227_v61 = vld [vmem:[%s8953_s3 + $0x4dc] ss:$20 sps:$4 sm:$0xff]  }
 0x165   :  { %4873 = vmatprep.subr.bf16.mxu1 %v6179_v0  ;;  %v6222_v0 = vld [vmem:[%s8953_s3 + $0x258] ss:$20 sps:$4 sm:$0xff]  }
 0x166   :  { %2678 = vmatmul.mubr.bf16.vlgmr.msra.gmra.mxu0 %v6936_v25  ;;  %v6191_v25 = vld [vmem:[%s8953_s3 + $0x34c] ss:$20 sps:$4 sm:$0xff]  }
 0x167   :  { %2721 = vmatmul.mubr.bf16.vlgmr.msra.gmra.mxu1 %v7097_v5  ;;  %4831 = vmatpush1.bf16.msra.mxu0 %v6174_v28  ;;  %v6186_v5 = vld [vmem:[%s8953_s3 + $0xc8] ss:$20 sps:$4 sm:$0xff]  }
 0x168   :  { %4862 = vmatprep.mubr.bf16.mxu0 %v7873_v6  ;;  %4874 = vmatpush1.bf16.msra.mxu1 %v6177_v19  ;;  %v6230_v28 = vld [vmem:[%s8953_s3 + $0x234] ss:$20 sps:$4 sm:$0xff]   ;;  %v6228_v19 = vld [vmem:[%s8953_s3 + $0x230] ss:$20 sps:$4 sm:$0xff]  }
 0x169   :  { %4832 = vmatprep.subr.bf16.mxu0 %v6182_v3  ;;  %4875 = vmatprep.subr.bf16.mxu1 %v6185_v4  ;;  %v6231_v3 = vld [vmem:[%s8953_s3 + $0x4b0] ss:$20 sps:$4 sm:$0xff]   ;;  %v6236_v4 = vld [vmem:[%s8953_s3 + $0x20c] ss:$20 sps:$4 sm:$0xff]  }
 0x16b   :  { %4833 = vmatpush1.bf16.msra.mxu0 %v6180_v7  ;;  %v6239_v7 = vld [vmem:[%s8953_s3 + $0x48c] ss:$20 sps:$4 sm:$0xff]  }
 0x16c   :  { %4876 = vmatpush1.bf16.msra.mxu1 %v6183_v9  ;;  %4834 = vmatprep.subr.bf16.mxu0 %v6188_v10  ;;  %v6234_v9 = vld [vmem:[%s8953_s3 + $0x208] ss:$20 sps:$4 sm:$0xff]  }
 0x16d   :  { %4877 = vmatprep.subr.bf16.mxu1 %v6191_v25  ;;  %v6237_v10 = vld [vmem:[%s8953_s3 + $0x488] ss:$20 sps:$4 sm:$0xff]   ;;  %v6242_v25 = vld [vmem:[%s8953_s3 + $0x1e4] ss:$20 sps:$4 sm:$0xff]  }
 0x16f   :  { %4835 = vmatpush1.bf16.msra.mxu0 %v6186_v5  ;;  %v6245_v5 = vld [vmem:[%s8953_s3 + $0x464] ss:$20 sps:$4 sm:$0xff]  }
 0x170   :  { %4878 = vmatpush1.bf16.msra.mxu1 %v6189_v12  ;;  %4836 = vmatprep.subr.bf16.mxu0 %v6194_v13  ;;  %v404_v12 = vsub.s32 2, %v7522_v51  ;;  %v6240_v13 = vld [vmem:[%s8953_s3 + $0x1e0] ss:$20 sps:$4 sm:$0xff]  }
 0x171   :  { %4879 = vmatprep.subr.bf16.mxu1 %v6197_v15  ;;  %v6248_v15 = vld [vmem:[%s8953_s3 + $0x1bc] ss:$20 sps:$4 sm:$0xff]  }
 0x173   :  { %4837 = vmatpush1.bf16.msra.mxu0 %v6192_v17  ;;  %v6251_v17 = vld [vmem:[%s8953_s3 + $0x43c] ss:$20 sps:$4 sm:$0xff]  }
 0x174   :  { %4880 = vmatpush1.bf16.msra.mxu1 %v6195_v18  ;;  %4838 = vmatprep.subr.bf16.mxu0 %v6200_v20  ;;  %v405_v18 = vrot.slane %v7534_v58, %v404_v12  ;;  %v6246_v20 = vld [vmem:[%s8953_s3 + $0x1b8] ss:$20 sps:$4 sm:$0xff]   ;;  %v6257_v58 = vld [vmem:[%s8953_s3 + $0x414] ss:$20 sps:$4 sm:$0xff]  }
 0x175   :  { %4881 = vmatprep.subr.bf16.mxu1 %v6203_v24  ;;  %v6249_v24 = vld [vmem:[%s8953_s3 + $0x438] ss:$20 sps:$4 sm:$0xff]  }
 0x176   :  { %v7934_v34 = vpop.f32.mrf.mxu0 }
 0x177   :  { %v7936_v36 = vpop.f32.mrf.mxu1  ;;  %4839 = vmatpush1.bf16.msra.mxu0 %v6198_v21  ;;  %v2383_v21 = vadd.f32 %v7914_v23, %v405_v18  ;;  %v6263_v23 = vld [vmem:[%s8953_s3 + $0x3ec] ss:$20 sps:$4 sm:$0xff]  }
 0x178   :  { %4882 = vmatpush1.bf16.msra.mxu1 %v6201_v29  ;;  %v2423_v32 = vpop.f32.mrf.mxu0  ;;  %4840 = vmatprep.subr.bf16.mxu0 %v6206_v30  ;;  %v6252_v29 = vld [vmem:[%s8953_s3 + $0x190] ss:$20 sps:$4 sm:$0xff]  }
 0x179   :  { %v2424_v40 = vadd.f32 %v2423_v32, %v2381_v35  ;;  %v2466_v41 = vpop.f32.mrf.mxu1  ;;  %4883 = vmatprep.subr.bf16.mxu1 %v6209_v33  ;;  %v6255_v30 = vld [vmem:[%s8953_s3 + $0x410] ss:$20 sps:$4 sm:$0xff]   ;;  %v2379_v33 = vadd.f32 %v7887_v11, %v405_v18  ;;  %v6258_v32 = vld [vmem:[%s8953_s3 + $0x168] ss:$20 sps:$4 sm:$0xff]   ;;  %v6363_v18 = vld [vmem:[%s8953_s3 + $0x780] ss:$20 sps:$4 sm:$0xff]  }
 0x17a   :  { %v7950_v44 = vpop.f32.mrf.mxu0  ;;  %v6261_v11 = vld [vmem:[%s8953_s3 + $0x3e8] ss:$20 sps:$4 sm:$0xff]  }
 0x17b   :  { %v7952_v46 = vpop.f32.mrf.mxu1  ;;  %4841 = vmatpush1.bf16.msra.mxu0 %v6204_v37  ;;  %v2467_v63 = vadd.f32 %v2466_v41, %v2424_v40  ;;  %v2426_v35 = vadd.f32 %v7950_v44, %v2383_v21  ;;  %v2422_v37 = vadd.f32 %v7934_v34, %v2379_v33  ;;  %v6269_v34 = vld [vmem:[%s8953_s3 + $0x3c4] ss:$20 sps:$4 sm:$0xff]   ;;  %v6264_v41 = vld [vmem:[%s8953_s3 + $0x140] ss:$20 sps:$4 sm:$0xff]   ;;  %v6272_v44 = vld [vmem:[%s8953_s3 + $0x61c] ss:$20 sps:$4 sm:$0xff]  }
 0x17c   :  { %4884 = vmatpush1.bf16.msra.mxu1 %v6207_v38  ;;  %v2427_v8 = vpop.f32.mrf.mxu0  ;;  %4842 = vmatprep.subr.bf16.mxu0 %v6212_v39  ;;  %v6266_v38 = vld [vmem:[%s8953_s3 + $0x144] ss:$20 sps:$4 sm:$0xff]   ;;  %v6377_v21 = vld [vmem:[%s8953_s3 + $0x9b4] ss:$20 sps:$4 sm:$0xff]   ;;  %v6383_v33 = vld [vmem:[%s8953_s3 + $0x98c] ss:$20 sps:$4 sm:$0xff]  }
 0x17d   :  { %v2428_v50 = vadd.f32 %v2427_v8, %v2385_v45  ;;  %4885 = vmatprep.subr.bf16.mxu1 %v6215_v43  ;;  %v2470_v53 = vpop.f32.mrf.mxu1  ;;  %v2734_v57 = vmax.f32 %v2467_v63, 0.0  ;;  %v2469_v39 = vadd.f32 %v7952_v46, %v2426_v35  ;;  %v2465_v40 = vadd.f32 %v7936_v36, %v2422_v37  ;;  %v6267_v43 = vld [vmem:[%s8953_s3 + $0x3c0] ss:$20 sps:$4 sm:$0xff]   ;;  %v6323_v36 = vld [vmem:[%s8953_s3 + $0x89c] ss:$20 sps:$4 sm:$0xff]  }
 0x17e   :  { %v6275_v8 = vld [vmem:[%s8953_s3 + $0x5f4] ss:$20 sps:$4 sm:$0xff]  }
 0x17f   :  { %v2471_v54 = vadd.f32 %v2470_v53, %v2428_v50  ;;  %4843 = vmatpush1.bf16.msra.mxu0 %v6210_v47  ;;  %v2741_v45 = vmax.f32 %v2469_v39, 0.0  ;;  %v2733_v46 = vmax.f32 %v2465_v40, 0.0  ;;  %v6270_v47 = vld [vmem:[%s8953_s3 + $0x618] ss:$20 sps:$4 sm:$0xff]   ;;  %v6329_v63 = vld [vmem:[%s8953_s3 + $0x874] ss:$20 sps:$4 sm:$0xff]  }
 0x180   :  { %4886 = vmatpush1.bf16.msra.mxu1 %v6213_v48  ;;  %4844 = vmatprep.subr.bf16.mxu0 %v6218_v49  ;;  %v6321_v48 = vld [vmem:[%s8953_s3 + $0x898] ss:$20 sps:$4 sm:$0xff]   ;;  %v6273_v50 = vld [vmem:[%s8953_s3 + $0x5f0] ss:$20 sps:$4 sm:$0xff]   ;;  %v6300_v35 = vld [vmem:[%s8953_s3 + $0x708] ss:$20 sps:$4 sm:$0xff]  }
 0x181   :  { %v2742_v60 = vmax.f32 %v2471_v54, 0.0  ;;  %4887 = vmatprep.subr.bf16.mxu1 %v6221_v52  ;;  %v8096_v49 = vpack.c.bf16 %v2741_v45, %v2733_v46  ;;  %v6278_v52 = vld [vmem:[%s8953_s3 + $0x5cc] ss:$20 sps:$4 sm:$0xff]   ;;  %v6327_v53 = vld [vmem:[%s8953_s3 + $0x870] ss:$20 sps:$4 sm:$0xff]  }
 0x182   :  { %v6335_v54 = vld [vmem:[%s8953_s3 + $0x84c] ss:$20 sps:$4 sm:$0xff]   ;;  %v6381_v37 = vld [vmem:[%s8953_s3 + $0x988] ss:$20 sps:$4 sm:$0xff]   ;;  %v6309_v45 = vld [vmem:[%s8953_s3 + $0x690] ss:$20 sps:$4 sm:$0xff]  }
 0x183   :  { %v7978_v62 = vpack.c.bf16 %v2742_v60, %v2734_v57  ;;  %4845 = vmatpush1.bf16.msra.mxu0 %v6216_v55  ;;  %v6276_v55 = vld [vmem:[%s8953_s3 + $0x5c8] ss:$20 sps:$4 sm:$0xff]   ;;  %v6341_v57 = vld [vmem:[%s8953_s3 + $0x824] ss:$20 sps:$4 sm:$0xff]   ;;  %v6279_v60 = vld [vmem:[%s8953_s3 + $0x5a0] ss:$20 sps:$4 sm:$0xff]  }
 0x184   :  { %4888 = vmatpush1.bf16.msra.mxu1 %v6219_v22  ;;  %4846 = vmatprep.subr.bf16.mxu0 %v6224_v56  ;;  %v6281_v22 = vld [vmem:[%s8953_s3 + $0x5a4] ss:$20 sps:$4 sm:$0xff]   ;;  %v6333_v56 = vld [vmem:[%s8953_s3 + $0x848] ss:$20 sps:$4 sm:$0xff]   ;;  %v6387_v39 = vld [vmem:[%s8953_s3 + $0x960] ss:$20 sps:$4 sm:$0xff]  }
 0x185   :  { %4905 = vmatprep.mubr.bf16.mxu1 %v7978_v62  ;;  %4889 = vmatprep.subr.bf16.mxu1 %v6227_v61  ;;  %v6284_v61 = vld [vmem:[%s8953_s3 + $0x57c] ss:$20 sps:$4 sm:$0xff]   ;;  %v6306_v40 = vld [vmem:[%s8953_s3 + $0x6b8] ss:$20 sps:$4 sm:$0xff]  }
 0x186   :  { %v6314_v46 = vld [vmem:[%s8953_s3 + $0x66c] ss:$20 sps:$4 sm:$0xff]  }
 0x187   :  { %4847 = vmatpush2.bf16.msra.mxu0 %v6222_v0  ;;  %v6339_v0 = vld [vmem:[%s8953_s3 + $0x820] ss:$20 sps:$4 sm:$0xff]  }
 0x188   :  { %4890 = vmatpush2.bf16.msra.mxu1 %v6225_v1  ;;  %4848 = vmatprep.subr.bf16.mxu0 %v6230_v28  ;;  %v6347_v1 = vld [vmem:[%s8953_s3 + $0x7fc] ss:$20 sps:$4 sm:$0xff]   ;;  %v6282_v28 = vld [vmem:[%s8953_s3 + $0x578] ss:$20 sps:$4 sm:$0xff]  }
 0x189   :  { %4891 = vmatprep.subr.bf16.mxu1 %v6233_v2  ;;  %v6287_v2 = vld [vmem:[%s8953_s3 + $0x554] ss:$20 sps:$4 sm:$0xff]  }
 0x18b   :  { %4849 = vmatpush2.bf16.msra.mxu0 %v6228_v19  ;;  %v6345_v19 = vld [vmem:[%s8953_s3 + $0x7f8] ss:$20 sps:$4 sm:$0xff]  }
 0x18c   :  { %4892 = vmatpush2.bf16.msra.mxu1 %v6231_v3  ;;  %4850 = vmatprep.subr.bf16.mxu0 %v6236_v4  ;;  %v6353_v3 = vld [vmem:[%s8953_s3 + $0x7d4] ss:$20 sps:$4 sm:$0xff]   ;;  %v6285_v4 = vld [vmem:[%s8953_s3 + $0x550] ss:$20 sps:$4 sm:$0xff]  }
 0x18d   :  { %4893 = vmatprep.subr.bf16.mxu1 %v6239_v7  ;;  %v6290_v7 = vld [vmem:[%s8953_s3 + $0x52c] ss:$20 sps:$4 sm:$0xff]  }
 0x18f   :  { %4851 = vmatpush2.bf16.msra.mxu0 %v6234_v9  ;;  %v6351_v9 = vld [vmem:[%s8953_s3 + $0x7d0] ss:$20 sps:$4 sm:$0xff]  }
 0x190   :  { %4894 = vmatpush2.bf16.msra.mxu1 %v6237_v10  ;;  %4852 = vmatprep.subr.bf16.mxu0 %v6242_v25  ;;  %v6359_v10 = vld [vmem:[%s8953_s3 + $0x7ac] ss:$20 sps:$4 sm:$0xff]   ;;  %v6288_v25 = vld [vmem:[%s8953_s3 + $0x528] ss:$20 sps:$4 sm:$0xff]  }
 0x191   :  { %4895 = vmatprep.subr.bf16.mxu1 %v6245_v5  ;;  %v6293_v5 = vld [vmem:[%s8953_s3 + $0x504] ss:$20 sps:$4 sm:$0xff]  }
 0x193   :  { %4853 = vmatpush2.bf16.msra.mxu0 %v6240_v13  ;;  %v6357_v13 = vld [vmem:[%s8953_s3 + $0x7a8] ss:$20 sps:$4 sm:$0xff]  }
 0x194   :  { %4896 = vmatpush2.bf16.msra.mxu1 %v6243_v14  ;;  %4854 = vmatprep.subr.bf16.mxu0 %v6248_v15  ;;  %v6365_v14 = vld [vmem:[%s8953_s3 + $0x784] ss:$20 sps:$4 sm:$0xff]   ;;  %v6291_v15 = vld [vmem:[%s8953_s3 + $0x500] ss:$20 sps:$4 sm:$0xff]  }
 0x195   :  { %4897 = vmatprep.subr.bf16.mxu1 %v6251_v17  ;;  %v6296_v17 = vld [vmem:[%s8953_s3 + $0x75c] ss:$20 sps:$4 sm:$0xff]  }
 0x197   :  { %4855 = vmatpush2.bf16.msra.mxu0 %v6246_v20  ;;  %v6371_v20 = vld [vmem:[%s8953_s3 + $0x9dc] ss:$20 sps:$4 sm:$0xff]  }
 0x198   :  { %4898 = vmatpush2.bf16.msra.mxu1 %v6249_v24  ;;  %4856 = vmatprep.subr.bf16.mxu0 %v6254_v26  ;;  %v6294_v24 = vld [vmem:[%s8953_s3 + $0x758] ss:$20 sps:$4 sm:$0xff]   ;;  %v6299_v26 = vld [vmem:[%s8953_s3 + $0x734] ss:$20 sps:$4 sm:$0xff]  }
 0x199   :  { %4899 = vmatprep.subr.bf16.mxu1 %v6257_v58  ;;  %v6369_v58 = vld [vmem:[%s8953_s3 + $0x9d8] ss:$20 sps:$4 sm:$0xff]  }
 0x19b   :  { %4857 = vmatpush2.bf16.msra.mxu0 %v6252_v29  ;;  %v6297_v29 = vld [vmem:[%s8953_s3 + $0x730] ss:$20 sps:$4 sm:$0xff]  }
 0x19c   :  { %4900 = vmatpush2.bf16.msra.mxu1 %v6255_v30  ;;  %4858 = vmatprep.subr.bf16.mxu0 %v6260_v31  ;;  %v6302_v30 = vld [vmem:[%s8953_s3 + $0x70c] ss:$20 sps:$4 sm:$0xff]   ;;  %v6375_v31 = vld [vmem:[%s8953_s3 + $0x9b0] ss:$20 sps:$4 sm:$0xff]  }
 0x19d   :  { %4901 = vmatprep.subr.bf16.mxu1 %v6263_v23  ;;  %v6305_v23 = vld [vmem:[%s8953_s3 + $0x6e4] ss:$20 sps:$4 sm:$0xff]  }
 0x19f   :  { %4859 = vmatpush2.bf16.msra.mxu0 %v6258_v32  ;;  %v6389_v32 = vld [vmem:[%s8953_s3 + $0x964] ss:$20 sps:$4 sm:$0xff]  }
 0x1a0   :  { %4902 = vmatpush2.bf16.msra.mxu1 %v6261_v11  ;;  %4860 = vmatprep.subr.bf16.mxu0 %v6266_v38  ;;  %v6303_v11 = vld [vmem:[%s8953_s3 + $0x6e0] ss:$20 sps:$4 sm:$0xff]   ;;  %v6308_v38 = vld [vmem:[%s8953_s3 + $0x6bc] ss:$20 sps:$4 sm:$0xff]  }
 0x1a1   :  { %4903 = vmatprep.subr.bf16.mxu1 %v6269_v34  ;;  %v6395_v34 = vld [vmem:[%s8953_s3 + $0x93c] ss:$20 sps:$4 sm:$0xff]  }
 0x1a3   :  { %4861 = vmatpush2.bf16.msra.mxu0 %v6264_v41  ;;  %v6311_v41 = vld [vmem:[%s8953_s3 + $0x694] ss:$20 sps:$4 sm:$0xff]  }
 0x1a4   :  { %4904 = vmatpush2.bf16.msra.mxu1 %v6267_v43  ;;  %4916 = vmatprep.subr.bf16.mxu0 %v6272_v44  ;;  %v6393_v43 = vld [vmem:[%s8953_s3 + $0x938] ss:$20 sps:$4 sm:$0xff]   ;;  %v6401_v44 = vld [vmem:[%s8953_s3 + $0x914] ss:$20 sps:$4 sm:$0xff]  }
 0x1a5   :  { %4959 = vmatprep.subr.bf16.mxu1 %v6323_v36 }
 0x1a6   :  { %4863 = vmatmul.mubr.bf16.vlgmr.msra.gmra.mxu0 %v7759_v42 }
 0x1a7   :  { %4906 = vmatmul.mubr.bf16.vlgmr.msra.gmra.mxu1 %v8096_v49  ;;  %4917 = vmatpush1.bf16.msra.mxu0 %v6270_v47  ;;  %v6399_v47 = vld [vmem:[%s8953_s3 + $0x910] ss:$20 sps:$4 sm:$0xff]  }
 0x1a8   :  { %4918 = vmatprep.subr.bf16.mxu0 %v6275_v8  ;;  %4960 = vmatpush1.bf16.msra.mxu1 %v6321_v48  ;;  %v6407_v8 = vld [vmem:[%s8953_s3 + $0x8ec] ss:$20 sps:$4 sm:$0xff]   ;;  %v6312_v48 = vld [vmem:[%s8953_s3 + $0x668] ss:$20 sps:$4 sm:$0xff]  }
 0x1a9   :  { %4961 = vmatprep.subr.bf16.mxu1 %v6329_v63 }
 0x1ab   :  { %4919 = vmatpush1.bf16.msra.mxu0 %v6273_v50  ;;  %v6317_v50 = vld [vmem:[%s8953_s3 + $0x644] ss:$20 sps:$4 sm:$0xff]  }
 0x1ac   :  { %4920 = vmatprep.subr.bf16.mxu0 %v6278_v52  ;;  %4962 = vmatpush1.bf16.msra.mxu1 %v6327_v53  ;;  %v6405_v52 = vld [vmem:[%s8953_s3 + $0x8e8] ss:$20 sps:$4 sm:$0xff]   ;;  %v416_v53 = vsub.s32 5, %v7522_v51 }
 0x1ad   :  { %4963 = vmatprep.subr.bf16.mxu1 %v6335_v54  ;;  %v6413_v54 = vld [vmem:[%s8953_s3 + $0x8c4] ss:$20 sps:$4 sm:$0xff]  }
 0x1af   :  { %4921 = vmatpush1.bf16.msra.mxu0 %v6276_v55  ;;  %v412_v55 = vsub.s32 4, %v7522_v51 }
 0x1b0   :  { %4922 = vmatprep.subr.bf16.mxu0 %v6281_v22  ;;  %4964 = vmatpush1.bf16.msra.mxu1 %v6333_v56  ;;  %v6315_v56 = vld [vmem:[%s8953_s3 + $0x640] ss:$20 sps:$4 sm:$0xff]  }
 0x1b1   :  { %4965 = vmatprep.subr.bf16.mxu1 %v6341_v57 }
 0x1b3   :  { %4923 = vmatpush1.bf16.msra.mxu0 %v6279_v60  ;;  %v6320_v60 = vld [vmem:[%s8953_s3 + $0x124] ss:$20 sps:$4 sm:$0xff]  }
 0x1b4   :  { %4924 = vmatprep.subr.bf16.mxu0 %v6284_v61  ;;  %4966 = vmatpush1.bf16.msra.mxu1 %v6339_v0  ;;  %v6411_v61 = vld [vmem:[%s8953_s3 + $0x8c0] ss:$20 sps:$4 sm:$0xff]  }
 0x1b5   :  { %4967 = vmatprep.subr.bf16.mxu1 %v6347_v1  ;;  %v8285_v0 = vld [vmem:[%s8952_s2] sm:$0xff] }
 0x1b6   :  { %v2507_v36 = vpop.f32.mrf.mxu0  ;;  %v417_v1 = vrot.slane %v8285_v0, %v416_v53  ;;  %v6374_v53 = vld [vmem:[%s8953_s3 + $0x23c] ss:$20 sps:$4 sm:$0xff]  }
 0x1b7   :  { %4925 = vmatpush1.bf16.msra.mxu0 %v6282_v28  ;;  %v2550_v22 = vpop.f32.mrf.mxu1  ;;  %v6419_v28 = vld [vmem:[%s8953_s3 + $0x3a4] ss:$20 sps:$4 sm:$0xff]  }
 0x1b8   :  { %4926 = vmatprep.subr.bf16.mxu0 %v6287_v2  ;;  %4968 = vmatpush1.bf16.msra.mxu1 %v6345_v19  ;;  %v2509_v63 = vpop.f32.mrf.mxu0  ;;  %v413_v2 = vrot.slane %v8285_v0, %v412_v55 }
 0x1b9   :  { %4969 = vmatprep.subr.bf16.mxu1 %v6353_v3  ;;  %v2552_v19 = vpop.f32.mrf.mxu1 }
 0x1ba   :  { %v2511_v57 = vpop.f32.mrf.mxu0 }
 0x1bb   :  { %4927 = vmatpush1.bf16.msra.mxu0 %v6285_v4  ;;  %v2510_v4 = vadd.f32 %v2509_v63, %v417_v1  ;;  %v6360_v63 = vld [vmem:[%s8953_s3 + $0x8] ss:$20 sps:$4 sm:$0xff]  }
 0x1bc   :  { %4928 = vmatprep.subr.bf16.mxu0 %v6290_v7  ;;  %4970 = vmatpush1.bf16.msra.mxu1 %v6351_v9  ;;  %v2513_v3 = vpop.f32.mrf.mxu0  ;;  %v2512_v7 = vadd.f32 %v2511_v57, %v413_v2  ;;  %v2508_v9 = vadd.f32 %v2507_v36, %v413_v2  ;;  %v6350_v36 = vld [vmem:[%s8953_s3 + $0x5c] ss:$20 sps:$4 sm:$0xff]   ;;  %v424_v2 = vsub.s32 7, %v7522_v51 }
 0x1bd   :  { %4971 = vmatprep.subr.bf16.mxu1 %v6359_v10  ;;  %v2554_v10 = vpop.f32.mrf.mxu1  ;;  %v6378_v57 = vld [vmem:[%s8953_s3 + $0x210] ss:$20 sps:$4 sm:$0xff]  }
 0x1bf   :  { %4929 = vmatpush1.bf16.msra.mxu0 %v6288_v25 }
 0x1c0   :  { %4930 = vmatprep.subr.bf16.mxu0 %v6293_v5  ;;  %4972 = vmatpush1.bf16.msra.mxu1 %v6357_v13  ;;  %v2514_v5 = vadd.f32 %v2513_v3, %v417_v1  ;;  %v6384_v1 = vld [vmem:[%s8953_s3 + $0x1e8] ss:$20 sps:$4 sm:$0xff]  }
 0x1c1   :  { %4973 = vmatprep.subr.bf16.mxu1 %v6365_v14  ;;  %v2553_v14 = vadd.f32 %v2552_v19, %v2510_v4  ;;  %v420_v19 = vsub.s32 6, %v7522_v51  ;;  %v6390_v4 = vld [vmem:[%s8953_s3 + $0x1c0] ss:$20 sps:$4 sm:$0xff]  }
 0x1c3   :  { %4931 = vmatpush1.bf16.msra.mxu0 %v6291_v15  ;;  %v2555_v15 = vadd.f32 %v2554_v10, %v2512_v7  ;;  %v6398_v7 = vld [vmem:[%s8953_s3 + $0x19c] ss:$20 sps:$4 sm:$0xff]   ;;  %v421_v10 = vrot.slane %v8285_v0, %v420_v19  ;;  %v6440_v19 = vld [vmem:[%s8953_s3 + $0x584] ss:$20 sps:$4 sm:$0xff]  }
 0x1c4   :  { %4932 = vmatprep.subr.bf16.mxu0 %v6296_v17  ;;  %4974 = vmatpush1.bf16.msra.mxu1 %v6363_v18  ;;  %v2551_v17 = vadd.f32 %v2550_v22, %v2508_v9  ;;  %v2556_v18 = vpop.f32.mrf.mxu1  ;;  %v6380_v22 = vld [vmem:[%s8953_s3 + $0x214] ss:$20 sps:$4 sm:$0xff]   ;;  %v425_v9 = vrot.slane %v8285_v0, %v424_v2  ;;  %v6402_v0 = vld [vmem:[%s8953_s3 + $0x170] ss:$20 sps:$4 sm:$0xff]   ;;  %v6437_v2 = vld [vmem:[%s8953_s3 + $0x32c] ss:$20 sps:$4 sm:$0xff]  }
 0x1c5   :  { %4975 = vmatprep.subr.bf16.mxu1 %v6371_v20 }
 0x1c7   :  { %4933 = vmatpush2.bf16.msra.mxu0 %v6294_v24  ;;  %v2557_v24 = vadd.f32 %v2556_v18, %v2514_v5  ;;  %v6396_v5 = vld [vmem:[%s8953_s3 + $0x198] ss:$20 sps:$4 sm:$0xff]  }
 0x1c8   :  { %4934 = vmatprep.subr.bf16.mxu0 %v6299_v26  ;;  %4976 = vmatpush2.bf16.msra.mxu1 %v6369_v58 }
 0x1c9   :  { %4977 = vmatprep.subr.bf16.mxu1 %v6377_v21 }
 0x1cb   :  { %4935 = vmatpush2.bf16.msra.mxu0 %v6297_v29 }
 0x1cc   :  { %4936 = vmatprep.subr.bf16.mxu0 %v6302_v30  ;;  %4978 = vmatpush2.bf16.msra.mxu1 %v6375_v31 }
 0x1cd   :  { %4979 = vmatprep.subr.bf16.mxu1 %v6383_v33 }
 0x1cf   :  { %4937 = vmatpush2.bf16.msra.mxu0 %v6300_v35 }
 0x1d0   :  { %4938 = vmatprep.subr.bf16.mxu0 %v6305_v23  ;;  %4980 = vmatpush2.bf16.msra.mxu1 %v6381_v37 }
 0x1d1   :  { %4981 = vmatprep.subr.bf16.mxu1 %v6389_v32  ;;  %v6318_v32 = vld [vmem:[%s8953_s3 + $0x120] ss:$20 sps:$4 sm:$0xff]  }
 0x1d3   :  { %4939 = vmatpush2.bf16.msra.mxu0 %v6303_v11 }
 0x1d4   :  { %4940 = vmatprep.subr.bf16.mxu0 %v6308_v38  ;;  %4982 = vmatpush2.bf16.msra.mxu1 %v6387_v39  ;;  %v6326_v38 = vld [vmem:[%s8953_s3 + $0xfc] ss:$20 sps:$4 sm:$0xff]   ;;  %v6324_v39 = vld [vmem:[%s8953_s3 + $0xf8] ss:$20 sps:$4 sm:$0xff]  }
 0x1d5   :  { %4983 = vmatprep.subr.bf16.mxu1 %v6395_v34  ;;  %v6332_v34 = vld [vmem:[%s8953_s3 + $0xd4] ss:$20 sps:$4 sm:$0xff]  }
 0x1d7   :  { %4941 = vmatpush2.bf16.msra.mxu0 %v6306_v40  ;;  %v6330_v40 = vld [vmem:[%s8953_s3 + $0xd0] ss:$20 sps:$4 sm:$0xff]  }
 0x1d8   :  { %4942 = vmatprep.subr.bf16.mxu0 %v6311_v41  ;;  %4984 = vmatpush2.bf16.msra.mxu1 %v6393_v43  ;;  %v6338_v41 = vld [vmem:[%s8953_s3 + $0xac] ss:$20 sps:$4 sm:$0xff]   ;;  %v6336_v43 = vld [vmem:[%s8953_s3 + $0xa8] ss:$20 sps:$4 sm:$0xff]  }
 0x1d9   :  { %4985 = vmatprep.subr.bf16.mxu1 %v6401_v44  ;;  %v6344_v44 = vld [vmem:[%s8953_s3 + $0x84] ss:$20 sps:$4 sm:$0xff]  }
 0x1db   :  { %4943 = vmatpush2.bf16.msra.mxu0 %v6309_v45  ;;  %v6342_v45 = vld [vmem:[%s8953_s3 + $0x80] ss:$20 sps:$4 sm:$0xff]  }
 0x1dc   :  { %4944 = vmatprep.subr.bf16.mxu0 %v6314_v46  ;;  %4986 = vmatpush2.bf16.msra.mxu1 %v6399_v47  ;;  %v6348_v46 = vld [vmem:[%s8953_s3 + $0x58] ss:$20 sps:$4 sm:$0xff]   ;;  %v6356_v47 = vld [vmem:[%s8953_s3 + $0x34] ss:$20 sps:$4 sm:$0xff]  }
 0x1dd   :  { %4987 = vmatprep.subr.bf16.mxu1 %v6407_v8  ;;  %v6354_v8 = vld [vmem:[%s8953_s3 + $0x30] ss:$20 sps:$4 sm:$0xff]  }
 0x1df   :  { %4945 = vmatpush2.bf16.msra.mxu0 %v6312_v48  ;;  %v6362_v48 = vld [vmem:[%s8953_s3 + $0xc] ss:$20 sps:$4 sm:$0xff]  }
 0x1e0   :  { %4946 = vmatprep.subr.bf16.mxu0 %v6317_v50  ;;  %4988 = vmatpush2.bf16.msra.mxu1 %v6405_v52  ;;  %v6368_v50 = vld [vmem:[%s8953_s3 + $0x264] ss:$20 sps:$4 sm:$0xff]   ;;  %v6366_v52 = vld [vmem:[%s8953_s3 + $0x260] ss:$20 sps:$4 sm:$0xff]  }
 0x1e1   :  { %4989 = vmatprep.subr.bf16.mxu1 %v6413_v54  ;;  %v6372_v54 = vld [vmem:[%s8953_s3 + $0x238] ss:$20 sps:$4 sm:$0xff]  }
 0x1e3   :  { %4947 = vmatpush2.bf16.msra.mxu0 %v6315_v56 }
 0x1e4   :  { %5002 = vmatprep.subr.bf16.mxu0 %v6320_v60  ;;  %4990 = vmatpush2.bf16.msra.mxu1 %v6411_v61  ;;  %v6386_v60 = vld [vmem:[%s8953_s3 + $0x1ec] ss:$20 sps:$4 sm:$0xff]  }
 0x1e5   :  { %5045 = vmatprep.subr.bf16.mxu1 %v6419_v28  ;;  %v6392_v28 = vld [vmem:[%s8953_s3 + $0x1c4] ss:$20 sps:$4 sm:$0xff]  }
 0x1e6   :  { %v2593_v25 = vpop.f32.mrf.mxu0 }
 0x1e7   :  { %v2594_v21 = vadd.f32 %v2593_v25, %v2551_v17 }
 0x1e8   :  { %v2595_v13 = vpop.f32.mrf.mxu0 }
 0x1e9   :  { %v2596_v26 = vadd.f32 %v2595_v13, %v2553_v14  ;;  %v2735_v23 = vmax.f32 %v2594_v21, 0.0  ;;  %v6404_v14 = vld [vmem:[%s8953_s3 + $0x174] ss:$20 sps:$4 sm:$0xff]  }
 0x1ea   :  { %v2597_v20 = vpop.f32.mrf.mxu0 }
 0x1eb   :  { %v2598_v58 = vadd.f32 %v2597_v20, %v2555_v15  ;;  %v2736_v33 = vmax.f32 %v2596_v26, 0.0 }
 0x1ec   :  { %v2599_v29 = vpop.f32.mrf.mxu0 }
 0x1ed   :  { %v2600_v30 = vadd.f32 %v2599_v29, %v2557_v24  ;;  %v2743_v31 = vmax.f32 %v2598_v58, 0.0  ;;  %v6410_v29 = vld [vmem:[%s8953_s3 + $0x14c] ss:$20 sps:$4 sm:$0xff]  }
 0x1ef   :  { %v2744_v35 = vmax.f32 %v2600_v30, 0.0  ;;  %v8299_v11 = vpack.c.bf16 %v2743_v31, %v2735_v23 }
 0x1f1   :  { %v8294_v37 = vpack.c.bf16 %v2744_v35, %v2736_v33 }
 0x1f3   :  { %4948 = vmatprep.mubr.bf16.mxu0 %v8294_v37 }
 0x1f4   :  { %4949 = vmatmul.mubr.bf16.vlgmr.msra.gmra.mxu0 %v8299_v11 }
 0x1f5   :  { %5003 = vmatpush1.bf16.msra.mxu0 %v6318_v32  ;;  %5034 = vmatprep.mubr.bf16.mxu0 %v7873_v6 }
 0x1f6   :  { %5004 = vmatprep.subr.bf16.mxu0 %v6326_v38 }
 0x1f7   :  { %v2636_v56 = vpop.f32.mrf.mxu1 }
 0x1f8   :  { %v2637_v20 = vadd.f32 %v2636_v56, %v421_v10  ;;  %v6423_v56 = vld [vmem:[%s8953_s3 + $0x378] ss:$20 sps:$4 sm:$0xff]  }
 0x1f9   :  { %5005 = vmatpush1.bf16.msra.mxu0 %v6324_v39  ;;  %v2638_v61 = vpop.f32.mrf.mxu1 }
 0x1fa   :  { %5006 = vmatprep.subr.bf16.mxu0 %v6332_v34  ;;  %v2639_v15 = vadd.f32 %v2638_v61, %v425_v9  ;;  %v6408_v34 = vld [vmem:[%s8953_s3 + $0x148] ss:$20 sps:$4 sm:$0xff]   ;;  %v6434_v61 = vld [vmem:[%s8953_s3 + $0x5ac] ss:$20 sps:$4 sm:$0xff]  }
 0x1fb   :  { %v2640_v3 = vpop.f32.mrf.mxu1 }
 0x1fc   :  { %v2641_v24 = vadd.f32 %v2640_v3, %v421_v10  ;;  %v6435_v3 = vld [vmem:[%s8953_s3 + $0x328] ss:$20 sps:$4 sm:$0xff]   ;;  %v6441_v10 = vld [vmem:[%s8953_s3 + $0x300] ss:$20 sps:$4 sm:$0xff]  }
 0x1fd   :  { %5007 = vmatpush1.bf16.msra.mxu0 %v6330_v40  ;;  %v2642_v25 = vpop.f32.mrf.mxu1 }
 0x1fe   :  { %5008 = vmatprep.subr.bf16.mxu0 %v6338_v41  ;;  %v2643_v30 = vadd.f32 %v2642_v25, %v425_v9  ;;  %v6416_v41 = vld [vmem:[%s8953_s3 + $0x624] ss:$20 sps:$4 sm:$0xff]   ;;  %v6446_v9 = vld [vmem:[%s8953_s3 + $0x55c] ss:$20 sps:$4 sm:$0xff]  }
 0x1ff   :  { %v6444_v25 = vld [vmem:[%s8953_s3 + $0x558] ss:$20 sps:$4 sm:$0xff]  }
 0x201   :  { %5009 = vmatpush1.bf16.msra.mxu0 %v6336_v43 }
 0x202   :  { %5010 = vmatprep.subr.bf16.mxu0 %v6344_v44 }
 0x205   :  { %5011 = vmatpush1.bf16.msra.mxu0 %v6342_v45 }
 0x206   :  { %5012 = vmatprep.subr.bf16.mxu0 %v6350_v36 }
 0x209   :  { %5013 = vmatpush1.bf16.msra.mxu0 %v6348_v46 }
 0x20a   :  { %5014 = vmatprep.subr.bf16.mxu0 %v6356_v47  ;;  %v6414_v47 = vld [vmem:[%s8953_s3 + $0x620] ss:$20 sps:$4 sm:$0xff]  }
 0x20d   :  { %5015 = vmatpush1.bf16.msra.mxu0 %v6354_v8  ;;  %v6422_v8 = vld [vmem:[%s8953_s3 + $0x5fc] ss:$20 sps:$4 sm:$0xff]  }
 0x20e   :  { %5016 = vmatprep.subr.bf16.mxu0 %v6362_v48 }
 0x211   :  { %5017 = vmatpush1.bf16.msra.mxu0 %v6360_v63 }
 0x212   :  { %5018 = vmatprep.subr.bf16.mxu0 %v6368_v50  ;;  %v6417_v50 = vld [vmem:[%s8953_s3 + $0x3a0] ss:$20 sps:$4 sm:$0xff]  }
 0x215   :  { %5019 = vmatpush2.bf16.msra.mxu0 %v6366_v52 }
 0x216   :  { %5020 = vmatprep.subr.bf16.mxu0 %v6374_v53  ;;  %v6420_v53 = vld [vmem:[%s8953_s3 + $0x5f8] ss:$20 sps:$4 sm:$0xff]  }
 0x219   :  { %5021 = vmatpush2.bf16.msra.mxu0 %v6372_v54  ;;  %v6425_v54 = vld [vmem:[%s8953_s3 + $0x37c] ss:$20 sps:$4 sm:$0xff]  }
 0x21a   :  { %5022 = vmatprep.subr.bf16.mxu0 %v6380_v22  ;;  %v6428_v22 = vld [vmem:[%s8953_s3 + $0x5d4] ss:$20 sps:$4 sm:$0xff]  }
 0x21d   :  { %5023 = vmatpush2.bf16.msra.mxu0 %v6378_v57  ;;  %v6426_v57 = vld [vmem:[%s8953_s3 + $0x5d0] ss:$20 sps:$4 sm:$0xff]  }
 0x21e   :  { %5024 = vmatprep.subr.bf16.mxu0 %v6386_v60  ;;  %v6431_v60 = vld [vmem:[%s8953_s3 + $0x354] ss:$20 sps:$4 sm:$0xff]  }
 0x221   :  { %5025 = vmatpush2.bf16.msra.mxu0 %v6384_v1  ;;  %v6429_v1 = vld [vmem:[%s8953_s3 + $0x350] ss:$20 sps:$4 sm:$0xff]  }
 0x222   :  { %5026 = vmatprep.subr.bf16.mxu0 %v6392_v28  ;;  %v6432_v28 = vld [vmem:[%s8953_s3 + $0x5a8] ss:$20 sps:$4 sm:$0xff]  }
 0x225   :  { %5027 = vmatpush2.bf16.msra.mxu0 %v6390_v4  ;;  %v6438_v4 = vld [vmem:[%s8953_s3 + $0x580] ss:$20 sps:$4 sm:$0xff]  }
 0x226   :  { %v2679_v13 = vpop.f32.mrf.mxu0  ;;  %5028 = vmatprep.subr.bf16.mxu0 %v6398_v7  ;;  %v6443_v7 = vld [vmem:[%s8953_s3 + $0x304] ss:$20 sps:$4 sm:$0xff]  }
 0x227   :  { %v2722_v17 = vpop.f32.mrf.mxu1  ;;  %v2680_v31 = vadd.f32 %v2679_v13, %v2637_v20  ;;  %v6452_v13 = vld [vmem:[%s8953_s3 + $0x534] ss:$20 sps:$4 sm:$0xff]   ;;  %v6453_v20 = vld [vmem:[%s8953_s3 + $0x2b0] ss:$20 sps:$4 sm:$0xff]  }
 0x228   :  { %v2681_v18 = vpop.f32.mrf.mxu0 }
 0x229   :  { %v2682_v26 = vadd.f32 %v2681_v18, %v2639_v15  ;;  %v2724_v58 = vpop.f32.mrf.mxu1  ;;  %5029 = vmatpush2.bf16.msra.mxu0 %v6396_v5  ;;  %v2723_v43 = vadd.f32 %v2722_v17, %v2680_v31  ;;  %v6449_v5 = vld [vmem:[%s8953_s3 + $0x2dc] ss:$20 sps:$4 sm:$0xff]   ;;  %v6455_v17 = vld [vmem:[%s8953_s3 + $0x2b4] ss:$20 sps:$4 sm:$0xff]   ;;  %v6458_v18 = vld [vmem:[%s8953_s3 + $0x50c] ss:$20 sps:$4 sm:$0xff]  }
 0x22a   :  { %v2683_v21 = vpop.f32.mrf.mxu0  ;;  %5030 = vmatprep.subr.bf16.mxu0 %v6404_v14  ;;  %v6447_v14 = vld [vmem:[%s8953_s3 + $0x2d8] ss:$20 sps:$4 sm:$0xff]   ;;  %v6450_v15 = vld [vmem:[%s8953_s3 + $0x530] ss:$20 sps:$4 sm:$0xff]   ;;  %v6465_v31 = vld [vmem:[%s8953_s3 + $0x4e0] ss:$20 sps:$4 sm:$0xff]  }
 0x22b   :  { %v2684_v33 = vadd.f32 %v2683_v21, %v2641_v24  ;;  %v2726_v35 = vpop.f32.mrf.mxu1  ;;  %v2725_v32 = vadd.f32 %v2724_v58, %v2682_v26  ;;  %v2737_v48 = vmax.f32 %v2723_v43, 0.0  ;;  %v6456_v24 = vld [vmem:[%s8953_s3 + $0x508] ss:$20 sps:$4 sm:$0xff]   ;;  %v6461_v26 = vld [vmem:[%s8953_s3 + $0x28c] ss:$20 sps:$4 sm:$0xff]  }
 0x22c   :  { %v2685_v23 = vpop.f32.mrf.mxu0  ;;  %v6464_v58 = vld [vmem:[%s8953_s3 + $0x764] ss:$20 sps:$4 sm:$0xff]   ;;  %v6462_v21 = vld [vmem:[%s8953_s3 + $0x760] ss:$20 sps:$4 sm:$0xff]  }
 0x22d   :  { %v2727_v38 = vadd.f32 %v2726_v35, %v2684_v33  ;;  %v2686_v39 = vadd.f32 %v2685_v23, %v2643_v30  ;;  %5031 = vmatpush2.bf16.msra.mxu0 %v6402_v0  ;;  %v2728_v40 = vpop.f32.mrf.mxu1  ;;  %v2738_v45 = vmax.f32 %v2725_v32, 0.0  ;;  %v6459_v0 = vld [vmem:[%s8953_s3 + $0x288] ss:$20 sps:$4 sm:$0xff]   ;;  %v6468_v33 = vld [vmem:[%s8953_s3 + $0x738] ss:$20 sps:$4 sm:$0xff]  }
 0x22e   :  { %5032 = vmatprep.subr.bf16.mxu0 %v6410_v29  ;;  %v6467_v29 = vld [vmem:[%s8953_s3 + $0x4e4] ss:$20 sps:$4 sm:$0xff]   ;;  %v6470_v30 = vld [vmem:[%s8953_s3 + $0x73c] ss:$20 sps:$4 sm:$0xff]   ;;  %v6476_v23 = vld [vmem:[%s8953_s3 + $0x714] ss:$20 sps:$4 sm:$0xff]  }
 0x22f   :  { %v2729_v44 = vadd.f32 %v2728_v40, %v2686_v39  ;;  %v2745_v36 = vmax.f32 %v2727_v38, 0.0  ;;  %v6473_v35 = vld [vmem:[%s8953_s3 + $0x4bc] ss:$20 sps:$4 sm:$0xff]   ;;  %v6471_v32 = vld [vmem:[%s8953_s3 + $0x4b8] ss:$20 sps:$4 sm:$0xff]  }
 0x230   :  { %v6474_v38 = vld [vmem:[%s8953_s3 + $0x710] ss:$20 sps:$4 sm:$0xff]   ;;  %v6479_v39 = vld [vmem:[%s8953_s3 + $0x494] ss:$20 sps:$4 sm:$0xff]   ;;  %v6485_v43 = vld [vmem:[%s8953_s3 + $0x46c] ss:$20 sps:$4 sm:$0xff]  }
 0x231   :  { %v2746_v46 = vmax.f32 %v2729_v44, 0.0  ;;  %5033 = vmatpush2.bf16.msra.mxu0 %v6408_v34  ;;  %v8413_v52 = vpack.c.bf16 %v2745_v36, %v2737_v48  ;;  %v6482_v34 = vld [vmem:[%s8953_s3 + $0x6ec] ss:$20 sps:$4 sm:$0xff]   ;;  %v6477_v40 = vld [vmem:[%s8953_s3 + $0x490] ss:$20 sps:$4 sm:$0xff]  }
 0x232   :  { %5088 = vmatprep.subr.bf16.mxu0 %v6416_v41  ;;  %v6480_v41 = vld [vmem:[%s8953_s3 + $0x6e8] ss:$20 sps:$4 sm:$0xff]   ;;  %v6488_v44 = vld [vmem:[%s8953_s3 + $0x6c4] ss:$20 sps:$4 sm:$0xff]   ;;  %v6486_v36 = vld [vmem:[%s8953_s3 + $0x6c0] ss:$20 sps:$4 sm:$0xff]  }
 0x233   :  { %v8407_v63 = vpack.c.bf16 %v2746_v46, %v2738_v45  ;;  %v6483_v45 = vld [vmem:[%s8953_s3 + $0x468] ss:$20 sps:$4 sm:$0xff]   ;;  %v6491_v46 = vld [vmem:[%s8953_s3 + $0x444] ss:$20 sps:$4 sm:$0xff]  }
 0x234   :  { %5035 = vmatmul.mubr.bf16.vlgmr.msra.gmra.mxu0 %v7759_v42  ;;  %v6492_v48 = vld [vmem:[%s8953_s3 + $0x698] ss:$20 sps:$4 sm:$0xff]  }
 0x235   :  { %5089 = vmatpush1.bf16.msra.mxu0 %v6414_v47  ;;  %5120 = vmatprep.mubr.bf16.mxu0 %v8294_v37  ;;  %v6494_v47 = vld [vmem:[%s8953_s3 + $0x69c] ss:$20 sps:$4 sm:$0xff]  }
 0x236   :  { %4991 = vmatprep.mubr.bf16.mxu1 %v8407_v63  ;;  %5090 = vmatprep.subr.bf16.mxu0 %v6422_v8  ;;  %v6489_v8 = vld [vmem:[%s8953_s3 + $0x440] ss:$20 sps:$4 sm:$0xff]  }
 0x237   :  { %4992 = vmatmul.mubr.bf16.vlgmr.msra.gmra.mxu1 %v8413_v52 }
 0x238   :  { %5046 = vmatpush1.bf16.msra.mxu1 %v6417_v50  ;;  %5077 = vmatprep.mubr.bf16.mxu1 %v7978_v62  ;;  %v6497_v50 = vld [vmem:[%s8953_s3 + $0x41c] ss:$20 sps:$4 sm:$0xff]  }
 0x239   :  { %5091 = vmatpush1.bf16.msra.mxu0 %v6420_v53  ;;  %5047 = vmatprep.subr.bf16.mxu1 %v6425_v54  ;;  %v6500_v53 = vld [vmem:[%s8953_s3 + $0x674] ss:$20 sps:$4 sm:$0xff]   ;;  %v6495_v54 = vld [vmem:[%s8953_s3 + $0x418] ss:$20 sps:$4 sm:$0xff]  }
 0x23a   :  { %5092 = vmatprep.subr.bf16.mxu0 %v6428_v22  ;;  %v6498_v22 = vld [vmem:[%s8953_s3 + $0x670] ss:$20 sps:$4 sm:$0xff]  }
 0x23c   :  { %5048 = vmatpush1.bf16.msra.mxu1 %v6423_v56  ;;  %v6503_v56 = vld [vmem:[%s8953_s3 + $0x3f4] ss:$20 sps:$4 sm:$0xff]  }
 0x23d   :  { %5093 = vmatpush1.bf16.msra.mxu0 %v6426_v57  ;;  %5049 = vmatprep.subr.bf16.mxu1 %v6431_v60  ;;  %v6506_v57 = vld [vmem:[%s8953_s3 + $0x64c] ss:$20 sps:$4 sm:$0xff]   ;;  %v6501_v60 = vld [vmem:[%s8953_s3 + $0x3f0] ss:$20 sps:$4 sm:$0xff]  }
 0x23e   :  { %5094 = vmatprep.subr.bf16.mxu0 %v6434_v61  ;;  %v6504_v61 = vld [vmem:[%s8953_s3 + $0x648] ss:$20 sps:$4 sm:$0xff]  }
 0x240   :  { %5050 = vmatpush1.bf16.msra.mxu1 %v6429_v1  ;;  %v6509_v1 = vld [vmem:[%s8953_s3 + $0x3cc] ss:$20 sps:$4 sm:$0xff]  }
 0x241   :  { %5095 = vmatpush1.bf16.msra.mxu0 %v6432_v28  ;;  %5051 = vmatprep.subr.bf16.mxu1 %v6437_v2  ;;  %v6510_v28 = vld [vmem:[%s8953_s3 + $0x268] ss:$20 sps:$4 sm:$0xff]  }
 0x242   :  { %5096 = vmatprep.subr.bf16.mxu0 %v6440_v19  ;;  %v6507_v2 = vld [vmem:[%s8953_s3 + $0x3c8] ss:$20 sps:$4 sm:$0xff]  }
 0x243   :  { %v6511_v19 = vld [vmem:[%s8953_s3 + $0x128] ss:$20 sps:$4 sm:$0xff]  }
 0x244   :  { %5052 = vmatpush1.bf16.msra.mxu1 %v6435_v3  ;;  %v6514_v3 = vld [vmem:[%s8953_s3 + $0x8a4] ss:$20 sps:$4 sm:$0xff]  }
 0x245   :  { %5097 = vmatpush1.bf16.msra.mxu0 %v6438_v4  ;;  %5053 = vmatprep.subr.bf16.mxu1 %v6443_v7  ;;  %v6515_v4 = vld [vmem:[%s8953_s3 + $0x240] ss:$20 sps:$4 sm:$0xff]  }
 0x246   :  { %5098 = vmatprep.subr.bf16.mxu0 %v6446_v9  ;;  %v6512_v7 = vld [vmem:[%s8953_s3 + $0x8a0] ss:$20 sps:$4 sm:$0xff]  }
 0x247   :  { %v6516_v9 = vld [vmem:[%s8953_s3 + $0x100] ss:$20 sps:$4 sm:$0xff]  }
 0x248   :  { %5054 = vmatpush1.bf16.msra.mxu1 %v6441_v10  ;;  %v6519_v10 = vld [vmem:[%s8953_s3 + $0x87c] ss:$20 sps:$4 sm:$0xff]  }
 0x249   :  { %5099 = vmatpush1.bf16.msra.mxu0 %v6444_v25  ;;  %5055 = vmatprep.subr.bf16.mxu1 %v6449_v5  ;;  %v6520_v25 = vld [vmem:[%s8953_s3 + $0x218] ss:$20 sps:$4 sm:$0xff]  }
 0x24a   :  { %5100 = vmatprep.subr.bf16.mxu0 %v6452_v13  ;;  %v6521_v5 = vld [vmem:[%s8953_s3 + $0xd8] ss:$20 sps:$4 sm:$0xff]   ;;  %v6524_v13 = vld [vmem:[%s8953_s3 + $0x854] ss:$20 sps:$4 sm:$0xff]  }
 0x24c   :  { %5056 = vmatpush1.bf16.msra.mxu1 %v6447_v14  ;;  %v6525_v14 = vld [vmem:[%s8953_s3 + $0x1f0] ss:$20 sps:$4 sm:$0xff]  }
 0x24d   :  { %5101 = vmatpush1.bf16.msra.mxu0 %v6450_v15  ;;  %5057 = vmatprep.subr.bf16.mxu1 %v6455_v17  ;;  %v6522_v15 = vld [vmem:[%s8953_s3 + $0x850] ss:$20 sps:$4 sm:$0xff]  }
 0x24e   :  { %5102 = vmatprep.subr.bf16.mxu0 %v6458_v18  ;;  %v6526_v17 = vld [vmem:[%s8953_s3 + $0xb0] ss:$20 sps:$4 sm:$0xff]   ;;  %v6529_v18 = vld [vmem:[%s8953_s3 + $0x82c] ss:$20 sps:$4 sm:$0xff]  }
 0x250   :  { %5058 = vmatpush1.bf16.msra.mxu1 %v6453_v20  ;;  %v6530_v20 = vld [vmem:[%s8953_s3 + $0x1c8] ss:$20 sps:$4 sm:$0xff]  }
 0x251   :  { %5103 = vmatpush1.bf16.msra.mxu0 %v6456_v24  ;;  %5059 = vmatprep.subr.bf16.mxu1 %v6461_v26  ;;  %v6527_v24 = vld [vmem:[%s8953_s3 + $0x828] ss:$20 sps:$4 sm:$0xff]  }
 0x252   :  { %5104 = vmatprep.subr.bf16.mxu0 %v6464_v58  ;;  %v6531_v26 = vld [vmem:[%s8953_s3 + $0x88] ss:$20 sps:$4 sm:$0xff]   ;;  %v6534_v58 = vld [vmem:[%s8953_s3 + $0x804] ss:$20 sps:$4 sm:$0xff]  }
 0x254   :  { %5060 = vmatpush1.bf16.msra.mxu1 %v6459_v0  ;;  %v6535_v0 = vld [vmem:[%s8953_s3 + $0x1a0] ss:$20 sps:$4 sm:$0xff]  }
 0x255   :  { %5105 = vmatpush2.bf16.msra.mxu0 %v6462_v21  ;;  %5061 = vmatprep.subr.bf16.mxu1 %v6467_v29  ;;  %v6532_v21 = vld [vmem:[%s8953_s3 + $0x800] ss:$20 sps:$4 sm:$0xff]  }
 0x256   :  { %5106 = vmatprep.subr.bf16.mxu0 %v6470_v30  ;;  %v6536_v29 = vld [vmem:[%s8953_s3 + $0x60] ss:$20 sps:$4 sm:$0xff]   ;;  %v6539_v30 = vld [vmem:[%s8953_s3 + $0x7dc] ss:$20 sps:$4 sm:$0xff]  }
 0x258   :  { %5062 = vmatpush2.bf16.msra.mxu1 %v6465_v31  ;;  %v6540_v31 = vld [vmem:[%s8953_s3 + $0x178] ss:$20 sps:$4 sm:$0xff]  }
 0x259   :  { %5107 = vmatpush2.bf16.msra.mxu0 %v6468_v33  ;;  %5063 = vmatprep.subr.bf16.mxu1 %v6473_v35  ;;  %v6537_v33 = vld [vmem:[%s8953_s3 + $0x7d8] ss:$20 sps:$4 sm:$0xff]  }
 0x25a   :  { %5108 = vmatprep.subr.bf16.mxu0 %v6476_v23  ;;  %v6541_v35 = vld [vmem:[%s8953_s3 + $0x38] ss:$20 sps:$4 sm:$0xff]   ;;  %v6544_v23 = vld [vmem:[%s8953_s3 + $0x7b4] ss:$20 sps:$4 sm:$0xff]  }
 0x25c   :  { %5064 = vmatpush2.bf16.msra.mxu1 %v6471_v32  ;;  %v6545_v32 = vld [vmem:[%s8953_s3 + $0x150] ss:$20 sps:$4 sm:$0xff]  }
 0x25d   :  { %5109 = vmatpush2.bf16.msra.mxu0 %v6474_v38  ;;  %5065 = vmatprep.subr.bf16.mxu1 %v6479_v39  ;;  %v6542_v38 = vld [vmem:[%s8953_s3 + $0x7b0] ss:$20 sps:$4 sm:$0xff]  }
 0x25e   :  { %5110 = vmatprep.subr.bf16.mxu0 %v6482_v34  ;;  %v6546_v39 = vld [vmem:[%s8953_s3 + $0x10] ss:$20 sps:$4 sm:$0xff]   ;;  %v6549_v34 = vld [vmem:[%s8953_s3 + $0x78c] ss:$20 sps:$4 sm:$0xff]  }
 0x260   :  { %5066 = vmatpush2.bf16.msra.mxu1 %v6477_v40  ;;  %v6550_v40 = vld [vmem:[%s8953_s3 + $0x768] ss:$20 sps:$4 sm:$0xff]  }
 0x261   :  { %5111 = vmatpush2.bf16.msra.mxu0 %v6480_v41  ;;  %5067 = vmatprep.subr.bf16.mxu1 %v6485_v43  ;;  %v6547_v41 = vld [vmem:[%s8953_s3 + $0x788] ss:$20 sps:$4 sm:$0xff]  }
 0x262   :  { %5112 = vmatprep.subr.bf16.mxu0 %v6488_v44  ;;  %v6551_v43 = vld [vmem:[%s8953_s3 + $0x628] ss:$20 sps:$4 sm:$0xff]   ;;  %v6554_v44 = vld [vmem:[%s8953_s3 + $0x9e4] ss:$20 sps:$4 sm:$0xff]  }
 0x264   :  { %5068 = vmatpush2.bf16.msra.mxu1 %v6483_v45  ;;  %v6555_v45 = vld [vmem:[%s8953_s3 + $0x740] ss:$20 sps:$4 sm:$0xff]  }
 0x265   :  { %5113 = vmatpush2.bf16.msra.mxu0 %v6486_v36  ;;  %5069 = vmatprep.subr.bf16.mxu1 %v6491_v46  ;;  %v6552_v36 = vld [vmem:[%s8953_s3 + $0x9e0] ss:$20 sps:$4 sm:$0xff]  }
 0x266   :  { %5114 = vmatprep.subr.bf16.mxu0 %v6494_v47  ;;  %v6556_v46 = vld [vmem:[%s8953_s3 + $0x600] ss:$20 sps:$4 sm:$0xff]   ;;  %v6559_v47 = vld [vmem:[%s8953_s3 + $0x9bc] ss:$20 sps:$4 sm:$0xff]  }
 0x268   :  { %5070 = vmatpush2.bf16.msra.mxu1 %v6489_v8  ;;  %v6557_v8 = vld [vmem:[%s8953_s3 + $0x9b8] ss:$20 sps:$4 sm:$0xff]  }
 0x269   :  { %5115 = vmatpush2.bf16.msra.mxu0 %v6492_v48  ;;  %5071 = vmatprep.subr.bf16.mxu1 %v6497_v50  ;;  %v6564_v48 = vld [vmem:[%s8953_s3 + $0x994] ss:$20 sps:$4 sm:$0xff]   ;;  %v6565_v50 = vld [vmem:[%s8953_s3 + $0x6f0] ss:$20 sps:$4 sm:$0xff]  }
 0x26a   :  { %5116 = vmatprep.subr.bf16.mxu0 %v6500_v53  ;;  %v6562_v53 = vld [vmem:[%s8953_s3 + $0x990] ss:$20 sps:$4 sm:$0xff]  }
 0x26c   :  { %5072 = vmatpush2.bf16.msra.mxu1 %v6495_v54  ;;  %v6566_v54 = vld [vmem:[%s8953_s3 + $0x5b0] ss:$20 sps:$4 sm:$0xff]  }
 0x26d   :  { %5117 = vmatpush2.bf16.msra.mxu0 %v6498_v22  ;;  %5073 = vmatprep.subr.bf16.mxu1 %v6503_v56  ;;  %v6569_v22 = vld [vmem:[%s8953_s3 + $0x96c] ss:$20 sps:$4 sm:$0xff]   ;;  %v6570_v56 = vld [vmem:[%s8953_s3 + $0x6c8] ss:$20 sps:$4 sm:$0xff]  }
 0x26e   :  { %5118 = vmatprep.subr.bf16.mxu0 %v6506_v57  ;;  %v6567_v57 = vld [vmem:[%s8953_s3 + $0x968] ss:$20 sps:$4 sm:$0xff]  }
 0x270   :  { %5074 = vmatpush2.bf16.msra.mxu1 %v6501_v60  ;;  %v6571_v60 = vld [vmem:[%s8953_s3 + $0x588] ss:$20 sps:$4 sm:$0xff]  }
 0x271   :  { %5119 = vmatpush2.bf16.msra.mxu0 %v6504_v61  ;;  %5075 = vmatprep.subr.bf16.mxu1 %v6509_v1  ;;  %v6574_v61 = vld [vmem:[%s8953_s3 + $0x944] ss:$20 sps:$4 sm:$0xff]   ;;  %v6575_v1 = vld [vmem:[%s8953_s3 + $0x6a0] ss:$20 sps:$4 sm:$0xff]  }
 0x272   :  { %6083 = vmatprep.subr.bf16.mxu0 %v6510_v28  ;;  %v6572_v28 = vld [vmem:[%s8953_s3 + $0x940] ss:$20 sps:$4 sm:$0xff]  }
 0x274   :  { %5076 = vmatpush2.bf16.msra.mxu1 %v6507_v2  ;;  %5121 = vmatmul.mubr.bf16.vlgmr.msra.gmra.mxu0 %v8299_v11  ;;  %v6576_v2 = vld [vmem:[%s8953_s3 + $0x560] ss:$20 sps:$4 sm:$0xff]  }
 0x275   :  { %6084 = vmatpush3.bf16.msra.mxu0 %v6511_v19  ;;  %5206 = vmatprep.mubr.bf16.mxu0 %v7873_v6  ;;  %v6517_v6 = vld [vmem:[%s8953_s3 + $0x878] ss:$20 sps:$4 sm:$0xff]   ;;  %v6579_v19 = vld [vmem:[%s8953_s3 + $0x91c] ss:$20 sps:$4 sm:$0xff]  }
 0x276   :  { %5131 = vmatprep.subr.bf16.mxu1 %v6514_v3  ;;  %6085 = vmatprep.subr.bf16.mxu0 %v6515_v4  ;;  %v6580_v3 = vld [vmem:[%s8953_s3 + $0x678] ss:$20 sps:$4 sm:$0xff]  }
 0x277   :  { %5078 = vmatmul.mubr.bf16.vlgmr.msra.gmra.mxu1 %v8096_v49  ;;  %v6577_v4 = vld [vmem:[%s8953_s3 + $0x918] ss:$20 sps:$4 sm:$0xff]  }
 0x278   :  { %5132 = vmatpush1.bf16.msra.mxu1 %v6512_v7  ;;  %5163 = vmatprep.mubr.bf16.mxu1 %v8407_v63  ;;  %v6581_v7 = vld [vmem:[%s8953_s3 + $0x538] ss:$20 sps:$4 sm:$0xff]  }
 0x279   :  { %6086 = vmatpush3.bf16.msra.mxu0 %v6516_v9  ;;  %5133 = vmatprep.subr.bf16.mxu1 %v6519_v10  ;;  %v6584_v9 = vld [vmem:[%s8953_s3 + $0x8f4] ss:$20 sps:$4 sm:$0xff]   ;;  %v6585_v10 = vld [vmem:[%s8953_s3 + $0x650] ss:$20 sps:$4 sm:$0xff]  }
 0x27a   :  { %6087 = vmatprep.subr.bf16.mxu0 %v6520_v25  ;;  %v6582_v25 = vld [vmem:[%s8953_s3 + $0x8f0] ss:$20 sps:$4 sm:$0xff]  }
 0x27c   :  { %5134 = vmatpush1.bf16.msra.mxu1 %v6517_v6  ;;  %v6586_v6 = vld [vmem:[%s8953_s3 + $0x510] ss:$20 sps:$4 sm:$0xff]  }
 0x27d   :  { %6088 = vmatpush3.bf16.msra.mxu0 %v6521_v5  ;;  %5135 = vmatprep.subr.bf16.mxu1 %v6524_v13  ;;  %v6589_v5 = vld [vmem:[%s8953_s3 + $0x8cc] ss:$20 sps:$4 sm:$0xff]   ;;  %v6587_v13 = vld [vmem:[%s8953_s3 + $0x8c8] ss:$20 sps:$4 sm:$0xff]  }
 0x27e   :  { %6089 = vmatprep.subr.bf16.mxu0 %v6525_v14  ;;  %v6590_v14 = vld [vmem:[%s8953_s3 + $0x4e8] ss:$20 sps:$4 sm:$0xff]  }
 0x280   :  { %5136 = vmatpush1.bf16.msra.mxu1 %v6522_v15  ;;  %v6591_v15 = vld [vmem:[%s8953_s3 + $0x3a8] ss:$20 sps:$4 sm:$0xff]  }
 0x281   :  { %6090 = vmatpush3.bf16.msra.mxu0 %v6526_v17  ;;  %5137 = vmatprep.subr.bf16.mxu1 %v6529_v18  ;;  %v6592_v17 = vld [vmem:[%s8953_s3 + $0x4c0] ss:$20 sps:$4 sm:$0xff]  }
 0x282   :  { %6091 = vmatprep.subr.bf16.mxu0 %v6530_v20  ;;  %v6593_v18 = vld [vmem:[%s8953_s3 + $0x380] ss:$20 sps:$4 sm:$0xff]   ;;  %v6595_v20 = vld [vmem:[%s8953_s3 + $0x358] ss:$20 sps:$4 sm:$0xff]  }
 0x284   :  { %5138 = vmatpush1.bf16.msra.mxu1 %v6527_v24  ;;  %v6596_v24 = vld [vmem:[%s8953_s3 + $0x470] ss:$20 sps:$4 sm:$0xff]  }
 0x285   :  { %6092 = vmatpush3.bf16.msra.mxu0 %v6531_v26  ;;  %5139 = vmatprep.subr.bf16.mxu1 %v6534_v58  ;;  %v6598_v26 = vld [vmem:[%s8953_s3 + $0x448] ss:$20 sps:$4 sm:$0xff]  }
 0x286   :  { %6093 = vmatprep.subr.bf16.mxu0 %v6535_v0  ;;  %v6599_v58 = vld [vmem:[%s8953_s3 + $0x308] ss:$20 sps:$4 sm:$0xff]   ;;  %v6600_v0 = vld [vmem:[%s8953_s3 + $0x420] ss:$20 sps:$4 sm:$0xff]  }
 0x288   :  { %5140 = vmatpush1.bf16.msra.mxu1 %v6532_v21  ;;  %v6601_v21 = vld [vmem:[%s8953_s3 + $0x2e0] ss:$20 sps:$4 sm:$0xff]  }
 0x289   :  { %6094 = vmatpush3.bf16.msra.mxu0 %v6536_v29  ;;  %5141 = vmatprep.subr.bf16.mxu1 %v6539_v30  ;;  %v6602_v29 = vld [vmem:[%s8953_s3 + $0x3f8] ss:$20 sps:$4 sm:$0xff]  }
 0x28a   :  { %6095 = vmatprep.subr.bf16.mxu0 %v6540_v31  ;;  %v6603_v30 = vld [vmem:[%s8953_s3 + $0x2b8] ss:$20 sps:$4 sm:$0xff]   ;;  %v6604_v31 = vld [vmem:[%s8953_s3 + $0x3d0] ss:$20 sps:$4 sm:$0xff]  }
 0x28c   :  { %5142 = vmatpush1.bf16.msra.mxu1 %v6537_v33  ;;  %v6605_v33 = vld [vmem:[%s8953_s3 + $0x290] ss:$20 sps:$4 sm:$0xff]  }
 0x28d   :  { %6096 = vmatpush3.bf16.msra.mxu0 %v6541_v35  ;;  %5143 = vmatprep.subr.bf16.mxu1 %v6544_v23  ;;  %v6606_v35 = vld [vmem:[%s8953_s3 + $0x9e8] ss:$20 sps:$4 sm:$0xff]  }
 0x28e   :  { %6097 = vmatprep.subr.bf16.mxu0 %v6545_v32  ;;  %v6607_v23 = vld [vmem:[%s8953_s3 + $0x8a8] ss:$20 sps:$4 sm:$0xff]   ;;  %v6608_v32 = vld [vmem:[%s8953_s3 + $0x9c0] ss:$20 sps:$4 sm:$0xff]  }
 0x290   :  { %5144 = vmatpush1.bf16.msra.mxu1 %v6542_v38  ;;  %v6609_v38 = vld [vmem:[%s8953_s3 + $0x880] ss:$20 sps:$4 sm:$0xff]  }
 0x291   :  { %6098 = vmatpush3.bf16.msra.mxu0 %v6546_v39  ;;  %5145 = vmatprep.subr.bf16.mxu1 %v6549_v34  ;;  %v6610_v39 = vld [vmem:[%s8953_s3 + $0x998] ss:$20 sps:$4 sm:$0xff]  }
 0x292   :  { %6127 = vmatprep.subr.bf16.mxu0 %v6550_v40  ;;  %v6611_v34 = vld [vmem:[%s8953_s3 + $0x858] ss:$20 sps:$4 sm:$0xff]   ;;  %v6614_v40 = vld [vmem:[%s8953_s3 + $0x948] ss:$20 sps:$4 sm:$0xff]  }
 0x294   :  { %5146 = vmatpush1.bf16.msra.mxu1 %v6547_v41  ;;  %5207 = vmatmul.mubr.bf16.vlgmr.msra.gmra.mxu0 %v7759_v42  ;;  %v6560_v42 = vld [vmem:[%s8953_s3 + $0x718] ss:$20 sps:$4 sm:$0xff]   ;;  %v6615_v41 = vld [vmem:[%s8953_s3 + $0x808] ss:$20 sps:$4 sm:$0xff]  }
 0x295   :  { %6128 = vmatpush3.bf16.msra.mxu0 %v6551_v43  ;;  %5288 = vmatprep.mubr.bf16.mxu0 %v8294_v37  ;;  %v6561_v37 = vld [vmem:[%s8953_s3 + $0x5d8] ss:$20 sps:$4 sm:$0xff]   ;;  %v6616_v43 = vld [vmem:[%s8953_s3 + $0x920] ss:$20 sps:$4 sm:$0xff]  }
 0x296   :  { %5147 = vmatprep.subr.bf16.mxu1 %v6554_v44  ;;  %6129 = vmatprep.subr.bf16.mxu0 %v6555_v45  ;;  %v6617_v44 = vld [vmem:[%s8953_s3 + $0x7e0] ss:$20 sps:$4 sm:$0xff]   ;;  %v6618_v45 = vld [vmem:[%s8953_s3 + $0x8f8] ss:$20 sps:$4 sm:$0xff]  }
 0x298   :  { %5148 = vmatpush2.bf16.msra.mxu1 %v6552_v36  ;;  %v6619_v36 = vld [vmem:[%s8953_s3 + $0x7b8] ss:$20 sps:$4 sm:$0xff]  }
 0x299   :  { %6130 = vmatpush3.bf16.msra.mxu0 %v6556_v46  ;;  %5149 = vmatprep.subr.bf16.mxu1 %v6559_v47  ;;  %v6620_v46 = vld [vmem:[%s8953_s3 + $0x8d0] ss:$20 sps:$4 sm:$0xff]  }
 0x29a   :  { %6131 = vmatprep.subr.bf16.mxu0 %v6560_v42  ;;  %v6621_v47 = vld [vmem:[%s8953_s3 + $0x790] ss:$20 sps:$4 sm:$0xff]   ;;  %v4864_v42 = vpop.f32.mrf.mxu0 }
 0x29c   :  { %5150 = vmatpush2.bf16.msra.mxu1 %v6557_v8  ;;  %v4866_v8 = vpop.f32.mrf.mxu0 }
 0x29d   :  { %6132 = vmatpush3.bf16.msra.mxu0 %v6561_v37  ;;  %5151 = vmatprep.subr.bf16.mxu1 %v6564_v48  ;;  %v4907_v37 = vpop.f32.mrf.mxu1 }
 0x29e   :  { %6133 = vmatprep.subr.bf16.mxu0 %v6565_v50  ;;  %v4868_v48 = vpop.f32.mrf.mxu0 }
 0x29f   :  { %v4909_v50 = vpop.f32.mrf.mxu1 }
 0x2a0   :  { %5152 = vmatpush2.bf16.msra.mxu1 %v6562_v53  ;;  %v4870_v53 = vpop.f32.mrf.mxu0 }
 0x2a1   :  { %6134 = vmatpush3.bf16.msra.mxu0 %v6566_v54  ;;  %5153 = vmatprep.subr.bf16.mxu1 %v6569_v22  ;;  %v4911_v22 = vpop.f32.mrf.mxu1 }
 0x2a2   :  { %6135 = vmatprep.subr.bf16.mxu0 %v6570_v56 }
 0x2a4   :  { %5154 = vmatpush2.bf16.msra.mxu1 %v6567_v57  ;;  %v4913_v57 = vpop.f32.mrf.mxu1 }
 0x2a5   :  { %6136 = vmatpush3.bf16.msra.mxu0 %v6571_v60  ;;  %5155 = vmatprep.subr.bf16.mxu1 %v6574_v61 }
 0x2a6   :  { %6137 = vmatprep.subr.bf16.mxu0 %v6575_v1 }
 0x2a8   :  { %5156 = vmatpush2.bf16.msra.mxu1 %v6572_v28 }
 0x2a9   :  { %6138 = vmatpush3.bf16.msra.mxu0 %v6576_v2  ;;  %5157 = vmatprep.subr.bf16.mxu1 %v6579_v19 }
 0x2aa   :  { %6139 = vmatprep.subr.bf16.mxu0 %v6580_v3 }
 0x2ac   :  { %5158 = vmatpush2.bf16.msra.mxu1 %v6577_v4 }
 0x2ad   :  { %6140 = vmatpush3.bf16.msra.mxu0 %v6581_v7  ;;  %5159 = vmatprep.subr.bf16.mxu1 %v6584_v9 }
 0x2ae   :  { %6141 = vmatprep.subr.bf16.mxu0 %v6585_v10 }
 0x2b0   :  { %5160 = vmatpush2.bf16.msra.mxu1 %v6582_v25 }
 0x2b1   :  { %6142 = vmatpush3.bf16.msra.mxu0 %v6586_v6  ;;  %5161 = vmatprep.subr.bf16.mxu1 %v6589_v5 }
 0x2b4   :  { %5162 = vmatpush2.bf16.msra.mxu1 %v6587_v13  ;;  %5289 = vmatmul.mubr.bf16.vlgmr.msra.gmra.mxu0 %v8299_v11  ;;  %v6594_v11 = vld [vmem:[%s8953_s3 + $0x498] ss:$20 sps:$4 sm:$0xff]   ;;  %v4950_v54 = vpop.f32.mrf.mxu0 }
 0x2b5   :  { %6105 = vmatprep.subr.bf16.mxu1 %v6590_v14 }
 0x2b6   :  { %v4952_v56 = vpop.f32.mrf.mxu0 }
 0x2b7   :  { %5164 = vmatmul.mubr.bf16.vlgmr.msra.gmra.mxu1 %v8413_v52 }
 0x2b8   :  { %6106 = vmatpush3.bf16.msra.mxu1 %v6591_v15  ;;  %5247 = vmatprep.mubr.bf16.mxu1 %v7978_v62  ;;  %v6597_v62 = vld [vmem:[%s8953_s3 + $0x330] ss:$20 sps:$4 sm:$0xff]   ;;  %v4954_v60 = vpop.f32.mrf.mxu0 }
 0x2b9   :  { %6107 = vmatprep.subr.bf16.mxu1 %v6592_v17 }
 0x2ba   :  { %v4956_v1 = vpop.f32.mrf.mxu0 }
 0x2bc   :  { %6108 = vmatpush3.bf16.msra.mxu1 %v6593_v18 }
 0x2bd   :  { %6109 = vmatprep.subr.bf16.mxu1 %v6594_v11 }
 0x2c0   :  { %6110 = vmatpush3.bf16.msra.mxu1 %v6595_v20 }
 0x2c1   :  { %6111 = vmatprep.subr.bf16.mxu1 %v6596_v24  ;;  %v3139_v24 = vld [vmem:[%s8954_s4] sm:$0x1f]  ;;  %s6649_s4 = smov [#allocation2]  }
 0x2c2   :  { %s5392_s11 = sshll.u32 %s6649_s4, 4  ;;  %s5393_s11 = int_to_ptr.vmem [resolvable:$true] %s5392_s11 }
 0x2c3   :  { %s6627_s12 = scalar_lea.vmem %s5393_s11, 1280  ;;  %p6632_p1 = scmp.lt.s32.totalorder %s5393_s11, %s5393_s11 }
 0x2c4   :  { %6112 = vmatpush3.bf16.msra.mxu1 %v6597_v62  ;;  %p6628_p0 = scmp.ne.s32.totalorder %s5393_s11, %s6627_s12  ;;  %p6633_p2 = scmp.lt.s32.totalorder %s6627_s12, %s6627_s12 }
 0x2c5   :  { %6113 = vmatprep.subr.bf16.mxu1 %v6598_v26  ;;  %v3148_v26 = vrot.slane %v3139_v24, %v400_v27 }
 0x2c6   :  { %p6634_p3 = por %p6633_p2, %p6632_p1 }
 0x2c7   :  { %v4871_v27 = vadd.f32 %v4870_v53, %v3148_v26 }
 0x2c8   :  { %6114 = vmatpush3.bf16.msra.mxu1 %v6599_v58  ;;  %p6635_p4 = pnand %p6634_p3, %p6628_p0 }
 0x2c9   :  { %6115 = vmatprep.subr.bf16.mxu1 %v6600_v0  ;;  %v3144_v0 = vrot.slane %v3139_v24, %v396_v59 }
 0x2cc   :  { %6116 = vmatpush3.bf16.msra.mxu1 %v6601_v21  ;;  %v3152_v21 = vrot.slane %v3139_v24, %v404_v12 }
 0x2cd   :  { %6117 = vmatprep.subr.bf16.mxu1 %v6602_v29 }
 0x2d0   :  { %6118 = vmatpush3.bf16.msra.mxu1 %v6603_v30 }
 0x2d1   :  { %6119 = vmatprep.subr.bf16.mxu1 %v6604_v31  ;;  %v4867_v31 = vadd.f32 %v4866_v8, %v3148_v26 }
 0x2d4   :  { %6120 = vmatpush3.bf16.msra.mxu1 %v6605_v33  ;;  %v4865_v33 = vadd.f32 %v4864_v42, %v3144_v0 }
 0x2d5   :  { %6149 = vmatprep.subr.bf16.mxu1 %v6606_v35 }
 0x2d6   :  { %v4908_v59 = vadd.f32 %v4907_v37, %v4865_v33 }
 0x2d7   :  { %5248 = vmatmul.mubr.bf16.vlgmr.msra.gmra.mxu1 %v8096_v49  ;;  %v6612_v49 = vld [vmem:[%s8953_s3 + $0x970] ss:$20 sps:$4 sm:$0xff]  }
 0x2d8   :  { %6150 = vmatpush3.bf16.msra.mxu1 %v6607_v23  ;;  %5329 = vmatprep.mubr.bf16.mxu1 %v8407_v63  ;;  %v6613_v63 = vld [vmem:[%s8953_s3 + $0x830] ss:$20 sps:$4 sm:$0xff]   ;;  %v3156_v23 = vrot.slane %v3139_v24, %v408_v16  ;;  %v4951_v16 = vadd.f32 %v4950_v54, %v4908_v59 }
 0x2d9   :  { %6151 = vmatprep.subr.bf16.mxu1 %v6608_v32 }
 0x2dc   :  { %6152 = vmatpush3.bf16.msra.mxu1 %v6609_v38 }
 0x2dd   :  { %6153 = vmatprep.subr.bf16.mxu1 %v6610_v39  ;;  %v4910_v39 = vadd.f32 %v4909_v50, %v4867_v31 }
 0x2e0   :  { %6154 = vmatpush3.bf16.msra.mxu1 %v6611_v34 }
 0x2e1   :  { %6155 = vmatprep.subr.bf16.mxu1 %v6612_v49 }
 0x2e4   :  { %6156 = vmatpush3.bf16.msra.mxu1 %v6613_v63  ;;  %v4869_v63 = vadd.f32 %v4868_v48, %v3144_v0 }
 0x2e5   :  { %6157 = vmatprep.subr.bf16.mxu1 %v6614_v40  ;;  %v4953_v40 = vadd.f32 %v4952_v56, %v4910_v39 }
 0x2e6   :  { %v4912_v53 = vadd.f32 %v4911_v22, %v4869_v63 }
 0x2e8   :  { %6158 = vmatpush3.bf16.msra.mxu1 %v6615_v41 }
 0x2e9   :  { %6159 = vmatprep.subr.bf16.mxu1 %v6616_v43 }
 0x2ec   :  { %6160 = vmatpush3.bf16.msra.mxu1 %v6617_v44  ;;  %v4914_v44 = vadd.f32 %v4913_v57, %v4871_v27 }
 0x2ed   :  { %6161 = vmatprep.subr.bf16.mxu1 %v6618_v45 }
 0x2ee   :  { %v4957_v48 = vadd.f32 %v4956_v1, %v4914_v44 }
 0x2f0   :  { %6162 = vmatpush3.bf16.msra.mxu1 %v6619_v36  ;;  %v3160_v36 = vrot.slane %v3139_v24, %v412_v55 }
 0x2f1   :  { %6163 = vmatprep.subr.bf16.mxu1 %v6620_v46 }
 0x2f4   :  { %6164 = vmatpush3.bf16.msra.mxu1 %v6621_v47  ;;  %v5036_v2 = vpop.f32.mrf.mxu0 }
 0x2f5   :  { %v5037_v35 = vadd.f32 %v5036_v2, %v3152_v21 }
 0x2f6   :  { %v5038_v3 = vpop.f32.mrf.mxu0 }
 0x2f7   :  { %5330 = vmatmul.mubr.bf16.vlgmr.msra.gmra.mxu1 %v8413_v52  ;;  %v4993_v61 = vpop.f32.mrf.mxu1  ;;  %v5039_v41 = vadd.f32 %v5038_v3, %v3156_v23 }
 0x2f8   :  { %v5040_v52 = vpop.f32.mrf.mxu0  ;;  %v8917_v56 = vadd.f32 %v4993_v61, %v4951_v16 }
 0x2f9   :  { %v4995_v28 = vpop.f32.mrf.mxu1  ;;  %v5041_v43 = vadd.f32 %v5040_v52, %v3152_v21 }
 0x2fa   :  { %v5042_v9 = vpop.f32.mrf.mxu0  ;;  %v8913_v45 = vadd.f32 %v4995_v28, %v4953_v40  ;;  %v4955_v28 = vadd.f32 %v4954_v60, %v4912_v53 }
 0x2fb   :  { %v8896_v19 = vpop.f32.mrf.mxu1  ;;  %v5043_v37 = vadd.f32 %v5042_v9, %v3156_v23 }
 0x2fc   :  { %v5339_v51 = vmul.f32 %v8913_v45, %v8913_v45  ;;  %v8926_v1 = vadd.f32 %v8896_v19, %v4955_v28 }
 0x2fd   :  { %v4999_v4 = vpop.f32.mrf.mxu1 }
 0x2fe   :  { %v8923_v54 = vadd.f32 %v4999_v4, %v4957_v48  ;;  %v5343_v0 = vmul.f32 %v8926_v1, %v8926_v1 }
 0x334   :  { %v5122_v25 = vpop.f32.mrf.mxu0 }
 0x336   :  { %v5124_v5 = vpop.f32.mrf.mxu0 }
 0x337   :  { %v5079_v7 = vpop.f32.mrf.mxu1 }
 0x338   :  { %v5126_v14 = vpop.f32.mrf.mxu0  ;;  %v5080_v34 = vadd.f32 %v5079_v7, %v5037_v35 }
 0x339   :  { %v5081_v10 = vpop.f32.mrf.mxu1 }
 0x33a   :  { %v8898_v17 = vpop.f32.mrf.mxu0  ;;  %v5082_v47 = vadd.f32 %v5081_v10, %v5039_v41  ;;  %v5123_v8 = vadd.f32 %v5122_v25, %v5080_v34 }
 0x33b   :  { %v5083_v6 = vpop.f32.mrf.mxu1 }
 0x33c   :  { %v5084_v42 = vadd.f32 %v5083_v6, %v5041_v43  ;;  %v5125_v10 = vadd.f32 %v5124_v5, %v5082_v47  ;;  %v5338_v6 = vmul.f32 %v8917_v56, %v8917_v56  ;;  %v5344_v5 = vmul.f32 %v8923_v54, %v8923_v54 }
 0x33d   :  { %v5085_v13 = vpop.f32.mrf.mxu1 }
 0x33e   :  { %v5086_v7 = vadd.f32 %v5085_v13, %v5043_v37  ;;  %v5127_v22 = vadd.f32 %v5126_v14, %v5084_v42  ;;  %v5348_v13 = vadd.f32 %v5339_v51, %v5338_v6 }
 0x340   :  { %v5129_v19 = vadd.f32 %v8898_v17, %v5086_v7 }
 0x354   :  { %v6099_v11 = vpop.f32.mrf.mxu0 }
 0x356   :  { %v6100_v62 = vpop.f32.mrf.mxu0 }
 0x357   :  { %v6101_v46 = vadd.f32 %v6100_v62, %v6099_v11 }
 0x358   :  { %v6102_v29 = vpop.f32.mrf.mxu0 }
 0x359   :  { %v5209_v55 = vadd.f32 %v6101_v46, %v3160_v36 }
 0x35a   :  { %v6103_v32 = vpop.f32.mrf.mxu0 }
 0x35b   :  { %v6104_v52 = vadd.f32 %v6103_v32, %v6102_v29 }
 0x35d   :  { %v5212_v4 = vadd.f32 %v6104_v52, %v3160_v36 }
 0x374   :  { %v6143_v49 = vpop.f32.mrf.mxu0 }
 0x376   :  { %v6144_v50 = vpop.f32.mrf.mxu0 }
 0x377   :  { %v5165_v15 = vpop.f32.mrf.mxu1  ;;  %v6145_v62 = vadd.f32 %v6144_v50, %v6143_v49 }
 0x378   :  { %v8919_v3 = vadd.f32 %v5165_v15, %v5123_v8  ;;  %v6146_v25 = vpop.f32.mrf.mxu0 }
 0x379   :  { %v5167_v18 = vpop.f32.mrf.mxu1 }
 0x37a   :  { %v5340_v60 = vmul.f32 %v8919_v3, %v8919_v3  ;;  %v5168_v15 = vadd.f32 %v5167_v18, %v5125_v10  ;;  %v6147_v14 = vpop.f32.mrf.mxu0 }
 0x37b   :  { %v5169_v20 = vpop.f32.mrf.mxu1  ;;  %v6148_v23 = vadd.f32 %v6147_v14, %v6146_v25 }
 0x37c   :  { %v5170_v11 = vadd.f32 %v5169_v20, %v5127_v22  ;;  %v5341_v31 = vmul.f32 %v5168_v15, %v5168_v15  ;;  %v5349_v35 = vadd.f32 %v5348_v13, %v5340_v60 }
 0x37d   :  { %v8905_v58 = vpop.f32.mrf.mxu1 }
 0x37e   :  { %v5345_v18 = vmul.f32 %v5170_v11, %v5170_v11  ;;  %v5172_v20 = vadd.f32 %v8905_v58, %v5129_v19  ;;  %v5350_v40 = vadd.f32 %v5349_v35, %v5341_v31 }
 0x380   :  { %v5346_v63 = vmul.f32 %v5172_v20, %v5172_v20 }
 0x397   :  { %v6121_v30 = vpop.f32.mrf.mxu1 }
 0x399   :  { %v6122_v38 = vpop.f32.mrf.mxu1 }
 0x39a   :  { %v6123_v2 = vadd.f32 %v6122_v38, %v6121_v30  ;;  %v5356_v38 = vadd.f32 %v5344_v5, %v5343_v0 }
 0x39b   :  { %v6124_v12 = vpop.f32.mrf.mxu1 }
 0x39c   :  { %v5250_v61 = vadd.f32 %v6123_v2, %v5209_v55  ;;  %v5357_v49 = vadd.f32 %v5356_v38, %v5345_v18 }
 0x39d   :  { %v6125_v57 = vpop.f32.mrf.mxu1 }
 0x39e   :  { %v6126_v9 = vadd.f32 %v6125_v57, %v6124_v12  ;;  %v5291_v29 = vadd.f32 %v6145_v62, %v5250_v61  ;;  %v5358_v58 = vadd.f32 %v5357_v49, %v5346_v63 }
 0x3a0   :  { %v5253_v21 = vadd.f32 %v6126_v9, %v5212_v4 }
 0x3a2   :  { %v5294_v27 = vadd.f32 %v6148_v23, %v5253_v21 }
 0x3b7   :  { %v6165_v24 = vpop.f32.mrf.mxu1 }
 0x3b9   :  { %v6166_v26 = vpop.f32.mrf.mxu1 }
 0x3ba   :  { %v6167_v30 = vadd.f32 %v6166_v26, %v6165_v24 }
 0x3bb   :  { %v6168_v33 = vpop.f32.mrf.mxu1 }
 0x3bc   :  { %v5332_v32 = vadd.f32 %v6167_v30, %v5291_v29 }
 0x3bd   :  { %v6169_v39 = vpop.f32.mrf.mxu1 }
 0x3be   :  { %v6170_v17 = vadd.f32 %v6169_v39, %v6168_v33  ;;  %v5342_v34 = vmul.f32 %v5332_v32, %v5332_v32 }
 0x3c0   :  { %v5335_v59 = vadd.f32 %v6170_v17, %v5294_v27  ;;  %v5352_v41 = vsel %vm5351_vm2, %v5342_v34, 0.0 }
 0x3c1   :  { %v5353_v43 = vadd.f32 %v5352_v41, %v5350_v40 }
 0x3c2   :  { %v5347_v12 = vmul.f32 %v5335_v59, %v5335_v59 }
 0x3c3   :  { %5354 = vadd.xlane.f32.xlu0 %v5353_v43 }
 0x3c4   :  { %v5359_v44 = vsel %vm5351_vm2, %v5347_v12, 0.0 }
 0x3c5   :  { %v5360_v36 = vadd.f32 %v5359_v44, %v5358_v58 }
 0x3c7   :  { %5361 = vadd.xlane.f32.xlu0 %v5360_v36 }
 0x44c   :  { %v5355_v46 = vpop.xlane.xlu0 %5354 }
 0x44d   :  { %v5363_v16 = vmax.f32 %v5355_v46, 1e-24 }
 0x44f   :  { %6622 = vrsqrt.f32 %v5363_v16 }
 0x450   :  { %v5362_v47 = vpop.xlane.xlu0 %5361 }
 0x451   :  { %v5364_v42 = vmax.f32 %v5362_v47, 1e-24 }
 0x453   :  { %6624 = vrsqrt.f32 %v5364_v42 }
 0x45c   :  { %v6623_v8 = vpop.eup %6622 }
 0x45d   :  { %v5367_v50 = vmul.f32 %v6623_v8, %v8917_v56  ;;  %v5368_v53 = vmul.f32 %v6623_v8, %v8913_v45  ;;  %v5369_v2 = vmul.f32 %v6623_v8, %v8919_v3  ;;  %v5370_v48 = vmul.f32 %v6623_v8, %v5168_v15 }
 0x45e   :  { %v5371_v37 = vmul.f32 %v6623_v8, %v5332_v32 }
 0x45f   :  { %5377 = vst [vmem:[#allocation2] sm:$0xff] %v5367_v50  ;;  %5378 = vst [vmem:[#allocation2 + $0x8] sm:$0xff] %v5368_v53 }
 0x460   :  { %5379 = vst [vmem:[#allocation2 + $0x10] sm:$0xff] %v5369_v2  ;;  %5380 = vst [vmem:[#allocation2 + $0x18] sm:$0xff] %v5370_v48  ;;  %v6625_v57 = vpop.eup %6624 }
 0x461   :  { %5381 = vst.msk [vmem:[#allocation2 + $0x20] sm:$0xff] %vm5351_vm2, %v5371_v37  ;;  %v5372_v28 = vmul.f32 %v6625_v57, %v8926_v1  ;;  %v5373_v51 = vmul.f32 %v6625_v57, %v8923_v54  ;;  %v5374_v56 = vmul.f32 %v6625_v57, %v5170_v11  ;;  %v5375_v55 = vmul.f32 %v6625_v57, %v5172_v20 }
 0x462   :  { %v5376_v45 = vmul.f32 %v6625_v57, %v5335_v59 }
 0x463   :  { %5382 = vst [vmem:[#allocation2 + $0x28] sm:$0xff] %v5372_v28  ;;  %5383 = vst [vmem:[#allocation2 + $0x30] sm:$0xff] %v5373_v51 }
 0x464   :  { %5384 = vst [vmem:[#allocation2 + $0x38] sm:$0xff] %v5374_v56  ;;  %5385 = vst [vmem:[#allocation2 + $0x40] sm:$0xff] %v5375_v55 }
 0x465   :  { %5386 = vst.msk [vmem:[#allocation2 + $0x48] sm:$0xff] %vm5351_vm2, %v5376_v45 }
 0x466   :  { %6638 = shalt.err (!%p6635_p4)
}
 0x467   :  { %s6650_s13 = smov 640   ;;  %s6651_s14 = smov 40  }
 0x468   :  { %5398 = dma.vmem_to_hbm [thread:$0]  %s5393_s11, 1280, %s8955_s5, [#allocation3], %s6650_s13, %s6650_s13, %s6651_s14  }
 0x469   :  { %6647 = dma.done.wait [#allocation3], 1280  }
 0x46a   :  { %6648 = vsyncadd [#allocation3], 4294966016 }
 0x46b   :  { %5402 = vsyncpa [#allocation3], 1 }

</bundles_post_ra>
